<compile_context>
chip_gen: v7x
topology: tpu7x:2x2x1
jax: 0.10.0
libtpu: 0.0.40
codegen_flags: <defaults>
</compile_context>

<pallas_src>
import jax
import jax.numpy as jnp
from jax.experimental import pallas as pl
from jax.experimental.pallas import tpu as pltpu

_HIGHEST = jax.lax.Precision.HIGHEST


def _round_up(x, m):
    return ((x + m - 1) // m) * m


def _pick_batch_tile(B, T, p_pad):
    """Largest batch tile that divides B, is a multiple of 8 sublanes, and keeps
    the double-buffered output block comfortably inside VMEM (v7x has 64 MiB)."""
    if B < 16 or B % 8 != 0:
        return B  # single full-batch block (e.g. the tiny demo batch)
    tb = min(B, 512)
    while tb >= 8:
        if B % tb == 0 and 2 * T * tb * p_pad * 4 <= (8 << 20):
            return tb
        tb //= 2
    return B


def _lstm_layer_kernel(x_ref, wih_ref, whh_ref, b_ref, whr_ref, out_ref):
    """One direction of one LSTM(proj_size) layer over the full sequence.

    x_ref:   (Tx, TB, D_in)  input block; Tx == 1 => input constant over time.
    wih_ref: (D_in, 4H)      W_ih^T
    whh_ref: (P_pad, 4H)     W_hh^T zero-padded P -> P_pad rows
    b_ref:   (1, 4H)         b_ih + b_hh
    whr_ref: (H, P_pad)      W_hr^T zero-padded P -> P_pad cols
    out_ref: (T, TB, P_pad)  per-timestep projected hidden state
    """
    T = out_ref.shape[0]
    tb = out_ref.shape[1]
    p_pad = out_ref.shape[2]
    H = whr_ref.shape[0]
    const_input = x_ref.shape[0] == 1

    # Load weights / bias once; resident across the whole time loop.
    wih = wih_ref[...]
    whh = whh_ref[...]
    whr = whr_ref[...]
    b = b_ref[...]

    if const_input:
        # Decoder repeats the latent at every timestep: hoist its gate
        # contribution out of the recurrence.
        xg_const = jnp.dot(x_ref[0], wih, precision=_HIGHEST,
                           preferred_element_type=jnp.float32) + b

    def step(t, carry):
        h, c = carry
        if const_input:
            xg = xg_const
        else:
            xg = jnp.dot(x_ref[t], wih, precision=_HIGHEST,
                         preferred_element_type=jnp.float32) + b
        gates = xg + jnp.dot(h, whh, precision=_HIGHEST,
                             preferred_element_type=jnp.float32)
        i_g = jax.nn.sigmoid(gates[:, 0 * H:1 * H])
        f_g = jax.nn.sigmoid(gates[:, 1 * H:2 * H])
        g_g = jnp.tanh(gates[:, 2 * H:3 * H])
        o_g = jax.nn.sigmoid(gates[:, 3 * H:4 * H])
        c_new = f_g * c + i_g * g_g
        h_new = jnp.dot(o_g * jnp.tanh(c_new), whr, precision=_HIGHEST,
                        preferred_element_type=jnp.float32)
        out_ref[t] = h_new
        return h_new, c_new

    h0 = jnp.zeros((tb, p_pad), jnp.float32)
    c0 = jnp.zeros((tb, H), jnp.float32)
    jax.lax.fori_loop(0, T, step, (h0, c0), unroll=T <= 16)


def _run_lstm_layer(x_seq, wih_t, whh_t_pad, bias, whr_t_pad, out_length, batch_tile):
    tx, B, d_in = x_seq.shape
    H, p_pad = whr_t_pad.shape
    four_h = wih_t.shape[1]
    grid = (B // batch_tile,)

    return pl.pallas_call(
        _lstm_layer_kernel,
        out_shape=jax.ShapeDtypeStruct((out_length, B, p_pad), jnp.float32),
        grid_spec=pltpu.PrefetchScalarGridSpec(
            num_scalar_prefetch=0,
            grid=grid,
            in_specs=[
                # batch-tiled input sequence
                pl.BlockSpec((tx, batch_tile, d_in), lambda i: (0, i, 0)),
                # weights / bias pinned in VMEM across all grid steps
                pl.BlockSpec((d_in, four_h), lambda i: (0, 0)),
                pl.BlockSpec((p_pad, four_h), lambda i: (0, 0)),
                pl.BlockSpec((1, four_h), lambda i: (0, 0)),
                pl.BlockSpec((H, p_pad), lambda i: (0, 0)),
            ],
            out_specs=pl.BlockSpec((out_length, batch_tile, p_pad),
                                   lambda i: (0, i, 0)),
        ),
        compiler_params=pltpu.CompilerParams(
            dimension_semantics=("parallel",)),
    )(x_seq, wih_t, whh_t_pad, bias, whr_t_pad)


def _kernel_params(torch_params, output_size, p_pad):
    """Torch-layout (w_ih, w_hh, b_ih, b_hh, w_hr) -> transposed / padded kernel layout."""
    w_ih, w_hh, b_ih, b_hh, w_hr = torch_params
    wih_t = w_ih.T                                                     # (D_in, 4H)
    whh_t = jnp.zeros((p_pad, w_hh.shape[0]), jnp.float32).at[:output_size, :].set(w_hh.T)
    whr_t = jnp.zeros((w_hr.shape[1], p_pad), jnp.float32).at[:, :output_size].set(w_hr.T)
    bias = (b_ih + b_hh).reshape(1, -1)                                # (1, 4H)
    return wih_t, whh_t, bias, whr_t


def lstm_decoder_forward(latent, params, *, output_length, output_size,
                         hidden_size, num_layers, directions):
    """Pallas implementation of LSTMDecoder.forward. Returns (B, T, output_size)."""
    P = output_size
    p_pad = _round_up(P, 128)
    tb = _pick_batch_tile(latent.shape[0], output_length, p_pad)

    # Layer 0 input is the latent repeated over time -> pass it as (1, B, D) and
    # let the kernel hoist its contribution (never materialize the repeat).
    layer_in = latent[None, :, :]
    for layer in range(num_layers):
        dir_outs = []
        for d in range(directions):
            wih_t, whh_t, bias, whr_t = _kernel_params(params[(layer, d)], P, p_pad)
            if layer == 0:
                x_seq = layer_in          # constant over time: time reversal is a no-op
            else:
                x_seq = layer_in if d == 0 else jnp.flip(layer_in, axis=0)
            y_pad = _run_lstm_layer(x_seq, wih_t, whh_t, bias, whr_t,
                                    output_length, tb)        # (T, B, P_pad)
            y = y_pad[:, :, :P]
            if d == 1:
                y = jnp.flip(y, axis=0)   # reverse direction stores outputs back-to-front
            dir_outs.append(y)
        layer_in = dir_outs[0] if directions == 1 else jnp.concatenate(dir_outs, axis=-1)

    out = layer_in                        # (T, B, directions * P)
    if directions == 2:
        out = 0.5 * (out[..., :P] + out[..., P:])
    return jnp.transpose(out, (1, 0, 2))  # (B, T, P)


def init_lstm_params(key, latent_size, hidden_size, output_size, num_layers, directions):
    """Deterministic synthetic params matching torch nn.LSTM(..., proj_size=output_size)."""
    params = {}
    lim = 1.0 / jnp.sqrt(hidden_size)
    keys = jax.random.split(key, num_layers * directions * 5)
    idx = 0
    for layer in range(num_layers):
        d_in = latent_size if layer == 0 else directions * output_size
        for d in range(directions):
            ks = keys[idx:idx + 5]
            idx += 5
            w_ih = jax.random.uniform(ks[0], (4 * hidden_size, d_in), jnp.float32, -lim, lim)
            w_hh = jax.random.uniform(ks[1], (4 * hidden_size, output_size), jnp.float32, -lim, lim)
            b_ih = jax.random.uniform(ks[2], (4 * hidden_size,), jnp.float32, -lim, lim)
            b_hh = jax.random.uniform(ks[3], (4 * hidden_size,), jnp.float32, -lim, lim)
            w_hr = jax.random.uniform(ks[4], (output_size, hidden_size), jnp.float32, -lim, lim)
            params[(layer, d)] = (w_ih, w_hh, b_ih, b_hh, w_hr)
    return params


def reference_lstm_decoder(latent, params, *, output_length, output_size,
                           hidden_size, num_layers, directions):
    """Pure-JAX mirror of the torch module (LSTM with proj_size, gate order i,f,g,o)."""
    B = latent.shape[0]
    T, P, H = output_length, output_size, hidden_size
    layer_in = jnp.broadcast_to(latent[None], (T, B, latent.shape[1]))
    for layer in range(num_layers):
        outs = []
        for d in range(directions):
            w_ih, w_hh, b_ih, b_hh, w_hr = params[(layer, d)]
            xs = layer_in if d == 0 else jnp.flip(layer_in, axis=0)
            h = jnp.zeros((B, P), jnp.float32)
            c = jnp.zeros((B, H), jnp.float32)
            ys = []
            for t in range(T):
                g = (jnp.dot(xs[t], w_ih.T, precision=_HIGHEST)
                     + jnp.dot(h, w_hh.T, precision=_HIGHEST) + b_ih + b_hh)
                i_g = jax.nn.sigmoid(g[:, 0 * H:1 * H])
                f_g = jax.nn.sigmoid(g[:, 1 * H:2 * H])
                g_g = jnp.tanh(g[:, 2 * H:3 * H])
                o_g = jax.nn.sigmoid(g[:, 3 * H:4 * H])
                c = f_g * c + i_g * g_g
                h = jnp.dot(o_g * jnp.tanh(c), w_hr.T, precision=_HIGHEST)
                ys.append(h)
            y = jnp.stack(ys, axis=0)
            if d == 1:
                y = jnp.flip(y, axis=0)
            outs.append(y)
        layer_in = outs[0] if directions == 1 else jnp.concatenate(outs, axis=-1)
    out = layer_in
    if directions == 2:
        out = 0.5 * (out[..., :P] + out[..., P:])
    return jnp.transpose(out, (1, 0, 2))


if __name__ == "__main__":
    batch = 2
    latent_size = 8
    output_length = 8     # length of the reconstructed series
    output_size = 4       # dimension of the reconstructed series
    hidden_size = 32      # 4*H = 128 -> lane-aligned gate dim
    num_layers = 2        # stacked LSTM
    directions = 2        # bi-directional

    key = jax.random.PRNGKey(0)
    k_lat, k_par = jax.random.split(key)
    latent = jax.random.normal(k_lat, (batch, latent_size), jnp.float32)
    params = init_lstm_params(k_par, latent_size, hidden_size, output_size,
                              num_layers, directions)

    out = lstm_decoder_forward(latent, params,
                               output_length=output_length,
                               output_size=output_size,
                               hidden_size=hidden_size,
                               num_layers=num_layers,
                               directions=directions)
    out = jax.block_until_ready(out)

    ref = reference_lstm_decoder(latent, params,
                                 output_length=output_length,
                                 output_size=output_size,
                                 hidden_size=hidden_size,
                                 num_layers=num_layers,
                                 directions=directions)

    assert out.shape == (batch, output_length, output_size)
    assert jnp.allclose(out, ref, atol=1e-4, rtol=1e-4), "mismatch vs JAX reference"
    print("KERNEL_OK")
</pallas_src>

<mosaic_0001>
module attributes {stable_mosaic.version = 11 : i64} {
  func.func @_lstm_layer_kernel(%arg0: i32, %arg1: memref<1x2x8xf32, #tpu.memory_space<vmem>>, %arg2: memref<8x128xf32, #tpu.memory_space<vmem>>, %arg3: memref<128x128xf32, #tpu.memory_space<vmem>>, %arg4: memref<1x128xf32, #tpu.memory_space<vmem>>, %arg5: memref<32x128xf32, #tpu.memory_space<vmem>>, %arg6: memref<8x2x128xf32, #tpu.memory_space<vmem>>) attributes {dimension_semantics = [#tpu.dimension_semantics<parallel>], iteration_bounds = array<i64: 1>, scalar_prefetch = 0 : i64, scratch_operands = 0 : i64, tpu.core_type = #tpu.core_type<tc>, window_params = [{transform_indices = @transform_0, window_bounds = array<i64: 1, 2, 8>}, {pipeline_mode = #tpu.pipeline_mode<synchronous>, transform_indices = @transform_1, window_bounds = array<i64: 8, 128>}, {pipeline_mode = #tpu.pipeline_mode<synchronous>, transform_indices = @transform_2, window_bounds = array<i64: 128, 128>}, {pipeline_mode = #tpu.pipeline_mode<synchronous>, transform_indices = @transform_3, window_bounds = array<i64: 1, 128>}, {pipeline_mode = #tpu.pipeline_mode<synchronous>, transform_indices = @transform_4, window_bounds = array<i64: 32, 128>}, {transform_indices = @transform_5, window_bounds = array<i64: 8, 2, 128>}]} {
    %c0 = arith.constant 0 : index
    %c0_0 = arith.constant 0 : index
    %0 = vector.load %arg2[%c0, %c0_0] : memref<8x128xf32, #tpu.memory_space<vmem>>, vector<8x128xf32>
    %c0_1 = arith.constant 0 : index
    %c0_2 = arith.constant 0 : index
    %1 = vector.load %arg3[%c0_1, %c0_2] : memref<128x128xf32, #tpu.memory_space<vmem>>, vector<128x128xf32>
    %c0_3 = arith.constant 0 : index
    %c0_4 = arith.constant 0 : index
    %2 = vector.load %arg5[%c0_3, %c0_4] : memref<32x128xf32, #tpu.memory_space<vmem>>, vector<32x128xf32>
    %c0_5 = arith.constant 0 : index
    %c0_6 = arith.constant 0 : index
    %3 = vector.load %arg4[%c0_5, %c0_6] : memref<1x128xf32, #tpu.memory_space<vmem>>, vector<1x128xf32>
    %c0_7 = arith.constant 0 : index
    %c0_8 = arith.constant 0 : index
    %c0_9 = arith.constant 0 : index
    %4 = vector.load %arg1[%c0_7, %c0_8, %c0_9] : memref<1x2x8xf32, #tpu.memory_space<vmem>>, vector<1x2x8xf32>
    %5 = vector.shape_cast %4 : vector<1x2x8xf32> to vector<2x8xf32>
    %cst = arith.constant dense<0.000000e+00> : vector<2x128xf32>
    %6 = tpu.matmul %5, %0, %cst {dimension_numbers = #tpu.dot_dimension_numbers<[1], [0], [0], [1], [0, 0, 1, 1], [], []>, precision = #tpu.contract_precision<fp32>} : vector<2x8xf32>, vector<8x128xf32>, vector<2x128xf32> -> vector<2x128xf32>
    %7 = vector.broadcast %3 : vector<1x128xf32> to vector<2x128xf32>
    %8 = arith.addf %6, %7 : vector<2x128xf32>
    %cst_10 = arith.constant 0.000000e+00 : f32
    %9 = vector.broadcast %cst_10 : f32 to vector<2x128xf32>
    %cst_11 = arith.constant 0.000000e+00 : f32
    %10 = vector.broadcast %cst_11 : f32 to vector<2x32xf32>
    %c0_i32 = arith.constant 0 : i32
    %cst_12 = arith.constant dense<0.000000e+00> : vector<2x128xf32>
    %11 = tpu.matmul %9, %1, %cst_12 {dimension_numbers = #tpu.dot_dimension_numbers<[1], [0], [0], [1], [0, 0, 1, 1], [], []>, precision = #tpu.contract_precision<fp32>} : vector<2x128xf32>, vector<128x128xf32>, vector<2x128xf32> -> vector<2x128xf32>
    %12 = arith.addf %8, %11 : vector<2x128xf32>
    %13 = vector.extract_strided_slice %12 {offsets = [0, 0], sizes = [2, 32], strides = [1, 1]} : vector<2x128xf32> to vector<2x32xf32>
    %14 = arith.negf %13 : vector<2x32xf32>
    %15 = math.exp %14 : vector<2x32xf32>
    %cst_13 = arith.constant 1.000000e+00 : f32
    %16 = vector.broadcast %cst_13 : f32 to vector<2x32xf32>
    %17 = arith.addf %16, %15 : vector<2x32xf32>
    %18 = arith.divf %16, %17 : vector<2x32xf32>
    %19 = vector.extract_strided_slice %12 {offsets = [0, 32], sizes = [2, 32], strides = [1, 1]} : vector<2x128xf32> to vector<2x32xf32>
    %20 = arith.negf %19 : vector<2x32xf32>
    %21 = math.exp %20 : vector<2x32xf32>
    %cst_14 = arith.constant 1.000000e+00 : f32
    %22 = vector.broadcast %cst_14 : f32 to vector<2x32xf32>
    %23 = arith.addf %22, %21 : vector<2x32xf32>
    %24 = arith.divf %22, %23 : vector<2x32xf32>
    %25 = vector.extract_strided_slice %12 {offsets = [0, 64], sizes = [2, 32], strides = [1, 1]} : vector<2x128xf32> to vector<2x32xf32>
    %26 = math.tanh %25 : vector<2x32xf32>
    %27 = vector.extract_strided_slice %12 {offsets = [0, 96], sizes = [2, 32], strides = [1, 1]} : vector<2x128xf32> to vector<2x32xf32>
    %28 = arith.negf %27 : vector<2x32xf32>
    %29 = math.exp %28 : vector<2x32xf32>
    %cst_15 = arith.constant 1.000000e+00 : f32
    %30 = vector.broadcast %cst_15 : f32 to vector<2x32xf32>
    %31 = arith.addf %30, %29 : vector<2x32xf32>
    %32 = arith.divf %30, %31 : vector<2x32xf32>
    %33 = arith.mulf %24, %10 : vector<2x32xf32>
    %34 = arith.mulf %18, %26 : vector<2x32xf32>
    %35 = arith.addf %33, %34 : vector<2x32xf32>
    %36 = math.tanh %35 : vector<2x32xf32>
    %37 = arith.mulf %32, %36 : vector<2x32xf32>
    %cst_16 = arith.constant dense<0.000000e+00> : vector<2x128xf32>
    %38 = tpu.matmul %37, %2, %cst_16 {dimension_numbers = #tpu.dot_dimension_numbers<[1], [0], [0], [1], [0, 0, 1, 1], [], []>, precision = #tpu.contract_precision<fp32>} : vector<2x32xf32>, vector<32x128xf32>, vector<2x128xf32> -> vector<2x128xf32>
    %39 = arith.index_cast %c0_i32 : i32 to index
    %c0_17 = arith.constant 0 : index
    %c0_18 = arith.constant 0 : index
    %40 = vector.load %arg6[%39, %c0_17, %c0_18] : memref<8x2x128xf32, #tpu.memory_space<vmem>>, vector<1x2x128xf32>
    %41 = vector.shape_cast %40 : vector<1x2x128xf32> to vector<2x128xf32>
    %42 = vector.shape_cast %38 : vector<2x128xf32> to vector<1x2x128xf32>
    tpu.vector_store %arg6[%39, %c0_17, %c0_18], %42 {strides = array<i32>} : memref<8x2x128xf32, #tpu.memory_space<vmem>>, vector<1x2x128xf32>,
    %c1_i32 = arith.constant 1 : i32
    %cst_19 = arith.constant dense<0.000000e+00> : vector<2x128xf32>
    %43 = tpu.matmul %38, %1, %cst_19 {dimension_numbers = #tpu.dot_dimension_numbers<[1], [0], [0], [1], [0, 0, 1, 1], [], []>, precision = #tpu.contract_precision<fp32>} : vector<2x128xf32>, vector<128x128xf32>, vector<2x128xf32> -> vector<2x128xf32>
    %44 = arith.addf %8, %43 : vector<2x128xf32>
    %45 = vector.extract_strided_slice %44 {offsets = [0, 0], sizes = [2, 32], strides = [1, 1]} : vector<2x128xf32> to vector<2x32xf32>
    %46 = arith.negf %45 : vector<2x32xf32>
    %47 = math.exp %46 : vector<2x32xf32>
    %cst_20 = arith.constant 1.000000e+00 : f32
    %48 = vector.broadcast %cst_20 : f32 to vector<2x32xf32>
    %49 = arith.addf %48, %47 : vector<2x32xf32>
    %50 = arith.divf %48, %49 : vector<2x32xf32>
    %51 = vector.extract_strided_slice %44 {offsets = [0, 32], sizes = [2, 32], strides = [1, 1]} : vector<2x128xf32> to vector<2x32xf32>
    %52 = arith.negf %51 : vector<2x32xf32>
    %53 = math.exp %52 : vector<2x32xf32>
    %cst_21 = arith.constant 1.000000e+00 : f32
    %54 = vector.broadcast %cst_21 : f32 to vector<2x32xf32>
    %55 = arith.addf %54, %53 : vector<2x32xf32>
    %56 = arith.divf %54, %55 : vector<2x32xf32>
    %57 = vector.extract_strided_slice %44 {offsets = [0, 64], sizes = [2, 32], strides = [1, 1]} : vector<2x128xf32> to vector<2x32xf32>
    %58 = math.tanh %57 : vector<2x32xf32>
    %59 = vector.extract_strided_slice %44 {offsets = [0, 96], sizes = [2, 32], strides = [1, 1]} : vector<2x128xf32> to vector<2x32xf32>
    %60 = arith.negf %59 : vector<2x32xf32>
    %61 = math.exp %60 : vector<2x32xf32>
    %cst_22 = arith.constant 1.000000e+00 : f32
    %62 = vector.broadcast %cst_22 : f32 to vector<2x32xf32>
    %63 = arith.addf %62, %61 : vector<2x32xf32>
    %64 = arith.divf %62, %63 : vector<2x32xf32>
    %65 = arith.mulf %56, %35 : vector<2x32xf32>
    %66 = arith.mulf %50, %58 : vector<2x32xf32>
    %67 = arith.addf %65, %66 : vector<2x32xf32>
    %68 = math.tanh %67 : vector<2x32xf32>
    %69 = arith.mulf %64, %68 : vector<2x32xf32>
    %cst_23 = arith.constant dense<0.000000e+00> : vector<2x128xf32>
    %70 = tpu.matmul %69, %2, %cst_23 {dimension_numbers = #tpu.dot_dimension_numbers<[1], [0], [0], [1], [0, 0, 1, 1], [], []>, precision = #tpu.contract_precision<fp32>} : vector<2x32xf32>, vector<32x128xf32>, vector<2x128xf32> -> vector<2x128xf32>
    %71 = arith.index_cast %c1_i32 : i32 to index
    %c0_24 = arith.constant 0 : index
    %c0_25 = arith.constant 0 : index
    %72 = vector.load %arg6[%71, %c0_24, %c0_25] : memref<8x2x128xf32, #tpu.memory_space<vmem>>, vector<1x2x128xf32>
    %73 = vector.shape_cast %72 : vector<1x2x128xf32> to vector<2x128xf32>
    %74 = vector.shape_cast %70 : vector<2x128xf32> to vector<1x2x128xf32>
    tpu.vector_store %arg6[%71, %c0_24, %c0_25], %74 {strides = array<i32>} : memref<8x2x128xf32, #tpu.memory_space<vmem>>, vector<1x2x128xf32>,
    %c2_i32 = arith.constant 2 : i32
    %cst_26 = arith.constant dense<0.000000e+00> : vector<2x128xf32>
    %75 = tpu.matmul %70, %1, %cst_26 {dimension_numbers = #tpu.dot_dimension_numbers<[1], [0], [0], [1], [0, 0, 1, 1], [], []>, precision = #tpu.contract_precision<fp32>} : vector<2x128xf32>, vector<128x128xf32>, vector<2x128xf32> -> vector<2x128xf32>
    %76 = arith.addf %8, %75 : vector<2x128xf32>
    %77 = vector.extract_strided_slice %76 {offsets = [0, 0], sizes = [2, 32], strides = [1, 1]} : vector<2x128xf32> to vector<2x32xf32>
    %78 = arith.negf %77 : vector<2x32xf32>
    %79 = math.exp %78 : vector<2x32xf32>
    %cst_27 = arith.constant 1.000000e+00 : f32
    %80 = vector.broadcast %cst_27 : f32 to vector<2x32xf32>
    %81 = arith.addf %80, %79 : vector<2x32xf32>
    %82 = arith.divf %80, %81 : vector<2x32xf32>
    %83 = vector.extract_strided_slice %76 {offsets = [0, 32], sizes = [2, 32], strides = [1, 1]} : vector<2x128xf32> to vector<2x32xf32>
    %84 = arith.negf %83 : vector<2x32xf32>
    %85 = math.exp %84 : vector<2x32xf32>
    %cst_28 = arith.constant 1.000000e+00 : f32
    %86 = vector.broadcast %cst_28 : f32 to vector<2x32xf32>
    %87 = arith.addf %86, %85 : vector<2x32xf32>
    %88 = arith.divf %86, %87 : vector<2x32xf32>
    %89 = vector.extract_strided_slice %76 {offsets = [0, 64], sizes = [2, 32], strides = [1, 1]} : vector<2x128xf32> to vector<2x32xf32>
    %90 = math.tanh %89 : vector<2x32xf32>
    %91 = vector.extract_strided_slice %76 {offsets = [0, 96], sizes = [2, 32], strides = [1, 1]} : vector<2x128xf32> to vector<2x32xf32>
    %92 = arith.negf %91 : vector<2x32xf32>
    %93 = math.exp %92 : vector<2x32xf32>
    %cst_29 = arith.constant 1.000000e+00 : f32
    %94 = vector.broadcast %cst_29 : f32 to vector<2x32xf32>
    %95 = arith.addf %94, %93 : vector<2x32xf32>
    %96 = arith.divf %94, %95 : vector<2x32xf32>
    %97 = arith.mulf %88, %67 : vector<2x32xf32>
    %98 = arith.mulf %82, %90 : vector<2x32xf32>
    %99 = arith.addf %97, %98 : vector<2x32xf32>
    %100 = math.tanh %99 : vector<2x32xf32>
    %101 = arith.mulf %96, %100 : vector<2x32xf32>
    %cst_30 = arith.constant dense<0.000000e+00> : vector<2x128xf32>
    %102 = tpu.matmul %101, %2, %cst_30 {dimension_numbers = #tpu.dot_dimension_numbers<[1], [0], [0], [1], [0, 0, 1, 1], [], []>, precision = #tpu.contract_precision<fp32>} : vector<2x32xf32>, vector<32x128xf32>, vector<2x128xf32> -> vector<2x128xf32>
    %103 = arith.index_cast %c2_i32 : i32 to index
    %c0_31 = arith.constant 0 : index
    %c0_32 = arith.constant 0 : index
    %104 = vector.load %arg6[%103, %c0_31, %c0_32] : memref<8x2x128xf32, #tpu.memory_space<vmem>>, vector<1x2x128xf32>
    %105 = vector.shape_cast %104 : vector<1x2x128xf32> to vector<2x128xf32>
    %106 = vector.shape_cast %102 : vector<2x128xf32> to vector<1x2x128xf32>
    tpu.vector_store %arg6[%103, %c0_31, %c0_32], %106 {strides = array<i32>} : memref<8x2x128xf32, #tpu.memory_space<vmem>>, vector<1x2x128xf32>,
    %c3_i32 = arith.constant 3 : i32
    %cst_33 = arith.constant dense<0.000000e+00> : vector<2x128xf32>
    %107 = tpu.matmul %102, %1, %cst_33 {dimension_numbers = #tpu.dot_dimension_numbers<[1], [0], [0], [1], [0, 0, 1, 1], [], []>, precision = #tpu.contract_precision<fp32>} : vector<2x128xf32>, vector<128x128xf32>, vector<2x128xf32> -> vector<2x128xf32>
    %108 = arith.addf %8, %107 : vector<2x128xf32>
    %109 = vector.extract_strided_slice %108 {offsets = [0, 0], sizes = [2, 32], strides = [1, 1]} : vector<2x128xf32> to vector<2x32xf32>
    %110 = arith.negf %109 : vector<2x32xf32>
    %111 = math.exp %110 : vector<2x32xf32>
    %cst_34 = arith.constant 1.000000e+00 : f32
    %112 = vector.broadcast %cst_34 : f32 to vector<2x32xf32>
    %113 = arith.addf %112, %111 : vector<2x32xf32>
    %114 = arith.divf %112, %113 : vector<2x32xf32>
    %115 = vector.extract_strided_slice %108 {offsets = [0, 32], sizes = [2, 32], strides = [1, 1]} : vector<2x128xf32> to vector<2x32xf32>
    %116 = arith.negf %115 : vector<2x32xf32>
    %117 = math.exp %116 : vector<2x32xf32>
    %cst_35 = arith.constant 1.000000e+00 : f32
    %118 = vector.broadcast %cst_35 : f32 to vector<2x32xf32>
    %119 = arith.addf %118, %117 : vector<2x32xf32>
    %120 = arith.divf %118, %119 : vector<2x32xf32>
    %121 = vector.extract_strided_slice %108 {offsets = [0, 64], sizes = [2, 32], strides = [1, 1]} : vector<2x128xf32> to vector<2x32xf32>
    %122 = math.tanh %121 : vector<2x32xf32>
    %123 = vector.extract_strided_slice %108 {offsets = [0, 96], sizes = [2, 32], strides = [1, 1]} : vector<2x128xf32> to vector<2x32xf32>
    %124 = arith.negf %123 : vector<2x32xf32>
    %125 = math.exp %124 : vector<2x32xf32>
    %cst_36 = arith.constant 1.000000e+00 : f32
    %126 = vector.broadcast %cst_36 : f32 to vector<2x32xf32>
    %127 = arith.addf %126, %125 : vector<2x32xf32>
    %128 = arith.divf %126, %127 : vector<2x32xf32>
    %129 = arith.mulf %120, %99 : vector<2x32xf32>
    %130 = arith.mulf %114, %122 : vector<2x32xf32>
    %131 = arith.addf %129, %130 : vector<2x32xf32>
    %132 = math.tanh %131 : vector<2x32xf32>
    %133 = arith.mulf %128, %132 : vector<2x32xf32>
    %cst_37 = arith.constant dense<0.000000e+00> : vector<2x128xf32>
    %134 = tpu.matmul %133, %2, %cst_37 {dimension_numbers = #tpu.dot_dimension_numbers<[1], [0], [0], [1], [0, 0, 1, 1], [], []>, precision = #tpu.contract_precision<fp32>} : vector<2x32xf32>, vector<32x128xf32>, vector<2x128xf32> -> vector<2x128xf32>
    %135 = arith.index_cast %c3_i32 : i32 to index
    %c0_38 = arith.constant 0 : index
    %c0_39 = arith.constant 0 : index
    %136 = vector.load %arg6[%135, %c0_38, %c0_39] : memref<8x2x128xf32, #tpu.memory_space<vmem>>, vector<1x2x128xf32>
    %137 = vector.shape_cast %136 : vector<1x2x128xf32> to vector<2x128xf32>
    %138 = vector.shape_cast %134 : vector<2x128xf32> to vector<1x2x128xf32>
    tpu.vector_store %arg6[%135, %c0_38, %c0_39], %138 {strides = array<i32>} : memref<8x2x128xf32, #tpu.memory_space<vmem>>, vector<1x2x128xf32>,
    %c4_i32 = arith.constant 4 : i32
    %cst_40 = arith.constant dense<0.000000e+00> : vector<2x128xf32>
    %139 = tpu.matmul %134, %1, %cst_40 {dimension_numbers = #tpu.dot_dimension_numbers<[1], [0], [0], [1], [0, 0, 1, 1], [], []>, precision = #tpu.contract_precision<fp32>} : vector<2x128xf32>, vector<128x128xf32>, vector<2x128xf32> -> vector<2x128xf32>
    %140 = arith.addf %8, %139 : vector<2x128xf32>
    %141 = vector.extract_strided_slice %140 {offsets = [0, 0], sizes = [2, 32], strides = [1, 1]} : vector<2x128xf32> to vector<2x32xf32>
    %142 = arith.negf %141 : vector<2x32xf32>
    %143 = math.exp %142 : vector<2x32xf32>
    %cst_41 = arith.constant 1.000000e+00 : f32
    %144 = vector.broadcast %cst_41 : f32 to vector<2x32xf32>
    %145 = arith.addf %144, %143 : vector<2x32xf32>
    %146 = arith.divf %144, %145 : vector<2x32xf32>
    %147 = vector.extract_strided_slice %140 {offsets = [0, 32], sizes = [2, 32], strides = [1, 1]} : vector<2x128xf32> to vector<2x32xf32>
    %148 = arith.negf %147 : vector<2x32xf32>
    %149 = math.exp %148 : vector<2x32xf32>
    %cst_42 = arith.constant 1.000000e+00 : f32
    %150 = vector.broadcast %cst_42 : f32 to vector<2x32xf32>
    %151 = arith.addf %150, %149 : vector<2x32xf32>
    %152 = arith.divf %150, %151 : vector<2x32xf32>
    %153 = vector.extract_strided_slice %140 {offsets = [0, 64], sizes = [2, 32], strides = [1, 1]} : vector<2x128xf32> to vector<2x32xf32>
    %154 = math.tanh %153 : vector<2x32xf32>
    %155 = vector.extract_strided_slice %140 {offsets = [0, 96], sizes = [2, 32], strides = [1, 1]} : vector<2x128xf32> to vector<2x32xf32>
    %156 = arith.negf %155 : vector<2x32xf32>
    %157 = math.exp %156 : vector<2x32xf32>
    %cst_43 = arith.constant 1.000000e+00 : f32
    %158 = vector.broadcast %cst_43 : f32 to vector<2x32xf32>
    %159 = arith.addf %158, %157 : vector<2x32xf32>
    %160 = arith.divf %158, %159 : vector<2x32xf32>
    %161 = arith.mulf %152, %131 : vector<2x32xf32>
    %162 = arith.mulf %146, %154 : vector<2x32xf32>
    %163 = arith.addf %161, %162 : vector<2x32xf32>
    %164 = math.tanh %163 : vector<2x32xf32>
    %165 = arith.mulf %160, %164 : vector<2x32xf32>
    %cst_44 = arith.constant dense<0.000000e+00> : vector<2x128xf32>
    %166 = tpu.matmul %165, %2, %cst_44 {dimension_numbers = #tpu.dot_dimension_numbers<[1], [0], [0], [1], [0, 0, 1, 1], [], []>, precision = #tpu.contract_precision<fp32>} : vector<2x32xf32>, vector<32x128xf32>, vector<2x128xf32> -> vector<2x128xf32>
    %167 = arith.index_cast %c4_i32 : i32 to index
    %c0_45 = arith.constant 0 : index
    %c0_46 = arith.constant 0 : index
    %168 = vector.load %arg6[%167, %c0_45, %c0_46] : memref<8x2x128xf32, #tpu.memory_space<vmem>>, vector<1x2x128xf32>
    %169 = vector.shape_cast %168 : vector<1x2x128xf32> to vector<2x128xf32>
    %170 = vector.shape_cast %166 : vector<2x128xf32> to vector<1x2x128xf32>
    tpu.vector_store %arg6[%167, %c0_45, %c0_46], %170 {strides = array<i32>} : memref<8x2x128xf32, #tpu.memory_space<vmem>>, vector<1x2x128xf32>,
    %c5_i32 = arith.constant 5 : i32
    %cst_47 = arith.constant dense<0.000000e+00> : vector<2x128xf32>
    %171 = tpu.matmul %166, %1, %cst_47 {dimension_numbers = #tpu.dot_dimension_numbers<[1], [0], [0], [1], [0, 0, 1, 1], [], []>, precision = #tpu.contract_precision<fp32>} : vector<2x128xf32>, vector<128x128xf32>, vector<2x128xf32> -> vector<2x128xf32>
    %172 = arith.addf %8, %171 : vector<2x128xf32>
    %173 = vector.extract_strided_slice %172 {offsets = [0, 0], sizes = [2, 32], strides = [1, 1]} : vector<2x128xf32> to vector<2x32xf32>
    %174 = arith.negf %173 : vector<2x32xf32>
    %175 = math.exp %174 : vector<2x32xf32>
    %cst_48 = arith.constant 1.000000e+00 : f32
    %176 = vector.broadcast %cst_48 : f32 to vector<2x32xf32>
    %177 = arith.addf %176, %175 : vector<2x32xf32>
    %178 = arith.divf %176, %177 : vector<2x32xf32>
    %179 = vector.extract_strided_slice %172 {offsets = [0, 32], sizes = [2, 32], strides = [1, 1]} : vector<2x128xf32> to vector<2x32xf32>
    %180 = arith.negf %179 : vector<2x32xf32>
    %181 = math.exp %180 : vector<2x32xf32>
    %cst_49 = arith.constant 1.000000e+00 : f32
    %182 = vector.broadcast %cst_49 : f32 to vector<2x32xf32>
    %183 = arith.addf %182, %181 : vector<2x32xf32>
    %184 = arith.divf %182, %183 : vector<2x32xf32>
    %185 = vector.extract_strided_slice %172 {offsets = [0, 64], sizes = [2, 32], strides = [1, 1]} : vector<2x128xf32> to vector<2x32xf32>
    %186 = math.tanh %185 : vector<2x32xf32>
    %187 = vector.extract_strided_slice %172 {offsets = [0, 96], sizes = [2, 32], strides = [1, 1]} : vector<2x128xf32> to vector<2x32xf32>
    %188 = arith.negf %187 : vector<2x32xf32>
    %189 = math.exp %188 : vector<2x32xf32>
    %cst_50 = arith.constant 1.000000e+00 : f32
    %190 = vector.broadcast %cst_50 : f32 to vector<2x32xf32>
    %191 = arith.addf %190, %189 : vector<2x32xf32>
    %192 = arith.divf %190, %191 : vector<2x32xf32>
    %193 = arith.mulf %184, %163 : vector<2x32xf32>
    %194 = arith.mulf %178, %186 : vector<2x32xf32>
    %195 = arith.addf %193, %194 : vector<2x32xf32>
    %196 = math.tanh %195 : vector<2x32xf32>
    %197 = arith.mulf %192, %196 : vector<2x32xf32>
    %cst_51 = arith.constant dense<0.000000e+00> : vector<2x128xf32>
    %198 = tpu.matmul %197, %2, %cst_51 {dimension_numbers = #tpu.dot_dimension_numbers<[1], [0], [0], [1], [0, 0, 1, 1], [], []>, precision = #tpu.contract_precision<fp32>} : vector<2x32xf32>, vector<32x128xf32>, vector<2x128xf32> -> vector<2x128xf32>
    %199 = arith.index_cast %c5_i32 : i32 to index
    %c0_52 = arith.constant 0 : index
    %c0_53 = arith.constant 0 : index
    %200 = vector.load %arg6[%199, %c0_52, %c0_53] : memref<8x2x128xf32, #tpu.memory_space<vmem>>, vector<1x2x128xf32>
    %201 = vector.shape_cast %200 : vector<1x2x128xf32> to vector<2x128xf32>
    %202 = vector.shape_cast %198 : vector<2x128xf32> to vector<1x2x128xf32>
    tpu.vector_store %arg6[%199, %c0_52, %c0_53], %202 {strides = array<i32>} : memref<8x2x128xf32, #tpu.memory_space<vmem>>, vector<1x2x128xf32>,
    %c6_i32 = arith.constant 6 : i32
    %cst_54 = arith.constant dense<0.000000e+00> : vector<2x128xf32>
    %203 = tpu.matmul %198, %1, %cst_54 {dimension_numbers = #tpu.dot_dimension_numbers<[1], [0], [0], [1], [0, 0, 1, 1], [], []>, precision = #tpu.contract_precision<fp32>} : vector<2x128xf32>, vector<128x128xf32>, vector<2x128xf32> -> vector<2x128xf32>
    %204 = arith.addf %8, %203 : vector<2x128xf32>
    %205 = vector.extract_strided_slice %204 {offsets = [0, 0], sizes = [2, 32], strides = [1, 1]} : vector<2x128xf32> to vector<2x32xf32>
    %206 = arith.negf %205 : vector<2x32xf32>
    %207 = math.exp %206 : vector<2x32xf32>
    %cst_55 = arith.constant 1.000000e+00 : f32
    %208 = vector.broadcast %cst_55 : f32 to vector<2x32xf32>
    %209 = arith.addf %208, %207 : vector<2x32xf32>
    %210 = arith.divf %208, %209 : vector<2x32xf32>
    %211 = vector.extract_strided_slice %204 {offsets = [0, 32], sizes = [2, 32], strides = [1, 1]} : vector<2x128xf32> to vector<2x32xf32>
    %212 = arith.negf %211 : vector<2x32xf32>
    %213 = math.exp %212 : vector<2x32xf32>
    %cst_56 = arith.constant 1.000000e+00 : f32
    %214 = vector.broadcast %cst_56 : f32 to vector<2x32xf32>
    %215 = arith.addf %214, %213 : vector<2x32xf32>
    %216 = arith.divf %214, %215 : vector<2x32xf32>
    %217 = vector.extract_strided_slice %204 {offsets = [0, 64], sizes = [2, 32], strides = [1, 1]} : vector<2x128xf32> to vector<2x32xf32>
    %218 = math.tanh %217 : vector<2x32xf32>
    %219 = vector.extract_strided_slice %204 {offsets = [0, 96], sizes = [2, 32], strides = [1, 1]} : vector<2x128xf32> to vector<2x32xf32>
    %220 = arith.negf %219 : vector<2x32xf32>
    %221 = math.exp %220 : vector<2x32xf32>
    %cst_57 = arith.constant 1.000000e+00 : f32
    %222 = vector.broadcast %cst_57 : f32 to vector<2x32xf32>
    %223 = arith.addf %222, %221 : vector<2x32xf32>
    %224 = arith.divf %222, %223 : vector<2x32xf32>
    %225 = arith.mulf %216, %195 : vector<2x32xf32>
    %226 = arith.mulf %210, %218 : vector<2x32xf32>
    %227 = arith.addf %225, %226 : vector<2x32xf32>
    %228 = math.tanh %227 : vector<2x32xf32>
    %229 = arith.mulf %224, %228 : vector<2x32xf32>
    %cst_58 = arith.constant dense<0.000000e+00> : vector<2x128xf32>
    %230 = tpu.matmul %229, %2, %cst_58 {dimension_numbers = #tpu.dot_dimension_numbers<[1], [0], [0], [1], [0, 0, 1, 1], [], []>, precision = #tpu.contract_precision<fp32>} : vector<2x32xf32>, vector<32x128xf32>, vector<2x128xf32> -> vector<2x128xf32>
    %231 = arith.index_cast %c6_i32 : i32 to index
    %c0_59 = arith.constant 0 : index
    %c0_60 = arith.constant 0 : index
    %232 = vector.load %arg6[%231, %c0_59, %c0_60] : memref<8x2x128xf32, #tpu.memory_space<vmem>>, vector<1x2x128xf32>
    %233 = vector.shape_cast %232 : vector<1x2x128xf32> to vector<2x128xf32>
    %234 = vector.shape_cast %230 : vector<2x128xf32> to vector<1x2x128xf32>
    tpu.vector_store %arg6[%231, %c0_59, %c0_60], %234 {strides = array<i32>} : memref<8x2x128xf32, #tpu.memory_space<vmem>>, vector<1x2x128xf32>,
    %c7_i32 = arith.constant 7 : i32
    %cst_61 = arith.constant dense<0.000000e+00> : vector<2x128xf32>
    %235 = tpu.matmul %230, %1, %cst_61 {dimension_numbers = #tpu.dot_dimension_numbers<[1], [0], [0], [1], [0, 0, 1, 1], [], []>, precision = #tpu.contract_precision<fp32>} : vector<2x128xf32>, vector<128x128xf32>, vector<2x128xf32> -> vector<2x128xf32>
    %236 = arith.addf %8, %235 : vector<2x128xf32>
    %237 = vector.extract_strided_slice %236 {offsets = [0, 0], sizes = [2, 32], strides = [1, 1]} : vector<2x128xf32> to vector<2x32xf32>
    %238 = arith.negf %237 : vector<2x32xf32>
    %239 = math.exp %238 : vector<2x32xf32>
    %cst_62 = arith.constant 1.000000e+00 : f32
    %240 = vector.broadcast %cst_62 : f32 to vector<2x32xf32>
    %241 = arith.addf %240, %239 : vector<2x32xf32>
    %242 = arith.divf %240, %241 : vector<2x32xf32>
    %243 = vector.extract_strided_slice %236 {offsets = [0, 32], sizes = [2, 32], strides = [1, 1]} : vector<2x128xf32> to vector<2x32xf32>
    %244 = arith.negf %243 : vector<2x32xf32>
    %245 = math.exp %244 : vector<2x32xf32>
    %cst_63 = arith.constant 1.000000e+00 : f32
    %246 = vector.broadcast %cst_63 : f32 to vector<2x32xf32>
    %247 = arith.addf %246, %245 : vector<2x32xf32>
    %248 = arith.divf %246, %247 : vector<2x32xf32>
    %249 = vector.extract_strided_slice %236 {offsets = [0, 64], sizes = [2, 32], strides = [1, 1]} : vector<2x128xf32> to vector<2x32xf32>
    %250 = math.tanh %249 : vector<2x32xf32>
    %251 = vector.extract_strided_slice %236 {offsets = [0, 96], sizes = [2, 32], strides = [1, 1]} : vector<2x128xf32> to vector<2x32xf32>
    %252 = arith.negf %251 : vector<2x32xf32>
    %253 = math.exp %252 : vector<2x32xf32>
    %cst_64 = arith.constant 1.000000e+00 : f32
    %254 = vector.broadcast %cst_64 : f32 to vector<2x32xf32>
    %255 = arith.addf %254, %253 : vector<2x32xf32>
    %256 = arith.divf %254, %255 : vector<2x32xf32>
    %257 = arith.mulf %248, %227 : vector<2x32xf32>
    %258 = arith.mulf %242, %250 : vector<2x32xf32>
    %259 = arith.addf %257, %258 : vector<2x32xf32>
    %260 = math.tanh %259 : vector<2x32xf32>
    %261 = arith.mulf %256, %260 : vector<2x32xf32>
    %cst_65 = arith.constant dense<0.000000e+00> : vector<2x128xf32>
    %262 = tpu.matmul %261, %2, %cst_65 {dimension_numbers = #tpu.dot_dimension_numbers<[1], [0], [0], [1], [0, 0, 1, 1], [], []>, precision = #tpu.contract_precision<fp32>} : vector<2x32xf32>, vector<32x128xf32>, vector<2x128xf32> -> vector<2x128xf32>
    %263 = arith.index_cast %c7_i32 : i32 to index
    %c0_66 = arith.constant 0 : index
    %c0_67 = arith.constant 0 : index
    %264 = vector.load %arg6[%263, %c0_66, %c0_67] : memref<8x2x128xf32, #tpu.memory_space<vmem>>, vector<1x2x128xf32>
    %265 = vector.shape_cast %264 : vector<1x2x128xf32> to vector<2x128xf32>
    %266 = vector.shape_cast %262 : vector<2x128xf32> to vector<1x2x128xf32>
    tpu.vector_store %arg6[%263, %c0_66, %c0_67], %266 {strides = array<i32>} : memref<8x2x128xf32, #tpu.memory_space<vmem>>, vector<1x2x128xf32>,
    %c8_i32 = arith.constant 8 : i32
    return
  }
  func.func @transform_0(%arg0: i32) -> (i32, i32, i32) {
    %c0_i32 = arith.constant 0 : i32
    %c0_i32_0 = arith.constant 0 : i32
    %c0_i32_1 = arith.constant 0 : i32
    return %c0_i32, %arg0, %c0_i32_0 : i32, i32, i32
  }
  func.func @transform_1(%arg0: i32) -> (i32, i32) {
    %c0_i32 = arith.constant 0 : i32
    %c0_i32_0 = arith.constant 0 : i32
    %c0_i32_1 = arith.constant 0 : i32
    return %c0_i32, %c0_i32_0 : i32, i32
  }
  func.func @transform_2(%arg0: i32) -> (i32, i32) {
    %c0_i32 = arith.constant 0 : i32
    %c0_i32_0 = arith.constant 0 : i32
    %c0_i32_1 = arith.constant 0 : i32
    return %c0_i32, %c0_i32_0 : i32, i32
  }
  func.func @transform_3(%arg0: i32) -> (i32, i32) {
    %c0_i32 = arith.constant 0 : i32
    %c0_i32_0 = arith.constant 0 : i32
    %c0_i32_1 = arith.constant 0 : i32
    return %c0_i32, %c0_i32_0 : i32, i32
  }
  func.func @transform_4(%arg0: i32) -> (i32, i32) {
    %c0_i32 = arith.constant 0 : i32
    %c0_i32_0 = arith.constant 0 : i32
    %c0_i32_1 = arith.constant 0 : i32
    return %c0_i32, %c0_i32_0 : i32, i32
  }
  func.func @transform_5(%arg0: i32) -> (i32, i32, i32) {
    %c0_i32 = arith.constant 0 : i32
    %c0_i32_0 = arith.constant 0 : i32
    %c0_i32_1 = arith.constant 0 : i32
    return %c0_i32, %arg0, %c0_i32_0 : i32, i32, i32
  }
}

</mosaic_0001>

<bundles_post_ra>
// kernel: tpu_custom_call.1
= control target key start
LH: loop header
LB: loop body
LE: loop exit
PB: predicated region body
PF: predicated region fallthrough
CT: control target
= control target key end

     0   :  { %10 = vsyncpa [#allocation3], 0  ;;  %s16561_s0 = inlined_call_operand.hbm [shape: f32[1,2,8], index: 0, kind: input, shape index: {}]   ;;  %s16562_s1 = inlined_call_operand.hbm [shape: f32[8,128], index: 1, kind: input, shape index: {}]   ;;  %s16563_s2 = inlined_call_operand.hbm [shape: f32[128,128], index: 2, kind: input, shape index: {}]   ;;  %s16564_s3 = inlined_call_operand.vmem [shape: f32[1,128], index: 3, kind: input, shape index: {}]   ;;  %s16565_s4 = inlined_call_operand.hbm [shape: f32[32,128], index: 4, kind: input, shape index: {}]   ;;  %s16566_s5 = inlined_call_operand.hbm [shape: f32[8,2,128], index: 5, kind: output, shape index: {}]  }
   0x1   :  { %11 = vsyncpa [#allocation6], 0 }
   0x2   :  { %12 = vsyncpa [#allocation9], 0 }
   0x3   :  { %13 = vsyncpa [#allocation4], 0  ;;  %s14860_s18 = smov [#allocation5]   ;;  %s14861_s20 = smov [#allocation2]  }
   0x4   :  { %s30_s19 = sshll.u32 %s14860_s18, 4  ;;  %s20_s21 = sshll.u32 %s14861_s20, 4  ;;  %s31_s19 = int_to_ptr.vmem [resolvable:$true] %s30_s19  ;;  %s21_s21 = int_to_ptr.vmem [resolvable:$true] %s20_s21 }
   0x5   :  { %s14742_s24 = scalar_lea.hbm %s16562_s1, 128 }
   0x6   :  { %p14743_p0 = scmp.ne.s32.totalorder %s16562_s1, %s14742_s24  ;;  %p14746_p1 = scmp.lt.u32.totalorder %s14742_s24, %s16562_s1 }
   0x8   :  { %p14748_p2 = pnand %p14746_p1, %p14743_p0 }
   0xa   :  { %14751 = shalt.err (!%p14748_p2)
}
   0xb   :  { %s14752_s29 = scalar_lea.vmem %s31_s19, 128  ;;  %p14757_p4 = scmp.lt.s32.totalorder %s31_s19, %s31_s19 }
   0xc   :  { %p14753_p3 = scmp.ne.s32.totalorder %s31_s19, %s14752_s29  ;;  %p14758_p5 = scmp.lt.s32.totalorder %s14752_s29, %s14752_s29 }
   0xe   :  { %p14759_p6 = por %p14758_p5, %p14757_p4 }
  0x10   :  { %p14760_p7 = pnand %p14759_p6, %p14753_p3 }
  0x12   :  { %14763 = shalt.err (!%p14760_p7)
}
  0x13   :  { %33 = dma.hbm_to_vmem [thread:$0]  %s16562_s1, 128, %s31_s19, [#allocation6]  }
  0x14   :  { %s14764_s9 = scalar_lea.hbm %s16561_s0, 32 }
  0x15   :  { %p14765_p8 = scmp.ne.s32.totalorder %s16561_s0, %s14764_s9  ;;  %p14768_p9 = scmp.lt.u32.totalorder %s14764_s9, %s16561_s0 }
  0x17   :  { %p14770_p10 = pnand %p14768_p9, %p14765_p8 }
  0x19   :  { %14773 = shalt.err (!%p14770_p10)
}
  0x1a   :  { %s14774_s14 = scalar_lea.vmem %s21_s21, 32  ;;  %p14779_p12 = scmp.lt.s32.totalorder %s21_s21, %s21_s21 }
  0x1b   :  { %p14775_p11 = scmp.ne.s32.totalorder %s21_s21, %s14774_s14  ;;  %p14780_p13 = scmp.lt.s32.totalorder %s14774_s14, %s14774_s14 }
  0x1d   :  { %p14781_p0 = por %p14780_p13, %p14779_p12 }
  0x1f   :  { %p14782_p1 = pnand %p14781_p0, %p14775_p11 }
  0x21   :  { %14785 = shalt.err (!%p14782_p1)
}
  0x22   :  { %23 = dma.hbm_to_vmem [thread:$0]  %s16561_s0, 32, %s21_s21, [#allocation3]  }
  0x23   :  { %s14862_s16 = smov [#allocation7]   ;;  %s14786_s20 = scalar_lea.hbm %s16563_s2, 2048 }
  0x24   :  { %s39_s17 = sshll.u32 %s14862_s16, 4  ;;  %p14787_p2 = scmp.ne.s32.totalorder %s16563_s2, %s14786_s20  ;;  %s40_s17 = int_to_ptr.vmem [resolvable:$true] %s39_s17 }
  0x25   :  { %p14790_p3 = scmp.lt.u32.totalorder %s14786_s20, %s16563_s2 }
  0x27   :  { %p14792_p4 = pnand %p14790_p3, %p14787_p2 }
  0x29   :  { %14795 = shalt.err (!%p14792_p4)
}
  0x2a   :  { %s14796_s26 = scalar_lea.vmem %s40_s17, 2048  ;;  %p14801_p6 = scmp.lt.s32.totalorder %s40_s17, %s40_s17 }
  0x2b   :  { %p14797_p5 = scmp.ne.s32.totalorder %s40_s17, %s14796_s26  ;;  %p14802_p7 = scmp.lt.s32.totalorder %s14796_s26, %s14796_s26 }
  0x2d   :  { %p14803_p8 = por %p14802_p7, %p14801_p6 }
  0x2f   :  { %p14804_p9 = pnand %p14803_p8, %p14797_p5 }
  0x31   :  { %14807 = shalt.err (!%p14804_p9)
}
  0x32   :  { %s14863_s0 = smov 128   ;;  %s14864_s21 = smov 8  }
  0x33   :  { %45 = dma.hbm_to_vmem [thread:$0]  %s16563_s2, 2048, %s40_s17, [#allocation6], %s14863_s0, %s14863_s0, %s14864_s21  }
  0x34   :  { %s14865_s29 = smov [#allocation8]   ;;  %s14808_s8 = scalar_lea.hbm %s16565_s4, 512 }
  0x35   :  { %s53_s30 = sshll.u32 %s14865_s29, 4  ;;  %p14809_p10 = scmp.ne.s32.totalorder %s16565_s4, %s14808_s8  ;;  %s54_s30 = int_to_ptr.vmem [resolvable:$true] %s53_s30 }
  0x36   :  { %p14812_p11 = scmp.lt.u32.totalorder %s14808_s8, %s16565_s4 }
  0x38   :  { %p14814_p12 = pnand %p14812_p11, %p14809_p10 }
  0x3a   :  { %14817 = shalt.err (!%p14814_p12)
}
  0x3b   :  { %s14818_s13 = scalar_lea.vmem %s54_s30, 512  ;;  %p14823_p0 = scmp.lt.s32.totalorder %s54_s30, %s54_s30 }
  0x3c   :  { %p14819_p13 = scmp.ne.s32.totalorder %s54_s30, %s14818_s13  ;;  %p14824_p1 = scmp.lt.s32.totalorder %s14818_s13, %s14818_s13 }
  0x3e   :  { %p14825_p2 = por %p14824_p1, %p14823_p0 }
  0x40   :  { %p14826_p3 = pnand %p14825_p2, %p14819_p13 }
  0x42   :  { %14829 = shalt.err (!%p14826_p3)
}
  0x43   :  { %59 = dma.hbm_to_vmem [thread:$0]  %s16565_s4, 512, %s54_s30, [#allocation9], %s14863_s0, %s14863_s0, %s14864_s21  }
  0x44   :  { %14852 = dma.done.wait [#allocation3], 32  }
  0x45   :  { %14853 = vsyncadd [#allocation3], 4294967264 }
  0x46   :  { %14854 = dma.done.wait [#allocation6], 2176  }
  0x47   :  { %14855 = vsyncadd [#allocation6], 4294965120 }
  0x48   :  { %14856 = dma.done.wait [#allocation9], 512  }
  0x49   :  { %14857 = vsyncadd [#allocation9], 4294966784  ;;  %v14866_v0 = vmov 0.0   ;;  %vm14867_vm0 = vmmov 0   ;;  %vm101_vm1 = vcmask 64512   ;;  %v72_v1 = vld [vmem:[#allocation5] sm:$0xff] }
  0x4a   :  { %10903 = vmatprep.subr.mxu0 %v14866_v0  ;;  %10898 = vmatprep.subr.mxu1 %v14866_v0  ;;  %v94_v2 = vld [vmem:[#allocation2] sm:$0x3]  ;;  %v14957_v3 = vand.u32 4294901760, %v72_v1  ;;  %v73_v7 = vld [vmem:[#allocation7] sm:$0xff]  ;;  %v74_v8 = vld [vmem:[#allocation7 + $0x8] sm:$0xff]  ;;  %v14868_v9 = vmov 0.0|0.0  }
  0x4b   :  { %10905 = vmatprep.mubr.msk.f32.mxu0 %vm14867_vm0, %v14866_v0  ;;  %10900 = vmatprep.mubr.msk.f32.mxu1 %vm14867_vm0, %v14866_v0  ;;  %v103_v4 = vsel %vm101_vm1, %v94_v2, 0  ;;  %v552_v13 = vand.u32 4294901760, %v73_v7  ;;  %v555_v14 = vand.u32 4294901760, %v74_v8  ;;  %v75_v16 = vld [vmem:[#allocation7 + $0x10] sm:$0xff]  ;;  %v76_v17 = vld [vmem:[#allocation7 + $0x18] sm:$0xff]  ;;  %v77_v24 = vld [vmem:[#allocation7 + $0x20] sm:$0xff] }
  0x4c   :  { %v14959_v5 = vand.u32 4294901760, %v103_v4  ;;  %v14962_v6 = vsub.f32 %v72_v1, %v14957_v3  ;;  %10899 = vmatpush3.msra.mxu1 %v14957_v3  ;;  %v558_v22 = vand.u32 4294901760, %v75_v16  ;;  %v561_v23 = vand.u32 4294901760, %v76_v17  ;;  %v78_v25 = vld [vmem:[#allocation7 + $0x28] sm:$0xff]  ;;  %v79_v29 = vld [vmem:[#allocation7 + $0x30] sm:$0xff]  ;;  %v80_v30 = vld [vmem:[#allocation7 + $0x38] sm:$0xff] }
  0x4d   :  { %13136 = vmatprep.subr.bf16.mxu1 %v14868_v9  ;;  %v14969_v21 = vpack.c.bf16 %v555_v14, %v552_v13  ;;  %v564_v27 = vand.u32 4294901760, %v77_v24  ;;  %v567_v28 = vand.u32 4294901760, %v78_v25  ;;  %v570_v32 = vand.u32 4294901760, %v79_v29  ;;  %v14987_v34 = vld [vmem:[#allocation7 + $0x40] sm:$0xff]  ;;  %v14989_v35 = vld [vmem:[#allocation7 + $0x48] sm:$0xff]  ;;  %v15001_v39 = vld [vmem:[#allocation7 + $0x50] sm:$0xff] }
  0x4e   :  { %v172_v10 = vsub.f32 %v103_v4, %v14959_v5  ;;  %v184_v11 = vand.u32 4294901760, %v14962_v6  ;;  %v14975_v26 = vpack.c.bf16 %v561_v23, %v558_v22  ;;  %v573_v33 = vand.u32 4294901760, %v80_v30  ;;  %v15003_v40 = vld [vmem:[#allocation7 + $0x58] sm:$0xff]  ;;  %v15015_v46 = vld [vmem:[#allocation7 + $0x60] sm:$0xff]  ;;  %v15017_v47 = vld [vmem:[#allocation7 + $0x68] sm:$0xff]  ;;  %s14870_s15 = smov 32  }
  0x4f   :  { %v14984_v31 = vpack.c.bf16 %v567_v28, %v564_v27  ;;  %v576_v37 = vand.u32 4294901760, %v14987_v34  ;;  %v579_v38 = vand.u32 4294901760, %v14989_v35  ;;  %v15005_v41 = vsub.f32 %v73_v7, %v552_v13  ;;  %v15038_v55 = vld [vmem:[#allocation7 + $0x70] sm:$0xff]  ;;  %v15040_v56 = vld [vmem:[#allocation7 + $0x78] sm:$0xff]  ;;  %s14871_s16 = smov [#allocation10]  }
  0x50   :  { %v173_v12 = vand.u32 4294901760, %v172_v10  ;;  %v185_v15 = vsub.f32 %v14962_v6, %v184_v11  ;;  %v14995_v36 = vpack.c.bf16 %v573_v33, %v570_v32  ;;  %v15007_v42 = vsub.f32 %v74_v8, %v555_v14  ;;  %s9807_s17 = sshll.u32 %s14871_s16, 4  ;;  %s9808_s17 = int_to_ptr.vmem [resolvable:$true] %s9807_s17 }
  0x51   :  { %v15010_v43 = vpack.c.bf16 %v579_v38, %v576_v37  ;;  %v582_v44 = vand.u32 4294901760, %v15001_v39  ;;  %v585_v45 = vand.u32 4294901760, %v15003_v40  ;;  %v640_v48 = vand.u32 4294901760, %v15005_v41  ;;  %s14830_s18 = scalar_lea.vmem %s9808_s17, 256  ;;  %p14835_p5 = scmp.lt.s32.totalorder %s9808_s17, %s9808_s17 }
  0x52   :  { %v174_v18 = vsub.f32 %v172_v10, %v173_v12  ;;  %v186_v19 = vand.u32 4294901760, %v185_v15  ;;  %v647_v49 = vand.u32 4294901760, %v15007_v42  ;;  %v15023_v50 = vsub.f32 %v75_v16, %v558_v22  ;;  %p14831_p4 = scmp.ne.s32.totalorder %s9808_s17, %s14830_s18  ;;  %p14836_p6 = scmp.lt.s32.totalorder %s14830_s18, %s14830_s18 }
  0x53   :  { %v15025_v51 = vsub.f32 %v76_v17, %v561_v23  ;;  %v15032_v52 = vpack.c.bf16 %v585_v45, %v582_v44  ;;  %v588_v53 = vand.u32 4294901760, %v15015_v46  ;;  %v591_v54 = vand.u32 4294901760, %v15017_v47 }
  0x54   :  { %v175_v20 = vand.u32 4294901760, %v174_v18  ;;  %10904 = vmatpush3.msra.mxu0 %v186_v19  ;;  %v641_v57 = vsub.f32 %v15005_v41, %v640_v48  ;;  %v15045_v58 = vsub.f32 %v77_v24, %v564_v27  ;;  %v648_v59 = vsub.f32 %v15007_v42, %v647_v49  ;;  %p14837_p7 = por %p14836_p6, %p14835_p5 }
  0x55   :  { %10906 = vmatmul.mubr.f32.vlgmr.msra.gmra.mrb[0].mxu0 %v14959_v5  ;;  %10908 = vmatprep.subr.mxu0 %v14866_v0  ;;  %v654_v60 = vand.u32 4294901760, %v15023_v50  ;;  %v661_v61 = vand.u32 4294901760, %v15025_v51  ;;  %v15052_v62 = vsub.f32 %v78_v25, %v567_v28  ;;  %v15059_v63 = vpack.c.bf16 %v591_v54, %v588_v53 }
  0x56   :  { %10909 = vmatpush3.msra.mxu0 %v14962_v6  ;;  %10901 = vmatmul.mubr.f32.vlgmr.msra.gmra.mrb[0].mxu1 %v175_v20  ;;  %v594_v1 = vand.u32 4294901760, %v15038_v55  ;;  %v597_v2 = vand.u32 4294901760, %v15040_v56  ;;  %v15064_v4 = vsub.f32 %v79_v29, %v570_v32  ;;  %v642_v6 = vand.u32 4294901760, %v641_v57  ;;  %p14838_p8 = pnand %p14837_p7, %p14831_p4 }
  0x57   :  { %13138 = vmatpush3.bf16.msra.mxu1 %v14969_v21  ;;  %10910 = vmatprep.mubr.msk.f32.mxu0 %vm14867_vm0, %v14866_v0  ;;  %v668_v7 = vand.u32 4294901760, %v15045_v58  ;;  %v15068_v8 = vsub.f32 %v80_v30, %v573_v33  ;;  %v675_v13 = vand.u32 4294901760, %v15052_v62  ;;  %v15091_v15 = vsub.f32 %v14987_v34, %v576_v37 }
  0x58   :  { %13139 = vmatprep.subr.bf16.mxu1 %v14868_v9  ;;  %10913 = vmatprep.subr.mxu0 %v14866_v0  ;;  %v682_v14 = vand.u32 4294901760, %v15064_v4  ;;  %v15098_v18 = vsub.f32 %v14989_v35, %v579_v38  ;;  %v15108_v24 = vpack.c.bf16 %v15007_v42, %v15005_v41  ;;  %v15123_v30 = vsub.f32 %v15001_v39, %v582_v44 }
  0x59   :  { %10960 = vmatprep.mubr.msk.f32.mxu1 %vm14867_vm0, %v14866_v0  ;;  %v669_v16 = vsub.f32 %v15045_v58, %v668_v7  ;;  %v689_v17 = vand.u32 4294901760, %v15068_v8  ;;  %v676_v23 = vsub.f32 %v15052_v62, %v675_v13  ;;  %v696_v27 = vand.u32 4294901760, %v15091_v15 }
  0x5a   :  { %v683_v25 = vsub.f32 %v15064_v4, %v682_v14  ;;  %v703_v29 = vand.u32 4294901760, %v15098_v18  ;;  %v15138_v35 = vpack.c.bf16 %v15025_v51, %v15023_v50  ;;  %v710_v44 = vand.u32 4294901760, %v15123_v30 }
  0x5b   :  { %13141 = vmatpush3.bf16.msra.mxu1 %v14975_v26  ;;  %v690_v28 = vsub.f32 %v15068_v8, %v689_v17  ;;  %v670_v33 = vand.u32 4294901760, %v669_v16  ;;  %v677_v34 = vand.u32 4294901760, %v676_v23  ;;  %v697_v38 = vsub.f32 %v15091_v15, %v696_v27 }
  0x5c   :  { %13142 = vmatprep.subr.bf16.mxu1 %v14868_v9  ;;  %v684_v37 = vand.u32 4294901760, %v683_v25  ;;  %v15198_v23 = vpack.c.bf16 %v15068_v8, %v15064_v4  ;;  %v15274_v41 = vpack.c.bf16 %v661_v61, %v654_v60  ;;  %v15288_v42 = vpack.c.bf16 %v675_v13, %v668_v7 }
  0x5d   :  { %10911 = vmatmul.mubr.f32.vlgmr.msra.gmra.mrb[0].mxu0 %v172_v10  ;;  %v649_v10 = vand.u32 4294901760, %v648_v59  ;;  %v691_v39 = vand.u32 4294901760, %v690_v28  ;;  %v15158_v57 = vpack.c.bf16 %v677_v34, %v670_v33  ;;  %v15216_v34 = vpack.c.bf16 %v15098_v18, %v15091_v15 }
  0x5e   :  { %10914 = vmatpush3.msra.mxu0 %v14957_v3  ;;  %10915 = vmatprep.mubr.msk.f32.mxu0 %vm14867_vm0, %v14866_v0  ;;  %vm1207_vm2 = vcmask 261120  }
  0x5f   :  { %13144 = vmatpush3.bf16.msra.mxu1 %v14984_v31  ;;  %10918 = vmatprep.subr.mxu0 %v14866_v0  ;;  %v15100_v19 = vpack.c.bf16 %v649_v10, %v642_v6  ;;  %v15164_v6 = vsub.f32 %v15017_v47, %v591_v54  ;;  %v15173_v10 = vpack.c.bf16 %v691_v39, %v684_v37 }
  0x60   :  { %13145 = vmatprep.subr.bf16.mxu1 %v14868_v9 }
  0x61   :  { %v731_v16 = vand.u32 4294901760, %v15164_v6 }
  0x63   :  { %13147 = vmatpush3.bf16.msra.mxu1 %v14995_v36 }
  0x64   :  { %13148 = vmatprep.subr.bf16.mxu1 %v14868_v9 }
  0x65   :  { %10916 = vmatmul.mubr.f32.vlgmr.msra.gmra.mrb[0].mxu0 %v173_v12  ;;  %v662_v12 = vsub.f32 %v15025_v51, %v661_v61 }
  0x66   :  { %10919 = vmatpush3.msra.mxu0 %v184_v11  ;;  %10920 = vmatprep.mubr.msk.f32.mxu0 %vm14867_vm0, %v14866_v0  ;;  %v655_v11 = vsub.f32 %v15023_v50, %v654_v60 }
  0x67   :  { %13150 = vmatpush3.bf16.msra.mxu1 %v15010_v43  ;;  %10923 = vmatprep.subr.mxu0 %v14866_v0  ;;  %v663_v22 = vand.u32 4294901760, %v662_v12  ;;  %v711_v12 = vsub.f32 %v15123_v30, %v710_v44 }
  0x68   :  { %13151 = vmatprep.subr.bf16.mxu1 %v14868_v9  ;;  %v656_v20 = vand.u32 4294901760, %v655_v11 }
  0x69   :  { %v712_v28 = vand.u32 4294901760, %v711_v12 }
  0x6a   :  { %v15127_v32 = vpack.c.bf16 %v663_v22, %v656_v20  ;;  %v15187_v20 = vsub.f32 %v15038_v55, %v594_v1  ;;  %v15192_v22 = vsub.f32 %v15040_v56, %v597_v2 }
  0x6b   :  { %13153 = vmatpush3.bf16.msra.mxu1 %v15032_v52 }
  0x6c   :  { %13154 = vmatprep.subr.bf16.mxu1 %v14868_v9  ;;  %v745_v33 = vand.u32 4294901760, %v15192_v22 }
  0x6d   :  { %10921 = vmatmul.mubr.f32.vlgmr.msra.gmra.mrb[0].mxu0 %v14959_v5 }
  0x6e   :  { %10924 = vmatpush3.msra.mxu0 %v14957_v3  ;;  %10925 = vmatprep.mubr.msk.f32.mxu0 %vm14867_vm0, %v14866_v0  ;;  %v15085_v3 = vpack.c.bf16 %v597_v2, %v594_v1  ;;  %v732_v1 = vsub.f32 %v15164_v6, %v731_v16  ;;  %v738_v2 = vand.u32 4294901760, %v15187_v20 }
  0x6f   :  { %13156 = vmatpush3.bf16.msra.mxu1 %v15059_v63  ;;  %13160 = vmatprep.subr.bf16.mxu0 %v14868_v9 }
  0x70   :  { %13157 = vmatprep.subr.bf16.mxu1 %v14868_v9  ;;  %v733_v39 = vand.u32 4294901760, %v732_v1  ;;  %v15252_v1 = vpack.c.bf16 %v15192_v22, %v15187_v20 }
  0x73   :  { %13159 = vmatpush3.bf16.msra.mxu1 %v15085_v3 }
  0x74   :  { %13184 = vmatprep.subr.bf16.mxu1 %v14868_v9 }
  0x75   :  { %10926 = vmatmul.mubr.f32.vlgmr.msra.gmra.mrb[0].mxu0 %v14959_v5  ;;  %v15132_v5 = vsub.f32 %v15003_v40, %v585_v45  ;;  %v704_v40 = vsub.f32 %v15098_v18, %v703_v29  ;;  %v15153_v45 = vsub.f32 %v15015_v46, %v588_v53  ;;  %v15170_v46 = vpack.c.bf16 %v15052_v62, %v15045_v58  ;;  %v9821_v62 = vld [vmem:[%s16564_s3] ss:$0 sm:$0xff]  ;;  %s14869_s3 = smov 64  }
  0x76   :  { %13162 = vmatpush3.bf16.msra.mxu0 %v15100_v19  ;;  %10961 = vmatmul.mubr.f32.vlgmr.msra.gmra.mrb[2].mxu1 %v14866_v0  ;;  %v698_v53 = vand.u32 4294901760, %v697_v38  ;;  %v15338_v58 = vpack.c.bf16 %v745_v33, %v738_v2 }
  0x77   :  { %13186 = vmatpush3.bf16.msra.mxu1 %v15108_v24  ;;  %13163 = vmatprep.subr.bf16.mxu0 %v14868_v9  ;;  %v717_v59 = vand.u32 4294901760, %v15132_v5  ;;  %v705_v11 = vand.u32 4294901760, %v704_v40  ;;  %v724_v47 = vand.u32 4294901760, %v15153_v45  ;;  %v739_v40 = vsub.f32 %v15187_v20, %v738_v2 }
  0x78   :  { %13187 = vmatprep.subr.bf16.mxu1 %v14868_v9  ;;  %10995 = vmatprep.mubr.msk.f32.mxu0 %vm14867_vm0, %v14866_v0 }
  0x79   :  { %11030 = vmatprep.mubr.msk.f32.mxu1 %vm14867_vm0, %v14866_v0  ;;  %v718_v54 = vsub.f32 %v15132_v5, %v717_v59  ;;  %v15201_v25 = vpack.c.bf16 %v705_v11, %v698_v53  ;;  %v725_v55 = vsub.f32 %v15153_v45, %v724_v47  ;;  %v746_v53 = vsub.f32 %v15192_v22, %v745_v33 }
  0x7a   :  { %13165 = vmatpush3.bf16.msra.mxu0 %v15127_v32  ;;  %v15232_v11 = vpack.c.bf16 %v15132_v5, %v15123_v30  ;;  %v15318_v50 = vpack.c.bf16 %v717_v59, %v710_v44  ;;  %v15328_v51 = vpack.c.bf16 %v731_v16, %v724_v47 }
  0x7b   :  { %13189 = vmatpush3.bf16.msra.mxu1 %v15138_v35  ;;  %13166 = vmatprep.subr.bf16.mxu0 %v14868_v9  ;;  %v719_v56 = vand.u32 4294901760, %v718_v54  ;;  %v726_v37 = vand.u32 4294901760, %v725_v55  ;;  %v740_v54 = vand.u32 4294901760, %v739_v40  ;;  %v15242_v55 = vpack.c.bf16 %v15164_v6, %v15153_v45 }
  0x7c   :  { %13190 = vmatprep.subr.bf16.mxu1 %v14868_v9 }
  0x7d   :  { %v15220_v38 = vpack.c.bf16 %v719_v56, %v712_v28  ;;  %v15236_v12 = vpack.c.bf16 %v733_v39, %v726_v37  ;;  %v747_v28 = vand.u32 4294901760, %v746_v53  ;;  %v15262_v37 = vpack.c.bf16 %v647_v49, %v640_v48 }
  0x7e   :  { %13168 = vmatpush3.bf16.msra.mxu0 %v15158_v57  ;;  %v15298_v48 = vpack.c.bf16 %v689_v17, %v682_v14  ;;  %v15308_v49 = vpack.c.bf16 %v703_v29, %v696_v27 }
  0x7f   :  { %13192 = vmatpush3.bf16.msra.mxu1 %v15170_v46  ;;  %13169 = vmatprep.subr.bf16.mxu0 %v14868_v9  ;;  %v15246_v56 = vpack.c.bf16 %v747_v28, %v740_v54 }
  0x80   :  { %13193 = vmatprep.subr.bf16.mxu1 %v14868_v9 }
  0x82   :  { %13171 = vmatpush3.bf16.msra.mxu0 %v15173_v10 }
  0x83   :  { %13195 = vmatpush3.bf16.msra.mxu1 %v15198_v23  ;;  %13172 = vmatprep.subr.bf16.mxu0 %v14868_v9 }
  0x84   :  { %13196 = vmatprep.subr.bf16.mxu1 %v14868_v9 }
  0x86   :  { %13174 = vmatpush3.bf16.msra.mxu0 %v15201_v25 }
  0x87   :  { %13198 = vmatpush3.bf16.msra.mxu1 %v15216_v34  ;;  %13175 = vmatprep.subr.bf16.mxu0 %v14868_v9 }
  0x88   :  { %13199 = vmatprep.subr.bf16.mxu1 %v14868_v9 }
  0x8a   :  { %13177 = vmatpush3.bf16.msra.mxu0 %v15220_v38 }
  0x8b   :  { %13201 = vmatpush3.bf16.msra.mxu1 %v15232_v11  ;;  %13178 = vmatprep.subr.bf16.mxu0 %v14868_v9 }
  0x8c   :  { %13202 = vmatprep.subr.bf16.mxu1 %v14868_v9 }
  0x8e   :  { %13180 = vmatpush3.bf16.msra.mxu0 %v15236_v12 }
  0x8f   :  { %13204 = vmatpush3.bf16.msra.mxu1 %v15242_v55  ;;  %13181 = vmatprep.subr.bf16.mxu0 %v14868_v9 }
  0x90   :  { %13205 = vmatprep.subr.bf16.mxu1 %v14868_v9 }
  0x92   :  { %13183 = vmatpush3.bf16.msra.mxu0 %v15246_v56 }
  0x93   :  { %13207 = vmatpush3.bf16.msra.mxu1 %v15252_v1  ;;  %13208 = vmatprep.subr.bf16.mxu0 %v14868_v9 }
  0x94   :  { %13232 = vmatprep.subr.bf16.mxu1 %v14868_v9 }
  0x95   :  { %10996 = vmatmul.mubr.f32.vlgmr.msra.gmra.mrb[2].mxu0 %v14866_v0 }
  0x96   :  { %13210 = vmatpush3.bf16.msra.mxu0 %v14969_v21  ;;  %11031 = vmatmul.mubr.f32.vlgmr.msra.gmra.mrb[4].mxu1 %v14866_v0 }
  0x97   :  { %13234 = vmatpush3.bf16.msra.mxu1 %v15262_v37  ;;  %13211 = vmatprep.subr.bf16.mxu0 %v14868_v9 }
  0x98   :  { %13235 = vmatprep.subr.bf16.mxu1 %v14868_v9  ;;  %11065 = vmatprep.mubr.msk.f32.mxu0 %vm14867_vm0, %v14866_v0 }
  0x99   :  { %11100 = vmatprep.mubr.msk.f32.mxu1 %vm14867_vm0, %v14866_v0 }
  0x9a   :  { %13213 = vmatpush3.bf16.msra.mxu0 %v14975_v26 }
  0x9b   :  { %13237 = vmatpush3.bf16.msra.mxu1 %v15274_v41  ;;  %13214 = vmatprep.subr.bf16.mxu0 %v14868_v9 }
  0x9c   :  { %13238 = vmatprep.subr.bf16.mxu1 %v14868_v9 }
  0x9e   :  { %13216 = vmatpush3.bf16.msra.mxu0 %v14984_v31 }
  0x9f   :  { %13240 = vmatpush3.bf16.msra.mxu1 %v15288_v42  ;;  %13217 = vmatprep.subr.bf16.mxu0 %v14868_v9 }
  0xa0   :  { %13241 = vmatprep.subr.bf16.mxu1 %v14868_v9 }
  0xa2   :  { %13219 = vmatpush3.bf16.msra.mxu0 %v14995_v36 }
  0xa3   :  { %13243 = vmatpush3.bf16.msra.mxu1 %v15298_v48  ;;  %13220 = vmatprep.subr.bf16.mxu0 %v14868_v9 }
  0xa4   :  { %13244 = vmatprep.subr.bf16.mxu1 %v14868_v9 }
  0xa6   :  { %13222 = vmatpush3.bf16.msra.mxu0 %v15010_v43 }
  0xa7   :  { %13246 = vmatpush3.bf16.msra.mxu1 %v15308_v49  ;;  %13223 = vmatprep.subr.bf16.mxu0 %v14868_v9 }
  0xa8   :  { %13247 = vmatprep.subr.bf16.mxu1 %v14868_v9 }
  0xaa   :  { %13225 = vmatpush3.bf16.msra.mxu0 %v15032_v52 }
  0xab   :  { %13249 = vmatpush3.bf16.msra.mxu1 %v15318_v50  ;;  %13226 = vmatprep.subr.bf16.mxu0 %v14868_v9 }
  0xac   :  { %13250 = vmatprep.subr.bf16.mxu1 %v14868_v9 }
  0xae   :  { %13228 = vmatpush3.bf16.msra.mxu0 %v15059_v63 }
  0xaf   :  { %13252 = vmatpush3.bf16.msra.mxu1 %v15328_v51  ;;  %13229 = vmatprep.subr.bf16.mxu0 %v14868_v9 }
  0xb0   :  { %13253 = vmatprep.subr.bf16.mxu1 %v14868_v9 }
  0xb2   :  { %13231 = vmatpush3.bf16.msra.mxu0 %v15085_v3 }
  0xb3   :  { %13255 = vmatpush3.bf16.msra.mxu1 %v15338_v58  ;;  %13256 = vmatprep.subr.bf16.mxu0 %v14868_v9 }
  0xb4   :  { %13280 = vmatprep.subr.bf16.mxu1 %v14868_v9 }
  0xb5   :  { %11066 = vmatmul.mubr.f32.vlgmr.msra.gmra.mrb[4].mxu0 %v14866_v0 }
  0xb6   :  { %13258 = vmatpush3.bf16.msra.mxu0 %v14969_v21  ;;  %11101 = vmatmul.mubr.f32.vlgmr.msra.gmra.mrb[6].mxu1 %v14866_v0 }
  0xb7   :  { %13259 = vmatprep.subr.bf16.mxu0 %v14868_v9  ;;  %11135 = vmatprep.mubr.msk.f32.mxu0 %vm14867_vm0, %v14866_v0 }
  0xb8   :  { %11146 = vmatprep.mubr.msk.f32.mxu1 %vm14867_vm0, %v14866_v0 }
  0xba   :  { %13261 = vmatpush3.bf16.msra.mxu0 %v14975_v26 }
  0xbb   :  { %13262 = vmatprep.subr.bf16.mxu0 %v14868_v9 }
  0xbe   :  { %13264 = vmatpush3.bf16.msra.mxu0 %v14984_v31 }
  0xbf   :  { %13265 = vmatprep.subr.bf16.mxu0 %v14868_v9 }
  0xc2   :  { %13267 = vmatpush3.bf16.msra.mxu0 %v14995_v36 }
  0xc3   :  { %13268 = vmatprep.subr.bf16.mxu0 %v14868_v9 }
  0xc6   :  { %13270 = vmatpush3.bf16.msra.mxu0 %v15010_v43 }
  0xc7   :  { %13271 = vmatprep.subr.bf16.mxu0 %v14868_v9 }
  0xca   :  { %13273 = vmatpush3.bf16.msra.mxu0 %v15032_v52 }
  0xcb   :  { %13274 = vmatprep.subr.bf16.mxu0 %v14868_v9 }
  0xce   :  { %13276 = vmatpush3.bf16.msra.mxu0 %v15059_v63 }
  0xcf   :  { %13277 = vmatprep.subr.bf16.mxu0 %v14868_v9 }
  0xd2   :  { %13279 = vmatpush3.bf16.msra.mxu0 %v15085_v3 }
  0xd3   :  { %13316 = vmatprep.subr.bf16.mxu0 %v14868_v9 }
  0xd5   :  { %11136 = vmatmul.mubr.f32.vlgmr.msra.gmra.mrb[6].mxu0 %v14866_v0 }
  0xd6   :  { %13318 = vmatpush3.bf16.msra.mxu0 %v14969_v21  ;;  %11236 = vmatprep.mubr.msk.f32.mxu0 %vm14867_vm0, %v14866_v0 }
  0xd7   :  { %13319 = vmatprep.subr.bf16.mxu0 %v14868_v9 }
  0xda   :  { %13321 = vmatpush3.bf16.msra.mxu0 %v14975_v26 }
  0xdb   :  { %13322 = vmatprep.subr.bf16.mxu0 %v14868_v9 }
  0xde   :  { %13324 = vmatpush3.bf16.msra.mxu0 %v14984_v31 }
  0xdf   :  { %13325 = vmatprep.subr.bf16.mxu0 %v14868_v9 }
  0xe2   :  { %13327 = vmatpush3.bf16.msra.mxu0 %v14995_v36 }
  0xe3   :  { %13328 = vmatprep.subr.bf16.mxu0 %v14868_v9 }
  0xe6   :  { %13330 = vmatpush3.bf16.msra.mxu0 %v15010_v43 }
  0xe7   :  { %13331 = vmatprep.subr.bf16.mxu0 %v14868_v9 }
  0xea   :  { %13333 = vmatpush3.bf16.msra.mxu0 %v15032_v52 }
  0xeb   :  { %13334 = vmatprep.subr.bf16.mxu0 %v14868_v9 }
  0xee   :  { %13336 = vmatpush3.bf16.msra.mxu0 %v15059_v63 }
  0xef   :  { %13337 = vmatprep.subr.bf16.mxu0 %v14868_v9 }
  0xf2   :  { %13339 = vmatpush3.bf16.msra.mxu0 %v15085_v3 }
  0xf3   :  { %13364 = vmatprep.subr.bf16.mxu0 %v14868_v9 }
 0x129   :  { %v177_v60 = vpop.f32.mrb[0].mxu1 }
 0x12a   :  { %v10902_v61 = vpop.f32.mrb[1].mxu1  ;;  %v178_v4 = vadd.f32 %v9821_v62, %v177_v60 }
 0x148   :  { %v547_v7 = vpop.f32.mrb[0].mxu0 }
 0x149   :  { %v15389_v8 = vadd.f32 %v547_v7, %v178_v4  ;;  %v10927_v13 = vpop.f32.mrb[1].mxu0  ;;  %v633_v14 = vpop.f32.mrb[2].mxu1 }
 0x14a   :  { %v10962_v15 = vpop.f32.mrb[3].mxu1 }
 0x14b   :  { %v90_v15 = vld [vmem:[#allocation8 + $0x8] sm:$0xff] }
 0x168   :  { %v783_v17 = vpop.f32.mrb[2].mxu0 }
 0x169   :  { %v784_v18 = vadd.f32 %v783_v17, %v633_v14  ;;  %v10997_v27 = vpop.f32.mrb[3].mxu0  ;;  %v885_v29 = vpop.f32.mrb[4].mxu1  ;;  %v89_v14 = vld [vmem:[#allocation8] sm:$0xff] }
 0x16a   :  { %v11032_v30 = vpop.f32.mrb[5].mxu1  ;;  %v1211_v17 = vand.u32 4294901760, %v89_v14 }
 0x16b   :  { %v886_v5 = vadd.f32 %v885_v29, %v784_v18  ;;  %v1214_v18 = vand.u32 4294901760, %v90_v15 }
 0x16c   :  { %v1291_v29 = vsub.f32 %v89_v14, %v1211_v17 }
 0x16d   :  { %v15398_v27 = vpack.c.bf16 %v1214_v18, %v1211_v17  ;;  %v1298_v30 = vsub.f32 %v90_v15, %v1214_v18 }
 0x16f   :  { %13282 = vmatpush3.bf16.msra.mxu1 %v15398_v27  ;;  %v15411_v18 = vpack.c.bf16 %v1298_v30, %v1291_v29 }
 0x170   :  { %13283 = vmatprep.subr.bf16.mxu1 %v14868_v9 }
 0x188   :  { %v971_v44 = vpop.f32.mrb[4].mxu0 }
 0x189   :  { %v972_v45 = vadd.f32 %v971_v44, %v886_v5  ;;  %v11067_v59 = vpop.f32.mrb[5].mxu0  ;;  %v1089_v6 = vpop.f32.mrb[6].mxu1  ;;  %v91_v5 = vld [vmem:[#allocation8 + $0x10] sm:$0xff]  ;;  %v92_v44 = vld [vmem:[#allocation8 + $0x18] sm:$0xff] }
 0x18a   :  { %v11102_v47 = vpop.f32.mrb[7].mxu1  ;;  %v1220_v59 = vand.u32 4294901760, %v92_v44 }
 0x18b   :  { %v1090_v16 = vadd.f32 %v1089_v6, %v972_v45  ;;  %v1217_v45 = vand.u32 4294901760, %v91_v5  ;;  %v1292_v6 = vand.u32 4294901760, %v1291_v29  ;;  %v1299_v47 = vand.u32 4294901760, %v1298_v30 }
 0x1a8   :  { %v1175_v20 = vpop.f32.mrb[6].mxu0 }
 0x1a9   :  { %v1176_v22 = vadd.f32 %v1175_v20, %v1090_v16  ;;  %v11137_v2 = vpop.f32.mrb[7].mxu0  ;;  %v15402_v16 = vpack.c.bf16 %v1220_v59, %v1217_v45  ;;  %v1293_v20 = vsub.f32 %v1291_v29, %v1292_v6 }
 0x1aa   :  { %v1305_v2 = vsub.f32 %v91_v5, %v1217_v45 }
 0x1ab   :  { %v1179_v33 = vadd.f32 %v15389_v8, %v1176_v22  ;;  %v1300_v22 = vsub.f32 %v1298_v30, %v1299_v47  ;;  %13285 = vmatpush3.bf16.msra.mxu1 %v15402_v16 }
 0x1ac   :  { %13286 = vmatprep.subr.bf16.mxu1 %v14868_v9 }
 0x1ad   :  { %14678 = vtanh.f32 %v1179_v33  ;;  %v9822_v40 = vmul.f32 -1.442695, %v1179_v33  ;;  %v1312_v33 = vsub.f32 %v92_v44, %v1220_v59  ;;  %v15415_v44 = vpack.c.bf16 %v1299_v47, %v1292_v6 }
 0x1af   :  { %14680 = vpow2.f32 %v9822_v40  ;;  %v1301_v40 = vand.u32 4294901760, %v1300_v22  ;;  %v15413_v5 = vpack.c.bf16 %v1312_v33, %v1305_v2 }
 0x1b7   :  { %v14679_v39 = vpop.eup %14678 }
 0x1b8   :  { %1189 = vrot.lane.b32.xlu0 %v14679_v39, %s14869_s3  ;;  %v1294_v39 = vand.u32 4294901760, %v1293_v20 }
 0x1b9   :  { %v14681_v53 = vpop.eup %14680 }
 0x1ba   :  { %v1183_v54 = vadd.f32 1.0, %v14681_v53  ;;  %v1306_v53 = vand.u32 4294901760, %v1305_v2 }
 0x1bc   :  { %14682 = vrcp.f32 %v1183_v54  ;;  %v1313_v54 = vand.u32 4294901760, %v1312_v33 }
 0x1be   :  { %v15417_v45 = vpack.c.bf16 %v1313_v54, %v1306_v53 }
 0x1c6   :  { %v14683_v28 = vpop.eup %14682 }
 0x1c7   :  { %v1187_v62 = vmul.f32 0.0, %v14683_v28 }
 0x22a   :  { %v1190_v60 = vpop.permute.xlu0 %1189 }
 0x22b   :  { %v1192_v61 = vmul.f32 %v14683_v28, %v1190_v60 }
 0x22d   :  { %1194 = vrot.lane.b32.xlu0 %v1192_v61, %s14870_s15  ;;  %v15406_v61 = vpack.c.bf16 %v1301_v40, %v1294_v39 }
 0x29f   :  { %v1195_v4 = vpop.permute.xlu0 %1194 }
 0x2a0   :  { %v15394_v7 = vadd.f32 %v1195_v4, %v1187_v62  ;;  %v1307_v62 = vsub.f32 %v1305_v2, %v1306_v53 }
 0x2a2   :  { %14684 = vtanh.f32 %v15394_v7  ;;  %v1308_v14 = vand.u32 4294901760, %v1307_v62 }
 0x2ac   :  { %v14685_v13 = vpop.eup %14684 }
 0x2ad   :  { %1200 = vrot.lane.b32.xlu1 %v14685_v13, %s14869_s3  ;;  %v1314_v13 = vsub.f32 %v1312_v33, %v1313_v54 }
 0x2af   :  { %v1315_v15 = vand.u32 4294901760, %v1314_v13 }
 0x2b1   :  { %v15409_v17 = vpack.c.bf16 %v1315_v15, %v1308_v14 }
 0x31f   :  { %v1201_v60 = vpop.permute.xlu1 %1200 }
 0x320   :  { %v1203_v4 = vmul.f32 %v14683_v28, %v1201_v60 }
 0x322   :  { %1205 = vrot.lane.b32.xlu1 %v1203_v4, %s14870_s15 }
 0x394   :  { %v1206_v59 = vpop.permute.xlu1 %1205 }
 0x395   :  { %v1208_v20 = vsel %vm1207_vm2, %v1206_v59, 0 }
 0x396   :  { %v1279_v28 = vand.u32 4294901760, %v1208_v20 }
 0x398   :  { %v1280_v22 = vsub.f32 %v1208_v20, %v1279_v28 }
 0x39a   :  { %v1281_v39 = vand.u32 4294901760, %v1280_v22 }
 0x39c   :  { %v1282_v40 = vsub.f32 %v1280_v22, %v1281_v39 }
 0x39e   :  { %v1283_v60 = vand.u32 4294901760, %v1282_v40 }
 0x3a0   :  { %11147 = vmatmul.mubr.f32.vlgmr.msra.gmra.mrb[8].mxu1 %v1283_v60 }
 0x3a1   :  { %13288 = vmatpush3.bf16.msra.mxu1 %v15406_v61  ;;  %11157 = vmatprep.mubr.msk.f32.mxu1 %vm14867_vm0, %v14866_v0 }
 0x3a2   :  { %13289 = vmatprep.subr.bf16.mxu1 %v14868_v9 }
 0x3a5   :  { %13291 = vmatpush3.bf16.msra.mxu1 %v15409_v17 }
 0x3a6   :  { %13292 = vmatprep.subr.bf16.mxu1 %v14868_v9 }
 0x3a8   :  { %11158 = vmatmul.mubr.f32.vlgmr.msra.gmra.mrb[8].mxu1 %v1279_v28 }
 0x3a9   :  { %13294 = vmatpush3.bf16.msra.mxu1 %v15411_v18  ;;  %11168 = vmatprep.mubr.msk.f32.mxu1 %vm14867_vm0, %v14866_v0 }
 0x3aa   :  { %13295 = vmatprep.subr.bf16.mxu1 %v14868_v9 }
 0x3ad   :  { %13297 = vmatpush3.bf16.msra.mxu1 %v15413_v5 }
 0x3ae   :  { %13298 = vmatprep.subr.bf16.mxu1 %v14868_v9 }
 0x3b0   :  { %11169 = vmatmul.mubr.f32.vlgmr.msra.gmra.mrb[8].mxu1 %v1280_v22 }
 0x3b1   :  { %13300 = vmatpush3.bf16.msra.mxu1 %v15398_v27  ;;  %11179 = vmatprep.mubr.msk.f32.mxu1 %vm14867_vm0, %v14866_v0 }
 0x3b2   :  { %13301 = vmatprep.subr.bf16.mxu1 %v14868_v9 }
 0x3b5   :  { %13303 = vmatpush3.bf16.msra.mxu1 %v15402_v16 }
 0x3b6   :  { %13304 = vmatprep.subr.bf16.mxu1 %v14868_v9 }
 0x3b8   :  { %11180 = vmatmul.mubr.f32.vlgmr.msra.gmra.mrb[8].mxu1 %v1281_v39 }
 0x3b9   :  { %13306 = vmatpush3.bf16.msra.mxu1 %v15415_v44  ;;  %11190 = vmatprep.mubr.msk.f32.mxu1 %vm14867_vm0, %v14866_v0 }
 0x3ba   :  { %13307 = vmatprep.subr.bf16.mxu1 %v14868_v9 }
 0x3bd   :  { %13309 = vmatpush3.bf16.msra.mxu1 %v15417_v45 }
 0x3be   :  { %13310 = vmatprep.subr.bf16.mxu1 %v14868_v9 }
 0x3c0   :  { %11191 = vmatmul.mubr.f32.vlgmr.msra.gmra.mrb[8].mxu1 %v1279_v28 }
 0x3c1   :  { %13312 = vmatpush3.bf16.msra.mxu1 %v15398_v27  ;;  %11201 = vmatprep.mubr.msk.f32.mxu1 %vm14867_vm0, %v14866_v0 }
 0x3c2   :  { %13313 = vmatprep.subr.bf16.mxu1 %v14868_v9 }
 0x3c5   :  { %13315 = vmatpush3.bf16.msra.mxu1 %v15402_v16 }
 0x3c6   :  { %13340 = vmatprep.subr.bf16.mxu1 %v14868_v9 }
 0x3c8   :  { %11202 = vmatmul.mubr.f32.vlgmr.msra.gmra.mrb[8].mxu1 %v1279_v28 }
 0x3c9   :  { %13342 = vmatpush3.bf16.msra.mxu1 %v15100_v19  ;;  %11271 = vmatprep.mubr.msk.f32.mxu1 %vm14867_vm0, %v14866_v0 }
 0x3ca   :  { %13343 = vmatprep.subr.bf16.mxu1 %v14868_v9 }
 0x3cd   :  { %13345 = vmatpush3.bf16.msra.mxu1 %v15127_v32 }
 0x3ce   :  { %13346 = vmatprep.subr.bf16.mxu1 %v14868_v9 }
 0x3d1   :  { %13348 = vmatpush3.bf16.msra.mxu1 %v15158_v57 }
 0x3d2   :  { %13349 = vmatprep.subr.bf16.mxu1 %v14868_v9 }
 0x3d5   :  { %13351 = vmatpush3.bf16.msra.mxu1 %v15173_v10 }
 0x3d6   :  { %13352 = vmatprep.subr.bf16.mxu1 %v14868_v9 }
 0x3d9   :  { %13354 = vmatpush3.bf16.msra.mxu1 %v15201_v25 }
 0x3da   :  { %13355 = vmatprep.subr.bf16.mxu1 %v14868_v9 }
 0x3dd   :  { %13357 = vmatpush3.bf16.msra.mxu1 %v15220_v38 }
 0x3de   :  { %13358 = vmatprep.subr.bf16.mxu1 %v14868_v9 }
 0x3e1   :  { %13360 = vmatpush3.bf16.msra.mxu1 %v15236_v12 }
 0x3e2   :  { %13361 = vmatprep.subr.bf16.mxu1 %v14868_v9 }
 0x3e5   :  { %13363 = vmatpush3.bf16.msra.mxu1 %v15246_v56 }
 0x3e6   :  { %13388 = vmatprep.subr.bf16.mxu1 %v14868_v9 }
 0x49b   :  { %v1691_v29 = vpop.f32.mrb[8].mxu1 }
 0x49c   :  { %1695 = vst [vmem:[#allocation10] sm:$0x3] %v1691_v29  ;;  %v15468_v30 = vand.u32 4294901760, %v1691_v29  ;;  %v11203_v6 = vpop.f32.mrb[9].mxu1 }
 0x49e   :  { %v1778_v47 = vsub.f32 %v1691_v29, %v15468_v30  ;;  %11272 = vmatmul.mubr.f32.vlgmr.msra.gmra.mrb[10].mxu1 %v15468_v30 }
 0x49f   :  { %13390 = vmatpush3.bf16.msra.mxu1 %v14969_v21  ;;  %11341 = vmatprep.mubr.msk.f32.mxu1 %vm14867_vm0, %v14866_v0 }
 0x4a0   :  { %v1779_v2 = vand.u32 4294901760, %v1778_v47  ;;  %13391 = vmatprep.subr.bf16.mxu1 %v14868_v9 }
 0x4a2   :  { %v1780_v33 = vsub.f32 %v1778_v47, %v1779_v2 }
 0x4a3   :  { %13393 = vmatpush3.bf16.msra.mxu1 %v14975_v26 }
 0x4a4   :  { %13394 = vmatprep.subr.bf16.mxu1 %v14868_v9  ;;  %v1781_v53 = vand.u32 4294901760, %v1780_v33 }
 0x4a6   :  { %11237 = vmatmul.mubr.f32.vlgmr.msra.gmra.mrb[8].mxu0 %v1781_v53 }
 0x4a7   :  { %13366 = vmatpush3.bf16.msra.mxu0 %v15108_v24  ;;  %13396 = vmatpush3.bf16.msra.mxu1 %v14984_v31 }
 0x4a8   :  { %13367 = vmatprep.subr.bf16.mxu0 %v14868_v9  ;;  %13397 = vmatprep.subr.bf16.mxu1 %v14868_v9 }
 0x4a9   :  { %11306 = vmatprep.mubr.msk.f32.mxu0 %vm14867_vm0, %v14866_v0 }
 0x4ab   :  { %13369 = vmatpush3.bf16.msra.mxu0 %v15138_v35  ;;  %13399 = vmatpush3.bf16.msra.mxu1 %v14995_v36 }
 0x4ac   :  { %13370 = vmatprep.subr.bf16.mxu0 %v14868_v9  ;;  %13400 = vmatprep.subr.bf16.mxu1 %v14868_v9 }
 0x4af   :  { %13372 = vmatpush3.bf16.msra.mxu0 %v15170_v46  ;;  %13402 = vmatpush3.bf16.msra.mxu1 %v15010_v43 }
 0x4b0   :  { %13373 = vmatprep.subr.bf16.mxu0 %v14868_v9  ;;  %13403 = vmatprep.subr.bf16.mxu1 %v14868_v9 }
 0x4b3   :  { %13375 = vmatpush3.bf16.msra.mxu0 %v15198_v23  ;;  %13405 = vmatpush3.bf16.msra.mxu1 %v15032_v52 }
 0x4b4   :  { %13376 = vmatprep.subr.bf16.mxu0 %v14868_v9  ;;  %13406 = vmatprep.subr.bf16.mxu1 %v14868_v9 }
 0x4b7   :  { %13378 = vmatpush3.bf16.msra.mxu0 %v15216_v34  ;;  %13408 = vmatpush3.bf16.msra.mxu1 %v15059_v63 }
 0x4b8   :  { %13379 = vmatprep.subr.bf16.mxu0 %v14868_v9  ;;  %13409 = vmatprep.subr.bf16.mxu1 %v14868_v9 }
 0x4bb   :  { %13381 = vmatpush3.bf16.msra.mxu0 %v15232_v11  ;;  %13411 = vmatpush3.bf16.msra.mxu1 %v15085_v3 }
 0x4bc   :  { %13382 = vmatprep.subr.bf16.mxu0 %v14868_v9  ;;  %13436 = vmatprep.subr.bf16.mxu1 %v14868_v9 }
 0x4be   :  { %11342 = vmatmul.mubr.f32.vlgmr.msra.gmra.mrb[12].mxu1 %v1779_v2 }
 0x4bf   :  { %13384 = vmatpush3.bf16.msra.mxu0 %v15242_v55  ;;  %13438 = vmatpush3.bf16.msra.mxu1 %v14969_v21 }
 0x4c0   :  { %13385 = vmatprep.subr.bf16.mxu0 %v14868_v9  ;;  %13439 = vmatprep.subr.bf16.mxu1 %v14868_v9 }
 0x4c1   :  { %11411 = vmatprep.mubr.msk.f32.mxu1 %vm14867_vm0, %v14866_v0 }
 0x4c3   :  { %13387 = vmatpush3.bf16.msra.mxu0 %v15252_v1  ;;  %13441 = vmatpush3.bf16.msra.mxu1 %v14975_v26 }
 0x4c4   :  { %13412 = vmatprep.subr.bf16.mxu0 %v14868_v9  ;;  %13442 = vmatprep.subr.bf16.mxu1 %v14868_v9 }
 0x4c6   :  { %11307 = vmatmul.mubr.f32.vlgmr.msra.gmra.mrb[10].mxu0 %v1778_v47 }
 0x4c7   :  { %13414 = vmatpush3.bf16.msra.mxu0 %v15262_v37  ;;  %13444 = vmatpush3.bf16.msra.mxu1 %v14984_v31 }
 0x4c8   :  { %13415 = vmatprep.subr.bf16.mxu0 %v14868_v9  ;;  %13445 = vmatprep.subr.bf16.mxu1 %v14868_v9 }
 0x4c9   :  { %11376 = vmatprep.mubr.msk.f32.mxu0 %vm14867_vm0, %v14866_v0 }
 0x4cb   :  { %13417 = vmatpush3.bf16.msra.mxu0 %v15274_v41  ;;  %13447 = vmatpush3.bf16.msra.mxu1 %v14995_v36 }
 0x4cc   :  { %13418 = vmatprep.subr.bf16.mxu0 %v14868_v9  ;;  %13448 = vmatprep.subr.bf16.mxu1 %v14868_v9 }
 0x4cf   :  { %13420 = vmatpush3.bf16.msra.mxu0 %v15288_v42  ;;  %13450 = vmatpush3.bf16.msra.mxu1 %v15010_v43 }
 0x4d0   :  { %13421 = vmatprep.subr.bf16.mxu0 %v14868_v9  ;;  %13451 = vmatprep.subr.bf16.mxu1 %v14868_v9 }
 0x4d3   :  { %13423 = vmatpush3.bf16.msra.mxu0 %v15298_v48  ;;  %13453 = vmatpush3.bf16.msra.mxu1 %v15032_v52 }
 0x4d4   :  { %13424 = vmatprep.subr.bf16.mxu0 %v14868_v9  ;;  %13454 = vmatprep.subr.bf16.mxu1 %v14868_v9 }
 0x4d7   :  { %13426 = vmatpush3.bf16.msra.mxu0 %v15308_v49  ;;  %13456 = vmatpush3.bf16.msra.mxu1 %v15059_v63 }
 0x4d8   :  { %13427 = vmatprep.subr.bf16.mxu0 %v14868_v9  ;;  %13457 = vmatprep.subr.bf16.mxu1 %v14868_v9 }
 0x4db   :  { %13429 = vmatpush3.bf16.msra.mxu0 %v15318_v50  ;;  %13459 = vmatpush3.bf16.msra.mxu1 %v15085_v3 }
 0x4dc   :  { %13430 = vmatprep.subr.bf16.mxu0 %v14868_v9  ;;  %13460 = vmatprep.subr.bf16.mxu1 %v14868_v9 }
 0x4de   :  { %11412 = vmatmul.mubr.f32.vlgmr.msra.gmra.mrb[14].mxu1 %v15468_v30 }
 0x4df   :  { %13432 = vmatpush3.bf16.msra.mxu0 %v15328_v51  ;;  %13462 = vmatpush3.bf16.msra.mxu1 %v15398_v27 }
 0x4e0   :  { %13433 = vmatprep.subr.bf16.mxu0 %v14868_v9  ;;  %13463 = vmatprep.subr.bf16.mxu1 %v14868_v9 }
 0x4e1   :  { %11422 = vmatprep.mubr.msk.f32.mxu1 %vm14867_vm0, %v14866_v0 }
 0x4e3   :  { %13435 = vmatpush3.bf16.msra.mxu0 %v15338_v58  ;;  %13465 = vmatpush3.bf16.msra.mxu1 %v15402_v16 }
 0x4e4   :  { %13466 = vmatprep.subr.bf16.mxu0 %v14868_v9  ;;  %13496 = vmatprep.subr.bf16.mxu1 %v14868_v9 }
 0x4e6   :  { %11377 = vmatmul.mubr.f32.vlgmr.msra.gmra.mrb[12].mxu0 %v15468_v30 }
 0x4e7   :  { %13468 = vmatpush3.bf16.msra.mxu0 %v15406_v61  ;;  %11433 = vmatprep.mubr.msk.f32.mxu0 %vm14867_vm0, %v14866_v0 }
 0x4e8   :  { %13469 = vmatprep.subr.bf16.mxu0 %v14868_v9 }
 0x4eb   :  { %13471 = vmatpush3.bf16.msra.mxu0 %v15409_v17 }
 0x4ec   :  { %13472 = vmatprep.subr.bf16.mxu0 %v14868_v9 }
 0x571   :  { %v1934_v54 = vpop.f32.mrb[10].mxu1 }
 0x572   :  { %v11273_v62 = vpop.f32.mrb[11].mxu1 }
 0x579   :  { %v1783_v4 = vpop.f32.mrb[8].mxu0 }
 0x57a   :  { %v1935_v13 = vadd.f32 %v1934_v54, %v1783_v4  ;;  %v11238_v14 = vpop.f32.mrb[9].mxu0 }
 0x591   :  { %v2127_v15 = vpop.f32.mrb[12].mxu1 }
 0x592   :  { %v11343_v59 = vpop.f32.mrb[13].mxu1 }
 0x599   :  { %v2038_v20 = vpop.f32.mrb[10].mxu0 }
 0x59a   :  { %v2039_v28 = vadd.f32 %v2038_v20, %v1935_v13  ;;  %v11308_v22 = vpop.f32.mrb[11].mxu0 }
 0x59c   :  { %v2128_v39 = vadd.f32 %v2127_v15, %v2039_v28 }
 0x5b1   :  { %v2333_v40 = vpop.f32.mrb[14].mxu1 }
 0x5b2   :  { %v11413_v60 = vpop.f32.mrb[15].mxu1 }
 0x5b9   :  { %v2246_v29 = vpop.f32.mrb[12].mxu0 }
 0x5ba   :  { %v2247_v30 = vadd.f32 %v2246_v29, %v2128_v39  ;;  %v11378_v6 = vpop.f32.mrb[13].mxu0 }
 0x5bc   :  { %v2334_v47 = vadd.f32 %v2333_v40, %v2247_v30 }
 0x5be   :  { %v2337_v2 = vadd.f32 %v15389_v8, %v2334_v47 }
 0x5c0   :  { %14686 = vtanh.f32 %v2337_v2  ;;  %v9823_v53 = vmul.f32 -1.442695, %v2337_v2 }
 0x5c2   :  { %14688 = vpow2.f32 %v9823_v53 }
 0x5ca   :  { %v14687_v33 = vpop.eup %14686 }
 0x5cb   :  { %2347 = vrot.lane.b32.xlu0 %v14687_v33, %s14869_s3 }
 0x5cc   :  { %v14689_v54 = vpop.eup %14688 }
 0x5cd   :  { %v2341_v62 = vadd.f32 1.0, %v14689_v54 }
 0x5cf   :  { %14690 = vrcp.f32 %v2341_v62 }
 0x5d9   :  { %v14691_v4 = vpop.eup %14690 }
 0x5da   :  { %v2345_v15 = vmul.f32 %v14691_v4, %v15394_v7 }
 0x63d   :  { %v2348_v13 = vpop.permute.xlu0 %2347 }
 0x63e   :  { %v2350_v14 = vmul.f32 %v14691_v4, %v2348_v13 }
 0x640   :  { %2352 = vrot.lane.b32.xlu1 %v2350_v14, %s14870_s15 }
 0x6b2   :  { %v2353_v59 = vpop.permute.xlu1 %2352 }
 0x6b3   :  { %v15562_v20 = vadd.f32 %v2353_v59, %v2345_v15 }
 0x6b5   :  { %14692 = vtanh.f32 %v15562_v20 }
 0x6bf   :  { %v14693_v28 = vpop.eup %14692 }
 0x6c0   :  { %2358 = vrot.lane.b32.xlu0 %v14693_v28, %s14869_s3 }
 0x732   :  { %v2359_v22 = vpop.permute.xlu0 %2358 }
 0x733   :  { %v2361_v39 = vmul.f32 %v14691_v4, %v2359_v22 }
 0x735   :  { %2363 = vrot.lane.b32.xlu1 %v2361_v39, %s14870_s15 }
 0x7a7   :  { %v2364_v40 = vpop.permute.xlu1 %2363 }
 0x7a8   :  { %v2365_v60 = vsel %vm1207_vm2, %v2364_v40, 0 }
 0x7a9   :  { %v2436_v29 = vand.u32 4294901760, %v2365_v60 }
 0x7ab   :  { %v2437_v30 = vsub.f32 %v2365_v60, %v2436_v29  ;;  %11434 = vmatmul.mubr.f32.vlgmr.msra.gmra.mrb[14].mxu0 %v2436_v29 }
 0x7ac   :  { %13474 = vmatpush3.bf16.msra.mxu0 %v15411_v18  ;;  %11444 = vmatprep.mubr.msk.f32.mxu0 %vm14867_vm0, %v14866_v0 }
 0x7ad   :  { %v2438_v7 = vand.u32 4294901760, %v2437_v30  ;;  %13475 = vmatprep.subr.bf16.mxu0 %v14868_v9 }
 0x7af   :  { %v2439_v6 = vsub.f32 %v2437_v30, %v2438_v7 }
 0x7b0   :  { %13477 = vmatpush3.bf16.msra.mxu0 %v15413_v5 }
 0x7b1   :  { %v2440_v47 = vand.u32 4294901760, %v2439_v6  ;;  %13478 = vmatprep.subr.bf16.mxu0 %v14868_v9 }
 0x7b3   :  { %11423 = vmatmul.mubr.f32.vlgmr.msra.gmra.mrb[16].mxu1 %v2440_v47  ;;  %11445 = vmatmul.mubr.f32.vlgmr.msra.gmra.mrb[14].mxu0 %v2437_v30 }
 0x7b4   :  { %13480 = vmatpush3.bf16.msra.mxu0 %v15398_v27  ;;  %11455 = vmatprep.mubr.msk.f32.mxu0 %vm14867_vm0, %v14866_v0 }
 0x7b5   :  { %13481 = vmatprep.subr.bf16.mxu0 %v14868_v9  ;;  %13498 = vmatpush3.bf16.msra.mxu1 %v14969_v21 }
 0x7b6   :  { %13499 = vmatprep.subr.bf16.mxu1 %v14868_v9  ;;  %11512 = vmatprep.mubr.msk.f32.mxu1 %vm14867_vm0, %v14866_v0 }
 0x7b8   :  { %13483 = vmatpush3.bf16.msra.mxu0 %v15402_v16 }
 0x7b9   :  { %13484 = vmatprep.subr.bf16.mxu0 %v14868_v9  ;;  %13501 = vmatpush3.bf16.msra.mxu1 %v14975_v26 }
 0x7ba   :  { %13502 = vmatprep.subr.bf16.mxu1 %v14868_v9 }
 0x7bb   :  { %11456 = vmatmul.mubr.f32.vlgmr.msra.gmra.mrb[14].mxu0 %v2438_v7 }
 0x7bc   :  { %13486 = vmatpush3.bf16.msra.mxu0 %v15415_v44  ;;  %11466 = vmatprep.mubr.msk.f32.mxu0 %vm14867_vm0, %v14866_v0 }
 0x7bd   :  { %13487 = vmatprep.subr.bf16.mxu0 %v14868_v9  ;;  %13504 = vmatpush3.bf16.msra.mxu1 %v14984_v31 }
 0x7be   :  { %13505 = vmatprep.subr.bf16.mxu1 %v14868_v9 }
 0x7c0   :  { %13489 = vmatpush3.bf16.msra.mxu0 %v15417_v45 }
 0x7c1   :  { %13490 = vmatprep.subr.bf16.mxu0 %v14868_v9  ;;  %13507 = vmatpush3.bf16.msra.mxu1 %v14995_v36 }
 0x7c2   :  { %13508 = vmatprep.subr.bf16.mxu1 %v14868_v9 }
 0x7c3   :  { %11467 = vmatmul.mubr.f32.vlgmr.msra.gmra.mrb[14].mxu0 %v2436_v29 }
 0x7c4   :  { %13492 = vmatpush3.bf16.msra.mxu0 %v15398_v27  ;;  %11477 = vmatprep.mubr.msk.f32.mxu0 %vm14867_vm0, %v14866_v0 }
 0x7c5   :  { %13493 = vmatprep.subr.bf16.mxu0 %v14868_v9  ;;  %13510 = vmatpush3.bf16.msra.mxu1 %v15010_v43 }
 0x7c6   :  { %13511 = vmatprep.subr.bf16.mxu1 %v14868_v9 }
 0x7c8   :  { %13495 = vmatpush3.bf16.msra.mxu0 %v15402_v16 }
 0x7c9   :  { %13520 = vmatprep.subr.bf16.mxu0 %v14868_v9  ;;  %13513 = vmatpush3.bf16.msra.mxu1 %v15032_v52 }
 0x7ca   :  { %13514 = vmatprep.subr.bf16.mxu1 %v14868_v9 }
 0x7cb   :  { %11478 = vmatmul.mubr.f32.vlgmr.msra.gmra.mrb[14].mxu0 %v2436_v29 }
 0x7cc   :  { %13522 = vmatpush3.bf16.msra.mxu0 %v15100_v19  ;;  %11547 = vmatprep.mubr.msk.f32.mxu0 %vm14867_vm0, %v14866_v0 }
 0x7cd   :  { %13523 = vmatprep.subr.bf16.mxu0 %v14868_v9  ;;  %13516 = vmatpush3.bf16.msra.mxu1 %v15059_v63 }
 0x7ce   :  { %13517 = vmatprep.subr.bf16.mxu1 %v14868_v9 }
 0x7d0   :  { %13525 = vmatpush3.bf16.msra.mxu0 %v15127_v32 }
 0x7d1   :  { %13526 = vmatprep.subr.bf16.mxu0 %v14868_v9  ;;  %13519 = vmatpush3.bf16.msra.mxu1 %v15085_v3 }
 0x7d2   :  { %13544 = vmatprep.subr.bf16.mxu1 %v14868_v9 }
 0x7d4   :  { %13528 = vmatpush3.bf16.msra.mxu0 %v15158_v57 }
 0x7d5   :  { %13529 = vmatprep.subr.bf16.mxu0 %v14868_v9 }
 0x7d8   :  { %13531 = vmatpush3.bf16.msra.mxu0 %v15173_v10 }
 0x7d9   :  { %13532 = vmatprep.subr.bf16.mxu0 %v14868_v9 }
 0x7dc   :  { %13534 = vmatpush3.bf16.msra.mxu0 %v15201_v25 }
 0x7dd   :  { %13535 = vmatprep.subr.bf16.mxu0 %v14868_v9 }
 0x7e0   :  { %13537 = vmatpush3.bf16.msra.mxu0 %v15220_v38 }
 0x7e1   :  { %13538 = vmatprep.subr.bf16.mxu0 %v14868_v9 }
 0x7e4   :  { %13540 = vmatpush3.bf16.msra.mxu0 %v15236_v12 }
 0x7e5   :  { %13541 = vmatprep.subr.bf16.mxu0 %v14868_v9 }
 0x7e8   :  { %13543 = vmatpush3.bf16.msra.mxu0 %v15246_v56 }
 0x7e9   :  { %13568 = vmatprep.subr.bf16.mxu0 %v14868_v9 }
 0x886   :  { %v2442_v2 = vpop.f32.mrb[16].mxu1 }
 0x887   :  { %v11424_v33 = vpop.f32.mrb[17].mxu1 }
 0x89e   :  { %v2848_v53 = vpop.f32.mrb[14].mxu0 }
 0x89f   :  { %v14578_v54 = vadd.f32 %v2848_v53, %v2442_v2  ;;  %v11479_v62 = vpop.f32.mrb[15].mxu0 }
 0x8a1   :  { %2853 = vst [vmem:[#allocation10 + $0x2] sm:$0x3] %v14578_v54  ;;  %v15628_v4 = vand.u32 4294901760, %v14578_v54 }
 0x8a3   :  { %v2936_v13 = vsub.f32 %v14578_v54, %v15628_v4  ;;  %11548 = vmatmul.mubr.f32.vlgmr.msra.gmra.mrb[16].mxu0 %v15628_v4 }
 0x8a4   :  { %13570 = vmatpush3.bf16.msra.mxu0 %v14969_v21  ;;  %11617 = vmatprep.mubr.msk.f32.mxu0 %vm14867_vm0, %v14866_v0 }
 0x8a5   :  { %v2937_v14 = vand.u32 4294901760, %v2936_v13  ;;  %13571 = vmatprep.subr.bf16.mxu0 %v14868_v9 }
 0x8a7   :  { %v2938_v15 = vsub.f32 %v2936_v13, %v2937_v14 }
 0x8a8   :  { %13573 = vmatpush3.bf16.msra.mxu0 %v14975_v26 }
 0x8a9   :  { %13574 = vmatprep.subr.bf16.mxu0 %v14868_v9  ;;  %v2939_v59 = vand.u32 4294901760, %v2938_v15 }
 0x8ab   :  { %11513 = vmatmul.mubr.f32.vlgmr.msra.gmra.mrb[18].mxu1 %v2939_v59 }
 0x8ac   :  { %13546 = vmatpush3.bf16.msra.mxu1 %v15108_v24  ;;  %13576 = vmatpush3.bf16.msra.mxu0 %v14984_v31 }
 0x8ad   :  { %13547 = vmatprep.subr.bf16.mxu1 %v14868_v9  ;;  %13577 = vmatprep.subr.bf16.mxu0 %v14868_v9 }
 0x8ae   :  { %11582 = vmatprep.mubr.msk.f32.mxu1 %vm14867_vm0, %v14866_v0 }
 0x8b0   :  { %13549 = vmatpush3.bf16.msra.mxu1 %v15138_v35  ;;  %13579 = vmatpush3.bf16.msra.mxu0 %v14995_v36 }
 0x8b1   :  { %13550 = vmatprep.subr.bf16.mxu1 %v14868_v9  ;;  %13580 = vmatprep.subr.bf16.mxu0 %v14868_v9 }
 0x8b4   :  { %13552 = vmatpush3.bf16.msra.mxu1 %v15170_v46  ;;  %13582 = vmatpush3.bf16.msra.mxu0 %v15010_v43 }
 0x8b5   :  { %13553 = vmatprep.subr.bf16.mxu1 %v14868_v9  ;;  %13583 = vmatprep.subr.bf16.mxu0 %v14868_v9 }
 0x8b8   :  { %13555 = vmatpush3.bf16.msra.mxu1 %v15198_v23  ;;  %13585 = vmatpush3.bf16.msra.mxu0 %v15032_v52 }
 0x8b9   :  { %13556 = vmatprep.subr.bf16.mxu1 %v14868_v9  ;;  %13586 = vmatprep.subr.bf16.mxu0 %v14868_v9 }
 0x8bc   :  { %13558 = vmatpush3.bf16.msra.mxu1 %v15216_v34  ;;  %13588 = vmatpush3.bf16.msra.mxu0 %v15059_v63 }
 0x8bd   :  { %13559 = vmatprep.subr.bf16.mxu1 %v14868_v9  ;;  %13589 = vmatprep.subr.bf16.mxu0 %v14868_v9 }
 0x8c0   :  { %13561 = vmatpush3.bf16.msra.mxu1 %v15232_v11  ;;  %13591 = vmatpush3.bf16.msra.mxu0 %v15085_v3 }
 0x8c1   :  { %13562 = vmatprep.subr.bf16.mxu1 %v14868_v9  ;;  %13616 = vmatprep.subr.bf16.mxu0 %v14868_v9 }
 0x8c3   :  { %11618 = vmatmul.mubr.f32.vlgmr.msra.gmra.mrb[18].mxu0 %v2937_v14 }
 0x8c4   :  { %13564 = vmatpush3.bf16.msra.mxu1 %v15242_v55  ;;  %13618 = vmatpush3.bf16.msra.mxu0 %v14969_v21 }
 0x8c5   :  { %13565 = vmatprep.subr.bf16.mxu1 %v14868_v9  ;;  %13619 = vmatprep.subr.bf16.mxu0 %v14868_v9 }
 0x8c6   :  { %11687 = vmatprep.mubr.msk.f32.mxu0 %vm14867_vm0, %v14866_v0 }
 0x8c8   :  { %13567 = vmatpush3.bf16.msra.mxu1 %v15252_v1  ;;  %13621 = vmatpush3.bf16.msra.mxu0 %v14975_v26 }
 0x8c9   :  { %13592 = vmatprep.subr.bf16.mxu1 %v14868_v9  ;;  %13622 = vmatprep.subr.bf16.mxu0 %v14868_v9 }
 0x8cb   :  { %11583 = vmatmul.mubr.f32.vlgmr.msra.gmra.mrb[20].mxu1 %v2936_v13 }
 0x8cc   :  { %13594 = vmatpush3.bf16.msra.mxu1 %v15262_v37  ;;  %13624 = vmatpush3.bf16.msra.mxu0 %v14984_v31 }
 0x8cd   :  { %13595 = vmatprep.subr.bf16.mxu1 %v14868_v9  ;;  %13625 = vmatprep.subr.bf16.mxu0 %v14868_v9 }
 0x8ce   :  { %11652 = vmatprep.mubr.msk.f32.mxu1 %vm14867_vm0, %v14866_v0 }
 0x8d0   :  { %13597 = vmatpush3.bf16.msra.mxu1 %v15274_v41  ;;  %13627 = vmatpush3.bf16.msra.mxu0 %v14995_v36 }
 0x8d1   :  { %13598 = vmatprep.subr.bf16.mxu1 %v14868_v9  ;;  %13628 = vmatprep.subr.bf16.mxu0 %v14868_v9 }
 0x8d4   :  { %13600 = vmatpush3.bf16.msra.mxu1 %v15288_v42  ;;  %13630 = vmatpush3.bf16.msra.mxu0 %v15010_v43 }
 0x8d5   :  { %13601 = vmatprep.subr.bf16.mxu1 %v14868_v9  ;;  %13631 = vmatprep.subr.bf16.mxu0 %v14868_v9 }
 0x8d8   :  { %13603 = vmatpush3.bf16.msra.mxu1 %v15298_v48  ;;  %13633 = vmatpush3.bf16.msra.mxu0 %v15032_v52 }
 0x8d9   :  { %13604 = vmatprep.subr.bf16.mxu1 %v14868_v9  ;;  %13634 = vmatprep.subr.bf16.mxu0 %v14868_v9 }
 0x8dc   :  { %13606 = vmatpush3.bf16.msra.mxu1 %v15308_v49  ;;  %13636 = vmatpush3.bf16.msra.mxu0 %v15059_v63 }
 0x8dd   :  { %13607 = vmatprep.subr.bf16.mxu1 %v14868_v9  ;;  %13637 = vmatprep.subr.bf16.mxu0 %v14868_v9 }
 0x8e0   :  { %13609 = vmatpush3.bf16.msra.mxu1 %v15318_v50  ;;  %13639 = vmatpush3.bf16.msra.mxu0 %v15085_v3 }
 0x8e1   :  { %13610 = vmatprep.subr.bf16.mxu1 %v14868_v9  ;;  %13676 = vmatprep.subr.bf16.mxu0 %v14868_v9 }
 0x8e3   :  { %11688 = vmatmul.mubr.f32.vlgmr.msra.gmra.mrb[20].mxu0 %v15628_v4 }
 0x8e4   :  { %13612 = vmatpush3.bf16.msra.mxu1 %v15328_v51  ;;  %13678 = vmatpush3.bf16.msra.mxu0 %v14969_v21 }
 0x8e5   :  { %13613 = vmatprep.subr.bf16.mxu1 %v14868_v9  ;;  %13679 = vmatprep.subr.bf16.mxu0 %v14868_v9 }
 0x8e6   :  { %11788 = vmatprep.mubr.msk.f32.mxu0 %vm14867_vm0, %v14866_v0 }
 0x8e8   :  { %13615 = vmatpush3.bf16.msra.mxu1 %v15338_v58  ;;  %13681 = vmatpush3.bf16.msra.mxu0 %v14975_v26 }
 0x8e9   :  { %13640 = vmatprep.subr.bf16.mxu1 %v14868_v9  ;;  %13682 = vmatprep.subr.bf16.mxu0 %v14868_v9 }
 0x8eb   :  { %11653 = vmatmul.mubr.f32.vlgmr.msra.gmra.mrb[22].mxu1 %v15628_v4 }
 0x8ec   :  { %13642 = vmatpush3.bf16.msra.mxu1 %v15398_v27  ;;  %11698 = vmatprep.mubr.msk.f32.mxu1 %vm14867_vm0, %v14866_v0 }
 0x8ed   :  { %13643 = vmatprep.subr.bf16.mxu1 %v14868_v9  ;;  %13684 = vmatpush3.bf16.msra.mxu0 %v14984_v31 }
 0x8ee   :  { %13685 = vmatprep.subr.bf16.mxu0 %v14868_v9 }
 0x8f0   :  { %13645 = vmatpush3.bf16.msra.mxu1 %v15402_v16 }
 0x8f1   :  { %13646 = vmatprep.subr.bf16.mxu1 %v14868_v9  ;;  %13687 = vmatpush3.bf16.msra.mxu0 %v14995_v36 }
 0x8f2   :  { %13688 = vmatprep.subr.bf16.mxu0 %v14868_v9 }
 0x8f5   :  { %13690 = vmatpush3.bf16.msra.mxu0 %v15010_v43 }
 0x8f6   :  { %13691 = vmatprep.subr.bf16.mxu0 %v14868_v9 }
 0x8f9   :  { %13693 = vmatpush3.bf16.msra.mxu0 %v15032_v52 }
 0x8fa   :  { %13694 = vmatprep.subr.bf16.mxu0 %v14868_v9 }
 0x8fd   :  { %13696 = vmatpush3.bf16.msra.mxu0 %v15059_v63 }
 0x8fe   :  { %13697 = vmatprep.subr.bf16.mxu0 %v14868_v9 }
 0x901   :  { %13699 = vmatpush3.bf16.msra.mxu0 %v15085_v3 }
 0x902   :  { %13724 = vmatprep.subr.bf16.mxu0 %v14868_v9 }
 0x976   :  { %v3092_v28 = vpop.f32.mrb[16].mxu0 }
 0x977   :  { %v11549_v22 = vpop.f32.mrb[17].mxu0 }
 0x97e   :  { %v2941_v39 = vpop.f32.mrb[18].mxu1 }
 0x97f   :  { %v3093_v40 = vadd.f32 %v3092_v28, %v2941_v39  ;;  %v11514_v60 = vpop.f32.mrb[19].mxu1 }
 0x996   :  { %v3285_v29 = vpop.f32.mrb[18].mxu0 }
 0x997   :  { %v11619_v30 = vpop.f32.mrb[19].mxu0 }
 0x99e   :  { %v3196_v7 = vpop.f32.mrb[20].mxu1 }
 0x99f   :  { %v3197_v6 = vadd.f32 %v3196_v7, %v3093_v40  ;;  %v11584_v47 = vpop.f32.mrb[21].mxu1 }
 0x9a1   :  { %v3286_v2 = vadd.f32 %v3285_v29, %v3197_v6 }
 0x9b6   :  { %v3491_v33 = vpop.f32.mrb[20].mxu0 }
 0x9b7   :  { %v11689_v53 = vpop.f32.mrb[21].mxu0 }
 0x9be   :  { %v3404_v54 = vpop.f32.mrb[22].mxu1 }
 0x9bf   :  { %v3405_v62 = vadd.f32 %v3404_v54, %v3286_v2  ;;  %v11654_v4 = vpop.f32.mrb[23].mxu1 }
 0x9c1   :  { %v3492_v13 = vadd.f32 %v3491_v33, %v3405_v62 }
 0x9c3   :  { %v3495_v14 = vadd.f32 %v15389_v8, %v3492_v13 }
 0x9c5   :  { %14694 = vtanh.f32 %v3495_v14  ;;  %v9824_v59 = vmul.f32 -1.442695, %v3495_v14 }
 0x9c7   :  { %14696 = vpow2.f32 %v9824_v59 }
 0x9cf   :  { %v14695_v15 = vpop.eup %14694 }
 0x9d0   :  { %3505 = vrot.lane.b32.xlu0 %v14695_v15, %s14869_s3 }
 0x9d1   :  { %v14697_v28 = vpop.eup %14696 }
 0x9d2   :  { %v3499_v22 = vadd.f32 1.0, %v14697_v28 }
 0x9d4   :  { %14698 = vrcp.f32 %v3499_v22 }
 0x9de   :  { %v14699_v39 = vpop.eup %14698 }
 0x9df   :  { %v3503_v29 = vmul.f32 %v14699_v39, %v15562_v20 }
 0xa42   :  { %v3506_v40 = vpop.permute.xlu0 %3505 }
 0xa43   :  { %v3508_v60 = vmul.f32 %v14699_v39, %v3506_v40 }
 0xa45   :  { %3510 = vrot.lane.b32.xlu1 %v3508_v60, %s14870_s15 }
 0xab7   :  { %v3511_v30 = vpop.permute.xlu1 %3510 }
 0xab8   :  { %v15734_v7 = vadd.f32 %v3511_v30, %v3503_v29 }
 0xaba   :  { %14700 = vtanh.f32 %v15734_v7 }
 0xac4   :  { %v14701_v6 = vpop.eup %14700 }
 0xac5   :  { %3516 = vrot.lane.b32.xlu0 %v14701_v6, %s14869_s3 }
 0xb37   :  { %v3517_v47 = vpop.permute.xlu0 %3516 }
 0xb38   :  { %v3519_v2 = vmul.f32 %v14699_v39, %v3517_v47 }
 0xb3a   :  { %3521 = vrot.lane.b32.xlu1 %v3519_v2, %s14870_s15 }
 0xbac   :  { %v3522_v33 = vpop.permute.xlu1 %3521 }
 0xbad   :  { %v3523_v53 = vsel %vm1207_vm2, %v3522_v33, 0 }
 0xbae   :  { %v3594_v54 = vand.u32 4294901760, %v3523_v53 }
 0xbb0   :  { %v3595_v62 = vsub.f32 %v3523_v53, %v3594_v54 }
 0xbb2   :  { %v3596_v4 = vand.u32 4294901760, %v3595_v62 }
 0xbb4   :  { %v3597_v13 = vsub.f32 %v3595_v62, %v3596_v4 }
 0xbb6   :  { %v3598_v20 = vand.u32 4294901760, %v3597_v13 }
 0xbb8   :  { %11699 = vmatmul.mubr.f32.vlgmr.msra.gmra.mrb[24].mxu1 %v3598_v20 }
 0xbb9   :  { %13648 = vmatpush3.bf16.msra.mxu1 %v15406_v61  ;;  %11709 = vmatprep.mubr.msk.f32.mxu1 %vm14867_vm0, %v14866_v0 }
 0xbba   :  { %13649 = vmatprep.subr.bf16.mxu1 %v14868_v9 }
 0xbbd   :  { %13651 = vmatpush3.bf16.msra.mxu1 %v15409_v17 }
 0xbbe   :  { %13652 = vmatprep.subr.bf16.mxu1 %v14868_v9 }
 0xbc0   :  { %11710 = vmatmul.mubr.f32.vlgmr.msra.gmra.mrb[24].mxu1 %v3594_v54 }
 0xbc1   :  { %13654 = vmatpush3.bf16.msra.mxu1 %v15411_v18  ;;  %11720 = vmatprep.mubr.msk.f32.mxu1 %vm14867_vm0, %v14866_v0 }
 0xbc2   :  { %13655 = vmatprep.subr.bf16.mxu1 %v14868_v9 }
 0xbc5   :  { %13657 = vmatpush3.bf16.msra.mxu1 %v15413_v5 }
 0xbc6   :  { %13658 = vmatprep.subr.bf16.mxu1 %v14868_v9 }
 0xbc8   :  { %11721 = vmatmul.mubr.f32.vlgmr.msra.gmra.mrb[24].mxu1 %v3595_v62 }
 0xbc9   :  { %13660 = vmatpush3.bf16.msra.mxu1 %v15398_v27  ;;  %11731 = vmatprep.mubr.msk.f32.mxu1 %vm14867_vm0, %v14866_v0 }
 0xbca   :  { %13661 = vmatprep.subr.bf16.mxu1 %v14868_v9 }
 0xbcd   :  { %13663 = vmatpush3.bf16.msra.mxu1 %v15402_v16 }
 0xbce   :  { %13664 = vmatprep.subr.bf16.mxu1 %v14868_v9 }
 0xbd0   :  { %11732 = vmatmul.mubr.f32.vlgmr.msra.gmra.mrb[24].mxu1 %v3596_v4 }
 0xbd1   :  { %13666 = vmatpush3.bf16.msra.mxu1 %v15415_v44  ;;  %11742 = vmatprep.mubr.msk.f32.mxu1 %vm14867_vm0, %v14866_v0 }
 0xbd2   :  { %13667 = vmatprep.subr.bf16.mxu1 %v14868_v9 }
 0xbd5   :  { %13669 = vmatpush3.bf16.msra.mxu1 %v15417_v45 }
 0xbd6   :  { %13670 = vmatprep.subr.bf16.mxu1 %v14868_v9 }
 0xbd8   :  { %11743 = vmatmul.mubr.f32.vlgmr.msra.gmra.mrb[24].mxu1 %v3594_v54 }
 0xbd9   :  { %13672 = vmatpush3.bf16.msra.mxu1 %v15398_v27  ;;  %11753 = vmatprep.mubr.msk.f32.mxu1 %vm14867_vm0, %v14866_v0 }
 0xbda   :  { %13673 = vmatprep.subr.bf16.mxu1 %v14868_v9 }
 0xbdd   :  { %13675 = vmatpush3.bf16.msra.mxu1 %v15402_v16 }
 0xbde   :  { %13700 = vmatprep.subr.bf16.mxu1 %v14868_v9 }
 0xbe0   :  { %11754 = vmatmul.mubr.f32.vlgmr.msra.gmra.mrb[24].mxu1 %v3594_v54 }
 0xbe1   :  { %13702 = vmatpush3.bf16.msra.mxu1 %v15100_v19  ;;  %11823 = vmatprep.mubr.msk.f32.mxu1 %vm14867_vm0, %v14866_v0 }
 0xbe2   :  { %13703 = vmatprep.subr.bf16.mxu1 %v14868_v9 }
 0xbe5   :  { %13705 = vmatpush3.bf16.msra.mxu1 %v15127_v32 }
 0xbe6   :  { %13706 = vmatprep.subr.bf16.mxu1 %v14868_v9 }
 0xbe9   :  { %13708 = vmatpush3.bf16.msra.mxu1 %v15158_v57 }
 0xbea   :  { %13709 = vmatprep.subr.bf16.mxu1 %v14868_v9 }
 0xbed   :  { %13711 = vmatpush3.bf16.msra.mxu1 %v15173_v10 }
 0xbee   :  { %13712 = vmatprep.subr.bf16.mxu1 %v14868_v9 }
 0xbf1   :  { %13714 = vmatpush3.bf16.msra.mxu1 %v15201_v25 }
 0xbf2   :  { %13715 = vmatprep.subr.bf16.mxu1 %v14868_v9 }
 0xbf5   :  { %13717 = vmatpush3.bf16.msra.mxu1 %v15220_v38 }
 0xbf6   :  { %13718 = vmatprep.subr.bf16.mxu1 %v14868_v9 }
 0xbf9   :  { %13720 = vmatpush3.bf16.msra.mxu1 %v15236_v12 }
 0xbfa   :  { %13721 = vmatprep.subr.bf16.mxu1 %v14868_v9 }
 0xbfd   :  { %13723 = vmatpush3.bf16.msra.mxu1 %v15246_v56 }
 0xbfe   :  { %13748 = vmatprep.subr.bf16.mxu1 %v14868_v9 }
 0xcb3   :  { %v4006_v14 = vpop.f32.mrb[24].mxu1 }
 0xcb4   :  { %4011 = vst [vmem:[#allocation10 + $0x4] sm:$0x3] %v4006_v14  ;;  %v15788_v15 = vand.u32 4294901760, %v4006_v14  ;;  %v11755_v59 = vpop.f32.mrb[25].mxu1 }
 0xcb6   :  { %v4094_v28 = vsub.f32 %v4006_v14, %v15788_v15  ;;  %11824 = vmatmul.mubr.f32.vlgmr.msra.gmra.mrb[26].mxu1 %v15788_v15 }
 0xcb7   :  { %13750 = vmatpush3.bf16.msra.mxu1 %v14969_v21  ;;  %11893 = vmatprep.mubr.msk.f32.mxu1 %vm14867_vm0, %v14866_v0 }
 0xcb8   :  { %v4095_v22 = vand.u32 4294901760, %v4094_v28  ;;  %13751 = vmatprep.subr.bf16.mxu1 %v14868_v9 }
 0xcba   :  { %v4096_v39 = vsub.f32 %v4094_v28, %v4095_v22 }
 0xcbb   :  { %13753 = vmatpush3.bf16.msra.mxu1 %v14975_v26 }
 0xcbc   :  { %13754 = vmatprep.subr.bf16.mxu1 %v14868_v9  ;;  %v4097_v40 = vand.u32 4294901760, %v4096_v39 }
 0xcbe   :  { %11789 = vmatmul.mubr.f32.vlgmr.msra.gmra.mrb[22].mxu0 %v4097_v40 }
 0xcbf   :  { %13726 = vmatpush3.bf16.msra.mxu0 %v15108_v24  ;;  %13756 = vmatpush3.bf16.msra.mxu1 %v14984_v31 }
 0xcc0   :  { %13727 = vmatprep.subr.bf16.mxu0 %v14868_v9  ;;  %13757 = vmatprep.subr.bf16.mxu1 %v14868_v9 }
 0xcc1   :  { %11858 = vmatprep.mubr.msk.f32.mxu0 %vm14867_vm0, %v14866_v0 }
 0xcc3   :  { %13729 = vmatpush3.bf16.msra.mxu0 %v15138_v35  ;;  %13759 = vmatpush3.bf16.msra.mxu1 %v14995_v36 }
 0xcc4   :  { %13730 = vmatprep.subr.bf16.mxu0 %v14868_v9  ;;  %13760 = vmatprep.subr.bf16.mxu1 %v14868_v9 }
 0xcc7   :  { %13732 = vmatpush3.bf16.msra.mxu0 %v15170_v46  ;;  %13762 = vmatpush3.bf16.msra.mxu1 %v15010_v43 }
 0xcc8   :  { %13733 = vmatprep.subr.bf16.mxu0 %v14868_v9  ;;  %13763 = vmatprep.subr.bf16.mxu1 %v14868_v9 }
 0xccb   :  { %13735 = vmatpush3.bf16.msra.mxu0 %v15198_v23  ;;  %13765 = vmatpush3.bf16.msra.mxu1 %v15032_v52 }
 0xccc   :  { %13736 = vmatprep.subr.bf16.mxu0 %v14868_v9  ;;  %13766 = vmatprep.subr.bf16.mxu1 %v14868_v9 }
 0xccf   :  { %13738 = vmatpush3.bf16.msra.mxu0 %v15216_v34  ;;  %13768 = vmatpush3.bf16.msra.mxu1 %v15059_v63 }
 0xcd0   :  { %13739 = vmatprep.subr.bf16.mxu0 %v14868_v9  ;;  %13769 = vmatprep.subr.bf16.mxu1 %v14868_v9 }
 0xcd3   :  { %13741 = vmatpush3.bf16.msra.mxu0 %v15232_v11  ;;  %13771 = vmatpush3.bf16.msra.mxu1 %v15085_v3 }
 0xcd4   :  { %13742 = vmatprep.subr.bf16.mxu0 %v14868_v9  ;;  %13796 = vmatprep.subr.bf16.mxu1 %v14868_v9 }
 0xcd6   :  { %11894 = vmatmul.mubr.f32.vlgmr.msra.gmra.mrb[28].mxu1 %v4095_v22 }
 0xcd7   :  { %13744 = vmatpush3.bf16.msra.mxu0 %v15242_v55  ;;  %13798 = vmatpush3.bf16.msra.mxu1 %v14969_v21 }
 0xcd8   :  { %13745 = vmatprep.subr.bf16.mxu0 %v14868_v9  ;;  %13799 = vmatprep.subr.bf16.mxu1 %v14868_v9 }
 0xcd9   :  { %11963 = vmatprep.mubr.msk.f32.mxu1 %vm14867_vm0, %v14866_v0 }
 0xcdb   :  { %13747 = vmatpush3.bf16.msra.mxu0 %v15252_v1  ;;  %13801 = vmatpush3.bf16.msra.mxu1 %v14975_v26 }
 0xcdc   :  { %13772 = vmatprep.subr.bf16.mxu0 %v14868_v9  ;;  %13802 = vmatprep.subr.bf16.mxu1 %v14868_v9 }
 0xcde   :  { %11859 = vmatmul.mubr.f32.vlgmr.msra.gmra.mrb[24].mxu0 %v4094_v28 }
 0xcdf   :  { %13774 = vmatpush3.bf16.msra.mxu0 %v15262_v37  ;;  %13804 = vmatpush3.bf16.msra.mxu1 %v14984_v31 }
 0xce0   :  { %13775 = vmatprep.subr.bf16.mxu0 %v14868_v9  ;;  %13805 = vmatprep.subr.bf16.mxu1 %v14868_v9 }
 0xce1   :  { %11928 = vmatprep.mubr.msk.f32.mxu0 %vm14867_vm0, %v14866_v0 }
 0xce3   :  { %13777 = vmatpush3.bf16.msra.mxu0 %v15274_v41  ;;  %13807 = vmatpush3.bf16.msra.mxu1 %v14995_v36 }
 0xce4   :  { %13778 = vmatprep.subr.bf16.mxu0 %v14868_v9  ;;  %13808 = vmatprep.subr.bf16.mxu1 %v14868_v9 }
 0xce7   :  { %13780 = vmatpush3.bf16.msra.mxu0 %v15288_v42  ;;  %13810 = vmatpush3.bf16.msra.mxu1 %v15010_v43 }
 0xce8   :  { %13781 = vmatprep.subr.bf16.mxu0 %v14868_v9  ;;  %13811 = vmatprep.subr.bf16.mxu1 %v14868_v9 }
 0xceb   :  { %13783 = vmatpush3.bf16.msra.mxu0 %v15298_v48  ;;  %13813 = vmatpush3.bf16.msra.mxu1 %v15032_v52 }
 0xcec   :  { %13784 = vmatprep.subr.bf16.mxu0 %v14868_v9  ;;  %13814 = vmatprep.subr.bf16.mxu1 %v14868_v9 }
 0xcef   :  { %13786 = vmatpush3.bf16.msra.mxu0 %v15308_v49  ;;  %13816 = vmatpush3.bf16.msra.mxu1 %v15059_v63 }
 0xcf0   :  { %13787 = vmatprep.subr.bf16.mxu0 %v14868_v9  ;;  %13817 = vmatprep.subr.bf16.mxu1 %v14868_v9 }
 0xcf3   :  { %13789 = vmatpush3.bf16.msra.mxu0 %v15318_v50  ;;  %13819 = vmatpush3.bf16.msra.mxu1 %v15085_v3 }
 0xcf4   :  { %13790 = vmatprep.subr.bf16.mxu0 %v14868_v9  ;;  %13856 = vmatprep.subr.bf16.mxu1 %v14868_v9 }
 0xcf6   :  { %11964 = vmatmul.mubr.f32.vlgmr.msra.gmra.mrb[30].mxu1 %v15788_v15 }
 0xcf7   :  { %13792 = vmatpush3.bf16.msra.mxu0 %v15328_v51  ;;  %13858 = vmatpush3.bf16.msra.mxu1 %v14969_v21 }
 0xcf8   :  { %13793 = vmatprep.subr.bf16.mxu0 %v14868_v9  ;;  %13859 = vmatprep.subr.bf16.mxu1 %v14868_v9 }
 0xcf9   :  { %12064 = vmatprep.mubr.msk.f32.mxu1 %vm14867_vm0, %v14866_v0 }
 0xcfb   :  { %13795 = vmatpush3.bf16.msra.mxu0 %v15338_v58  ;;  %13861 = vmatpush3.bf16.msra.mxu1 %v14975_v26 }
 0xcfc   :  { %13820 = vmatprep.subr.bf16.mxu0 %v14868_v9  ;;  %13862 = vmatprep.subr.bf16.mxu1 %v14868_v9 }
 0xcfe   :  { %11929 = vmatmul.mubr.f32.vlgmr.msra.gmra.mrb[26].mxu0 %v15788_v15 }
 0xcff   :  { %13822 = vmatpush3.bf16.msra.mxu0 %v15398_v27  ;;  %11974 = vmatprep.mubr.msk.f32.mxu0 %vm14867_vm0, %v14866_v0 }
 0xd00   :  { %13823 = vmatprep.subr.bf16.mxu0 %v14868_v9  ;;  %13864 = vmatpush3.bf16.msra.mxu1 %v14984_v31 }
 0xd01   :  { %13865 = vmatprep.subr.bf16.mxu1 %v14868_v9 }
 0xd03   :  { %13825 = vmatpush3.bf16.msra.mxu0 %v15402_v16 }
 0xd04   :  { %13826 = vmatprep.subr.bf16.mxu0 %v14868_v9  ;;  %13867 = vmatpush3.bf16.msra.mxu1 %v14995_v36 }
 0xd05   :  { %13868 = vmatprep.subr.bf16.mxu1 %v14868_v9 }
 0xd08   :  { %13870 = vmatpush3.bf16.msra.mxu1 %v15010_v43 }
 0xd09   :  { %13871 = vmatprep.subr.bf16.mxu1 %v14868_v9 }
 0xd0c   :  { %13873 = vmatpush3.bf16.msra.mxu1 %v15032_v52 }
 0xd0d   :  { %13874 = vmatprep.subr.bf16.mxu1 %v14868_v9 }
 0xd10   :  { %13876 = vmatpush3.bf16.msra.mxu1 %v15059_v63 }
 0xd11   :  { %13877 = vmatprep.subr.bf16.mxu1 %v14868_v9 }
 0xd14   :  { %13879 = vmatpush3.bf16.msra.mxu1 %v15085_v3 }
 0xd15   :  { %13904 = vmatprep.subr.bf16.mxu1 %v14868_v9 }
 0xd89   :  { %v4250_v60 = vpop.f32.mrb[26].mxu1 }
 0xd8a   :  { %v11825_v29 = vpop.f32.mrb[27].mxu1 }
 0xd91   :  { %v4099_v30 = vpop.f32.mrb[22].mxu0 }
 0xd92   :  { %v4251_v6 = vadd.f32 %v4250_v60, %v4099_v30  ;;  %v11790_v47 = vpop.f32.mrb[23].mxu0 }
 0xda9   :  { %v4443_v2 = vpop.f32.mrb[28].mxu1 }
 0xdaa   :  { %v11895_v33 = vpop.f32.mrb[29].mxu1 }
 0xdb1   :  { %v4354_v53 = vpop.f32.mrb[24].mxu0 }
 0xdb2   :  { %v4355_v54 = vadd.f32 %v4354_v53, %v4251_v6  ;;  %v11860_v62 = vpop.f32.mrb[25].mxu0 }
 0xdb4   :  { %v4444_v4 = vadd.f32 %v4443_v2, %v4355_v54 }
 0xdc9   :  { %v4649_v13 = vpop.f32.mrb[30].mxu1 }
 0xdca   :  { %v11965_v20 = vpop.f32.mrb[31].mxu1 }
 0xdd1   :  { %v4562_v14 = vpop.f32.mrb[26].mxu0 }
 0xdd2   :  { %v4563_v15 = vadd.f32 %v4562_v14, %v4444_v4  ;;  %v11930_v59 = vpop.f32.mrb[27].mxu0 }
 0xdd4   :  { %v4650_v28 = vadd.f32 %v4649_v13, %v4563_v15 }
 0xdd6   :  { %v4653_v22 = vadd.f32 %v15389_v8, %v4650_v28 }
 0xdd8   :  { %14702 = vtanh.f32 %v4653_v22  ;;  %v9825_v40 = vmul.f32 -1.442695, %v4653_v22 }
 0xdda   :  { %14704 = vpow2.f32 %v9825_v40 }
 0xde2   :  { %v14703_v39 = vpop.eup %14702 }
 0xde3   :  { %4663 = vrot.lane.b32.xlu0 %v14703_v39, %s14869_s3 }
 0xde4   :  { %v14705_v60 = vpop.eup %14704 }
 0xde5   :  { %v4657_v29 = vadd.f32 1.0, %v14705_v60 }
 0xde7   :  { %14706 = vrcp.f32 %v4657_v29 }
 0xdf1   :  { %v14707_v30 = vpop.eup %14706 }
 0xdf2   :  { %v4661_v2 = vmul.f32 %v14707_v30, %v15734_v7 }
 0xe55   :  { %v4664_v6 = vpop.permute.xlu0 %4663 }
 0xe56   :  { %v4666_v47 = vmul.f32 %v14707_v30, %v4664_v6 }
 0xe58   :  { %4668 = vrot.lane.b32.xlu1 %v4666_v47, %s14870_s15 }
 0xeca   :  { %v4669_v33 = vpop.permute.xlu1 %4668 }
 0xecb   :  { %v15894_v53 = vadd.f32 %v4669_v33, %v4661_v2 }
 0xecd   :  { %14708 = vtanh.f32 %v15894_v53 }
 0xed7   :  { %v14709_v54 = vpop.eup %14708 }
 0xed8   :  { %4674 = vrot.lane.b32.xlu0 %v14709_v54, %s14869_s3 }
 0xf4a   :  { %v4675_v62 = vpop.permute.xlu0 %4674 }
 0xf4b   :  { %v4677_v4 = vmul.f32 %v14707_v30, %v4675_v62 }
 0xf4d   :  { %4679 = vrot.lane.b32.xlu1 %v4677_v4, %s14870_s15 }
 0xfbf   :  { %v4680_v13 = vpop.permute.xlu1 %4679 }
 0xfc0   :  { %v4681_v20 = vsel %vm1207_vm2, %v4680_v13, 0 }
 0xfc1   :  { %v4752_v14 = vand.u32 4294901760, %v4681_v20 }
 0xfc3   :  { %v4753_v15 = vsub.f32 %v4681_v20, %v4752_v14 }
 0xfc5   :  { %v4754_v59 = vand.u32 4294901760, %v4753_v15 }
 0xfc7   :  { %v4755_v28 = vsub.f32 %v4753_v15, %v4754_v59 }
 0xfc9   :  { %v4756_v7 = vand.u32 4294901760, %v4755_v28 }
 0xfcb   :  { %11975 = vmatmul.mubr.f32.vlgmr.msra.gmra.mrb[28].mxu0 %v4756_v7 }
 0xfcc   :  { %13828 = vmatpush3.bf16.msra.mxu0 %v15406_v61  ;;  %11985 = vmatprep.mubr.msk.f32.mxu0 %vm14867_vm0, %v14866_v0 }
 0xfcd   :  { %13829 = vmatprep.subr.bf16.mxu0 %v14868_v9 }
 0xfd0   :  { %13831 = vmatpush3.bf16.msra.mxu0 %v15409_v17 }
 0xfd1   :  { %13832 = vmatprep.subr.bf16.mxu0 %v14868_v9 }
 0xfd3   :  { %11986 = vmatmul.mubr.f32.vlgmr.msra.gmra.mrb[28].mxu0 %v4752_v14 }
 0xfd4   :  { %13834 = vmatpush3.bf16.msra.mxu0 %v15411_v18  ;;  %11996 = vmatprep.mubr.msk.f32.mxu0 %vm14867_vm0, %v14866_v0 }
 0xfd5   :  { %13835 = vmatprep.subr.bf16.mxu0 %v14868_v9 }
 0xfd8   :  { %13837 = vmatpush3.bf16.msra.mxu0 %v15413_v5 }
 0xfd9   :  { %13838 = vmatprep.subr.bf16.mxu0 %v14868_v9 }
 0xfdb   :  { %11997 = vmatmul.mubr.f32.vlgmr.msra.gmra.mrb[28].mxu0 %v4753_v15 }
 0xfdc   :  { %13840 = vmatpush3.bf16.msra.mxu0 %v15398_v27  ;;  %12007 = vmatprep.mubr.msk.f32.mxu0 %vm14867_vm0, %v14866_v0 }
 0xfdd   :  { %13841 = vmatprep.subr.bf16.mxu0 %v14868_v9 }
 0xfe0   :  { %13843 = vmatpush3.bf16.msra.mxu0 %v15402_v16 }
 0xfe1   :  { %13844 = vmatprep.subr.bf16.mxu0 %v14868_v9 }
 0xfe3   :  { %12008 = vmatmul.mubr.f32.vlgmr.msra.gmra.mrb[28].mxu0 %v4754_v59 }
 0xfe4   :  { %13846 = vmatpush3.bf16.msra.mxu0 %v15415_v44  ;;  %12018 = vmatprep.mubr.msk.f32.mxu0 %vm14867_vm0, %v14866_v0 }
 0xfe5   :  { %13847 = vmatprep.subr.bf16.mxu0 %v14868_v9 }
 0xfe8   :  { %13849 = vmatpush3.bf16.msra.mxu0 %v15417_v45 }
 0xfe9   :  { %13850 = vmatprep.subr.bf16.mxu0 %v14868_v9 }
 0xfeb   :  { %12019 = vmatmul.mubr.f32.vlgmr.msra.gmra.mrb[28].mxu0 %v4752_v14 }
 0xfec   :  { %13852 = vmatpush3.bf16.msra.mxu0 %v15398_v27  ;;  %12029 = vmatprep.mubr.msk.f32.mxu0 %vm14867_vm0, %v14866_v0 }
 0xfed   :  { %13853 = vmatprep.subr.bf16.mxu0 %v14868_v9 }
 0xff0   :  { %13855 = vmatpush3.bf16.msra.mxu0 %v15402_v16 }
 0xff1   :  { %13880 = vmatprep.subr.bf16.mxu0 %v14868_v9 }
 0xff3   :  { %12030 = vmatmul.mubr.f32.vlgmr.msra.gmra.mrb[28].mxu0 %v4752_v14 }
 0xff4   :  { %13882 = vmatpush3.bf16.msra.mxu0 %v15100_v19  ;;  %12099 = vmatprep.mubr.msk.f32.mxu0 %vm14867_vm0, %v14866_v0 }
 0xff5   :  { %13883 = vmatprep.subr.bf16.mxu0 %v14868_v9 }
 0xff8   :  { %13885 = vmatpush3.bf16.msra.mxu0 %v15127_v32 }
 0xff9   :  { %13886 = vmatprep.subr.bf16.mxu0 %v14868_v9 }
 0xffc   :  { %13888 = vmatpush3.bf16.msra.mxu0 %v15158_v57 }
 0xffd   :  { %13889 = vmatprep.subr.bf16.mxu0 %v14868_v9 }
0x1000   :  { %13891 = vmatpush3.bf16.msra.mxu0 %v15173_v10 }
0x1001   :  { %13892 = vmatprep.subr.bf16.mxu0 %v14868_v9 }
0x1004   :  { %13894 = vmatpush3.bf16.msra.mxu0 %v15201_v25 }
0x1005   :  { %13895 = vmatprep.subr.bf16.mxu0 %v14868_v9 }
0x1008   :  { %13897 = vmatpush3.bf16.msra.mxu0 %v15220_v38 }
0x1009   :  { %13898 = vmatprep.subr.bf16.mxu0 %v14868_v9 }
0x100c   :  { %13900 = vmatpush3.bf16.msra.mxu0 %v15236_v12 }
0x100d   :  { %13901 = vmatprep.subr.bf16.mxu0 %v14868_v9 }
0x1010   :  { %13903 = vmatpush3.bf16.msra.mxu0 %v15246_v56 }
0x1011   :  { %13928 = vmatprep.subr.bf16.mxu0 %v14868_v9 }
0x10c6   :  { %v5164_v22 = vpop.f32.mrb[28].mxu0 }
0x10c7   :  { %5169 = vst [vmem:[#allocation10 + $0x6] sm:$0x3] %v5164_v22  ;;  %v15948_v39 = vand.u32 4294901760, %v5164_v22  ;;  %v12031_v40 = vpop.f32.mrb[29].mxu0 }
0x10c9   :  { %v5252_v60 = vsub.f32 %v5164_v22, %v15948_v39  ;;  %12100 = vmatmul.mubr.f32.vlgmr.msra.gmra.mrb[30].mxu0 %v15948_v39 }
0x10ca   :  { %13930 = vmatpush3.bf16.msra.mxu0 %v14969_v21  ;;  %12169 = vmatprep.mubr.msk.f32.mxu0 %vm14867_vm0, %v14866_v0 }
0x10cb   :  { %v5253_v29 = vand.u32 4294901760, %v5252_v60  ;;  %13931 = vmatprep.subr.bf16.mxu0 %v14868_v9 }
0x10cd   :  { %v5254_v30 = vsub.f32 %v5252_v60, %v5253_v29 }
0x10ce   :  { %13933 = vmatpush3.bf16.msra.mxu0 %v14975_v26 }
0x10cf   :  { %13934 = vmatprep.subr.bf16.mxu0 %v14868_v9  ;;  %v5255_v6 = vand.u32 4294901760, %v5254_v30 }
0x10d1   :  { %12065 = vmatmul.mubr.f32.vlgmr.msra.gmra.mrb[32].mxu1 %v5255_v6 }
0x10d2   :  { %13906 = vmatpush3.bf16.msra.mxu1 %v15108_v24  ;;  %13936 = vmatpush3.bf16.msra.mxu0 %v14984_v31 }
0x10d3   :  { %13907 = vmatprep.subr.bf16.mxu1 %v14868_v9  ;;  %13937 = vmatprep.subr.bf16.mxu0 %v14868_v9 }
0x10d4   :  { %12134 = vmatprep.mubr.msk.f32.mxu1 %vm14867_vm0, %v14866_v0 }
0x10d6   :  { %13909 = vmatpush3.bf16.msra.mxu1 %v15138_v35  ;;  %13939 = vmatpush3.bf16.msra.mxu0 %v14995_v36 }
0x10d7   :  { %13910 = vmatprep.subr.bf16.mxu1 %v14868_v9  ;;  %13940 = vmatprep.subr.bf16.mxu0 %v14868_v9 }
0x10da   :  { %13912 = vmatpush3.bf16.msra.mxu1 %v15170_v46  ;;  %13942 = vmatpush3.bf16.msra.mxu0 %v15010_v43 }
0x10db   :  { %13913 = vmatprep.subr.bf16.mxu1 %v14868_v9  ;;  %13943 = vmatprep.subr.bf16.mxu0 %v14868_v9 }
0x10de   :  { %13915 = vmatpush3.bf16.msra.mxu1 %v15198_v23  ;;  %13945 = vmatpush3.bf16.msra.mxu0 %v15032_v52 }
0x10df   :  { %13916 = vmatprep.subr.bf16.mxu1 %v14868_v9  ;;  %13946 = vmatprep.subr.bf16.mxu0 %v14868_v9 }
0x10e2   :  { %13918 = vmatpush3.bf16.msra.mxu1 %v15216_v34  ;;  %13948 = vmatpush3.bf16.msra.mxu0 %v15059_v63 }
0x10e3   :  { %13919 = vmatprep.subr.bf16.mxu1 %v14868_v9  ;;  %13949 = vmatprep.subr.bf16.mxu0 %v14868_v9 }
0x10e6   :  { %13921 = vmatpush3.bf16.msra.mxu1 %v15232_v11  ;;  %13951 = vmatpush3.bf16.msra.mxu0 %v15085_v3 }
0x10e7   :  { %13922 = vmatprep.subr.bf16.mxu1 %v14868_v9  ;;  %13976 = vmatprep.subr.bf16.mxu0 %v14868_v9 }
0x10e9   :  { %12170 = vmatmul.mubr.f32.vlgmr.msra.gmra.mrb[32].mxu0 %v5253_v29 }
0x10ea   :  { %13924 = vmatpush3.bf16.msra.mxu1 %v15242_v55  ;;  %13978 = vmatpush3.bf16.msra.mxu0 %v14969_v21 }
0x10eb   :  { %13925 = vmatprep.subr.bf16.mxu1 %v14868_v9  ;;  %13979 = vmatprep.subr.bf16.mxu0 %v14868_v9 }
0x10ec   :  { %12239 = vmatprep.mubr.msk.f32.mxu0 %vm14867_vm0, %v14866_v0 }
0x10ee   :  { %13927 = vmatpush3.bf16.msra.mxu1 %v15252_v1  ;;  %13981 = vmatpush3.bf16.msra.mxu0 %v14975_v26 }
0x10ef   :  { %13952 = vmatprep.subr.bf16.mxu1 %v14868_v9  ;;  %13982 = vmatprep.subr.bf16.mxu0 %v14868_v9 }
0x10f1   :  { %12135 = vmatmul.mubr.f32.vlgmr.msra.gmra.mrb[34].mxu1 %v5252_v60 }
0x10f2   :  { %13954 = vmatpush3.bf16.msra.mxu1 %v15262_v37  ;;  %13984 = vmatpush3.bf16.msra.mxu0 %v14984_v31 }
0x10f3   :  { %13955 = vmatprep.subr.bf16.mxu1 %v14868_v9  ;;  %13985 = vmatprep.subr.bf16.mxu0 %v14868_v9 }
0x10f4   :  { %12204 = vmatprep.mubr.msk.f32.mxu1 %vm14867_vm0, %v14866_v0 }
0x10f6   :  { %13957 = vmatpush3.bf16.msra.mxu1 %v15274_v41  ;;  %13987 = vmatpush3.bf16.msra.mxu0 %v14995_v36 }
0x10f7   :  { %13958 = vmatprep.subr.bf16.mxu1 %v14868_v9  ;;  %13988 = vmatprep.subr.bf16.mxu0 %v14868_v9 }
0x10fa   :  { %13960 = vmatpush3.bf16.msra.mxu1 %v15288_v42  ;;  %13990 = vmatpush3.bf16.msra.mxu0 %v15010_v43 }
0x10fb   :  { %13961 = vmatprep.subr.bf16.mxu1 %v14868_v9  ;;  %13991 = vmatprep.subr.bf16.mxu0 %v14868_v9 }
0x10fe   :  { %13963 = vmatpush3.bf16.msra.mxu1 %v15298_v48  ;;  %13993 = vmatpush3.bf16.msra.mxu0 %v15032_v52 }
0x10ff   :  { %13964 = vmatprep.subr.bf16.mxu1 %v14868_v9  ;;  %13994 = vmatprep.subr.bf16.mxu0 %v14868_v9 }
0x1102   :  { %13966 = vmatpush3.bf16.msra.mxu1 %v15308_v49  ;;  %13996 = vmatpush3.bf16.msra.mxu0 %v15059_v63 }
0x1103   :  { %13967 = vmatprep.subr.bf16.mxu1 %v14868_v9  ;;  %13997 = vmatprep.subr.bf16.mxu0 %v14868_v9 }
0x1106   :  { %13969 = vmatpush3.bf16.msra.mxu1 %v15318_v50  ;;  %13999 = vmatpush3.bf16.msra.mxu0 %v15085_v3 }
0x1107   :  { %13970 = vmatprep.subr.bf16.mxu1 %v14868_v9  ;;  %14036 = vmatprep.subr.bf16.mxu0 %v14868_v9 }
0x1109   :  { %12240 = vmatmul.mubr.f32.vlgmr.msra.gmra.mrb[34].mxu0 %v15948_v39 }
0x110a   :  { %13972 = vmatpush3.bf16.msra.mxu1 %v15328_v51  ;;  %14038 = vmatpush3.bf16.msra.mxu0 %v14969_v21 }
0x110b   :  { %13973 = vmatprep.subr.bf16.mxu1 %v14868_v9  ;;  %14039 = vmatprep.subr.bf16.mxu0 %v14868_v9 }
0x110c   :  { %12340 = vmatprep.mubr.msk.f32.mxu0 %vm14867_vm0, %v14866_v0 }
0x110e   :  { %13975 = vmatpush3.bf16.msra.mxu1 %v15338_v58  ;;  %14041 = vmatpush3.bf16.msra.mxu0 %v14975_v26 }
0x110f   :  { %14000 = vmatprep.subr.bf16.mxu1 %v14868_v9  ;;  %14042 = vmatprep.subr.bf16.mxu0 %v14868_v9 }
0x1111   :  { %12205 = vmatmul.mubr.f32.vlgmr.msra.gmra.mrb[36].mxu1 %v15948_v39 }
0x1112   :  { %14002 = vmatpush3.bf16.msra.mxu1 %v15398_v27  ;;  %12250 = vmatprep.mubr.msk.f32.mxu1 %vm14867_vm0, %v14866_v0 }
0x1113   :  { %14003 = vmatprep.subr.bf16.mxu1 %v14868_v9  ;;  %14044 = vmatpush3.bf16.msra.mxu0 %v14984_v31 }
0x1114   :  { %14045 = vmatprep.subr.bf16.mxu0 %v14868_v9 }
0x1116   :  { %14005 = vmatpush3.bf16.msra.mxu1 %v15402_v16 }
0x1117   :  { %14006 = vmatprep.subr.bf16.mxu1 %v14868_v9  ;;  %14047 = vmatpush3.bf16.msra.mxu0 %v14995_v36 }
0x1118   :  { %14048 = vmatprep.subr.bf16.mxu0 %v14868_v9 }
0x111b   :  { %14050 = vmatpush3.bf16.msra.mxu0 %v15010_v43 }
0x111c   :  { %14051 = vmatprep.subr.bf16.mxu0 %v14868_v9 }
0x111f   :  { %14053 = vmatpush3.bf16.msra.mxu0 %v15032_v52 }
0x1120   :  { %14054 = vmatprep.subr.bf16.mxu0 %v14868_v9 }
0x1123   :  { %14056 = vmatpush3.bf16.msra.mxu0 %v15059_v63 }
0x1124   :  { %14057 = vmatprep.subr.bf16.mxu0 %v14868_v9 }
0x1127   :  { %14059 = vmatpush3.bf16.msra.mxu0 %v15085_v3 }
0x1128   :  { %14084 = vmatprep.subr.bf16.mxu0 %v14868_v9 }
0x119c   :  { %v5408_v47 = vpop.f32.mrb[30].mxu0 }
0x119d   :  { %v12101_v2 = vpop.f32.mrb[31].mxu0 }
0x11a4   :  { %v5257_v33 = vpop.f32.mrb[32].mxu1 }
0x11a5   :  { %v5409_v54 = vadd.f32 %v5408_v47, %v5257_v33  ;;  %v12066_v62 = vpop.f32.mrb[33].mxu1 }
0x11bc   :  { %v5601_v4 = vpop.f32.mrb[32].mxu0 }
0x11bd   :  { %v12171_v13 = vpop.f32.mrb[33].mxu0 }
0x11c4   :  { %v5512_v20 = vpop.f32.mrb[34].mxu1 }
0x11c5   :  { %v5513_v14 = vadd.f32 %v5512_v20, %v5409_v54  ;;  %v12136_v15 = vpop.f32.mrb[35].mxu1 }
0x11c7   :  { %v5602_v59 = vadd.f32 %v5601_v4, %v5513_v14 }
0x11dc   :  { %v5807_v28 = vpop.f32.mrb[34].mxu0 }
0x11dd   :  { %v12241_v7 = vpop.f32.mrb[35].mxu0 }
0x11e4   :  { %v5720_v22 = vpop.f32.mrb[36].mxu1 }
0x11e5   :  { %v5721_v39 = vadd.f32 %v5720_v22, %v5602_v59  ;;  %v12206_v40 = vpop.f32.mrb[37].mxu1 }
0x11e7   :  { %v5808_v60 = vadd.f32 %v5807_v28, %v5721_v39 }
0x11e9   :  { %v5811_v29 = vadd.f32 %v15389_v8, %v5808_v60 }
0x11eb   :  { %14710 = vtanh.f32 %v5811_v29  ;;  %v9826_v6 = vmul.f32 -1.442695, %v5811_v29 }
0x11ed   :  { %14712 = vpow2.f32 %v9826_v6 }
0x11f5   :  { %v14711_v30 = vpop.eup %14710 }
0x11f6   :  { %5821 = vrot.lane.b32.xlu0 %v14711_v30, %s14869_s3 }
0x11f7   :  { %v14713_v47 = vpop.eup %14712 }
0x11f8   :  { %v5815_v2 = vadd.f32 1.0, %v14713_v47 }
0x11fa   :  { %14714 = vrcp.f32 %v5815_v2 }
0x1204   :  { %v14715_v33 = vpop.eup %14714 }
0x1205   :  { %v5819_v4 = vmul.f32 %v14715_v33, %v15894_v53 }
0x1268   :  { %v5822_v54 = vpop.permute.xlu0 %5821 }
0x1269   :  { %v5824_v62 = vmul.f32 %v14715_v33, %v5822_v54 }
0x126b   :  { %5826 = vrot.lane.b32.xlu1 %v5824_v62, %s14870_s15 }
0x12dd   :  { %v5827_v13 = vpop.permute.xlu1 %5826 }
0x12de   :  { %v16054_v20 = vadd.f32 %v5827_v13, %v5819_v4 }
0x12e0   :  { %14716 = vtanh.f32 %v16054_v20 }
0x12ea   :  { %v14717_v14 = vpop.eup %14716 }
0x12eb   :  { %5832 = vrot.lane.b32.xlu0 %v14717_v14, %s14869_s3 }
0x135d   :  { %v5833_v15 = vpop.permute.xlu0 %5832 }
0x135e   :  { %v5835_v59 = vmul.f32 %v14715_v33, %v5833_v15 }
0x1360   :  { %5837 = vrot.lane.b32.xlu1 %v5835_v59, %s14870_s15 }
0x13d2   :  { %v5838_v28 = vpop.permute.xlu1 %5837 }
0x13d3   :  { %v5839_v7 = vsel %vm1207_vm2, %v5838_v28, 0 }
0x13d4   :  { %v5910_v22 = vand.u32 4294901760, %v5839_v7 }
0x13d6   :  { %v5911_v39 = vsub.f32 %v5839_v7, %v5910_v22 }
0x13d8   :  { %v5912_v40 = vand.u32 4294901760, %v5911_v39 }
0x13da   :  { %v5913_v60 = vsub.f32 %v5911_v39, %v5912_v40 }
0x13dc   :  { %v5914_v53 = vand.u32 4294901760, %v5913_v60 }
0x13de   :  { %12251 = vmatmul.mubr.f32.vlgmr.msra.gmra.mrb[38].mxu1 %v5914_v53 }
0x13df   :  { %14008 = vmatpush3.bf16.msra.mxu1 %v15406_v61  ;;  %12261 = vmatprep.mubr.msk.f32.mxu1 %vm14867_vm0, %v14866_v0 }
0x13e0   :  { %14009 = vmatprep.subr.bf16.mxu1 %v14868_v9 }
0x13e3   :  { %14011 = vmatpush3.bf16.msra.mxu1 %v15409_v17 }
0x13e4   :  { %14012 = vmatprep.subr.bf16.mxu1 %v14868_v9 }
0x13e6   :  { %12262 = vmatmul.mubr.f32.vlgmr.msra.gmra.mrb[38].mxu1 %v5910_v22 }
0x13e7   :  { %14014 = vmatpush3.bf16.msra.mxu1 %v15411_v18  ;;  %12272 = vmatprep.mubr.msk.f32.mxu1 %vm14867_vm0, %v14866_v0 }
0x13e8   :  { %14015 = vmatprep.subr.bf16.mxu1 %v14868_v9 }
0x13eb   :  { %14017 = vmatpush3.bf16.msra.mxu1 %v15413_v5 }
0x13ec   :  { %14018 = vmatprep.subr.bf16.mxu1 %v14868_v9 }
0x13ee   :  { %12273 = vmatmul.mubr.f32.vlgmr.msra.gmra.mrb[38].mxu1 %v5911_v39 }
0x13ef   :  { %14020 = vmatpush3.bf16.msra.mxu1 %v15398_v27  ;;  %12283 = vmatprep.mubr.msk.f32.mxu1 %vm14867_vm0, %v14866_v0 }
0x13f0   :  { %14021 = vmatprep.subr.bf16.mxu1 %v14868_v9 }
0x13f3   :  { %14023 = vmatpush3.bf16.msra.mxu1 %v15402_v16 }
0x13f4   :  { %14024 = vmatprep.subr.bf16.mxu1 %v14868_v9 }
0x13f6   :  { %12284 = vmatmul.mubr.f32.vlgmr.msra.gmra.mrb[38].mxu1 %v5912_v40 }
0x13f7   :  { %14026 = vmatpush3.bf16.msra.mxu1 %v15415_v44  ;;  %12294 = vmatprep.mubr.msk.f32.mxu1 %vm14867_vm0, %v14866_v0 }
0x13f8   :  { %14027 = vmatprep.subr.bf16.mxu1 %v14868_v9 }
0x13fb   :  { %14029 = vmatpush3.bf16.msra.mxu1 %v15417_v45 }
0x13fc   :  { %14030 = vmatprep.subr.bf16.mxu1 %v14868_v9 }
0x13fe   :  { %12295 = vmatmul.mubr.f32.vlgmr.msra.gmra.mrb[38].mxu1 %v5910_v22 }
0x13ff   :  { %14032 = vmatpush3.bf16.msra.mxu1 %v15398_v27  ;;  %12305 = vmatprep.mubr.msk.f32.mxu1 %vm14867_vm0, %v14866_v0 }
0x1400   :  { %14033 = vmatprep.subr.bf16.mxu1 %v14868_v9 }
0x1403   :  { %14035 = vmatpush3.bf16.msra.mxu1 %v15402_v16 }
0x1404   :  { %14060 = vmatprep.subr.bf16.mxu1 %v14868_v9 }
0x1406   :  { %12306 = vmatmul.mubr.f32.vlgmr.msra.gmra.mrb[38].mxu1 %v5910_v22 }
0x1407   :  { %14062 = vmatpush3.bf16.msra.mxu1 %v15100_v19  ;;  %12375 = vmatprep.mubr.msk.f32.mxu1 %vm14867_vm0, %v14866_v0 }
0x1408   :  { %14063 = vmatprep.subr.bf16.mxu1 %v14868_v9 }
0x140b   :  { %14065 = vmatpush3.bf16.msra.mxu1 %v15127_v32 }
0x140c   :  { %14066 = vmatprep.subr.bf16.mxu1 %v14868_v9 }
0x140f   :  { %14068 = vmatpush3.bf16.msra.mxu1 %v15158_v57 }
0x1410   :  { %14069 = vmatprep.subr.bf16.mxu1 %v14868_v9 }
0x1413   :  { %14071 = vmatpush3.bf16.msra.mxu1 %v15173_v10 }
0x1414   :  { %14072 = vmatprep.subr.bf16.mxu1 %v14868_v9 }
0x1417   :  { %14074 = vmatpush3.bf16.msra.mxu1 %v15201_v25 }
0x1418   :  { %14075 = vmatprep.subr.bf16.mxu1 %v14868_v9 }
0x141b   :  { %14077 = vmatpush3.bf16.msra.mxu1 %v15220_v38 }
0x141c   :  { %14078 = vmatprep.subr.bf16.mxu1 %v14868_v9 }
0x141f   :  { %14080 = vmatpush3.bf16.msra.mxu1 %v15236_v12 }
0x1420   :  { %14081 = vmatprep.subr.bf16.mxu1 %v14868_v9 }
0x1423   :  { %14083 = vmatpush3.bf16.msra.mxu1 %v15246_v56 }
0x1424   :  { %14108 = vmatprep.subr.bf16.mxu1 %v14868_v9 }
0x14d9   :  { %v6322_v29 = vpop.f32.mrb[38].mxu1 }
0x14da   :  { %6327 = vst [vmem:[#allocation10 + $0x8] sm:$0x3] %v6322_v29  ;;  %v16108_v30 = vand.u32 4294901760, %v6322_v29  ;;  %v12307_v6 = vpop.f32.mrb[39].mxu1 }
0x14dc   :  { %v6410_v47 = vsub.f32 %v6322_v29, %v16108_v30  ;;  %12376 = vmatmul.mubr.f32.vlgmr.msra.gmra.mrb[40].mxu1 %v16108_v30 }
0x14dd   :  { %14110 = vmatpush3.bf16.msra.mxu1 %v14969_v21  ;;  %12445 = vmatprep.mubr.msk.f32.mxu1 %vm14867_vm0, %v14866_v0 }
0x14de   :  { %v6411_v2 = vand.u32 4294901760, %v6410_v47  ;;  %14111 = vmatprep.subr.bf16.mxu1 %v14868_v9 }
0x14e0   :  { %v6412_v33 = vsub.f32 %v6410_v47, %v6411_v2 }
0x14e1   :  { %14113 = vmatpush3.bf16.msra.mxu1 %v14975_v26 }
0x14e2   :  { %14114 = vmatprep.subr.bf16.mxu1 %v14868_v9  ;;  %v6413_v54 = vand.u32 4294901760, %v6412_v33 }
0x14e4   :  { %12341 = vmatmul.mubr.f32.vlgmr.msra.gmra.mrb[36].mxu0 %v6413_v54 }
0x14e5   :  { %14086 = vmatpush3.bf16.msra.mxu0 %v15108_v24  ;;  %14116 = vmatpush3.bf16.msra.mxu1 %v14984_v31 }
0x14e6   :  { %14087 = vmatprep.subr.bf16.mxu0 %v14868_v9  ;;  %14117 = vmatprep.subr.bf16.mxu1 %v14868_v9 }
0x14e7   :  { %12410 = vmatprep.mubr.msk.f32.mxu0 %vm14867_vm0, %v14866_v0 }
0x14e9   :  { %14089 = vmatpush3.bf16.msra.mxu0 %v15138_v35  ;;  %14119 = vmatpush3.bf16.msra.mxu1 %v14995_v36 }
0x14ea   :  { %14090 = vmatprep.subr.bf16.mxu0 %v14868_v9  ;;  %14120 = vmatprep.subr.bf16.mxu1 %v14868_v9 }
0x14ed   :  { %14092 = vmatpush3.bf16.msra.mxu0 %v15170_v46  ;;  %14122 = vmatpush3.bf16.msra.mxu1 %v15010_v43 }
0x14ee   :  { %14093 = vmatprep.subr.bf16.mxu0 %v14868_v9  ;;  %14123 = vmatprep.subr.bf16.mxu1 %v14868_v9 }
0x14f1   :  { %14095 = vmatpush3.bf16.msra.mxu0 %v15198_v23  ;;  %14125 = vmatpush3.bf16.msra.mxu1 %v15032_v52 }
0x14f2   :  { %14096 = vmatprep.subr.bf16.mxu0 %v14868_v9  ;;  %14126 = vmatprep.subr.bf16.mxu1 %v14868_v9 }
0x14f5   :  { %14098 = vmatpush3.bf16.msra.mxu0 %v15216_v34  ;;  %14128 = vmatpush3.bf16.msra.mxu1 %v15059_v63 }
0x14f6   :  { %14099 = vmatprep.subr.bf16.mxu0 %v14868_v9  ;;  %14129 = vmatprep.subr.bf16.mxu1 %v14868_v9 }
0x14f9   :  { %14101 = vmatpush3.bf16.msra.mxu0 %v15232_v11  ;;  %14131 = vmatpush3.bf16.msra.mxu1 %v15085_v3 }
0x14fa   :  { %14102 = vmatprep.subr.bf16.mxu0 %v14868_v9  ;;  %14156 = vmatprep.subr.bf16.mxu1 %v14868_v9 }
0x14fc   :  { %12446 = vmatmul.mubr.f32.vlgmr.msra.gmra.mrb[42].mxu1 %v6411_v2 }
0x14fd   :  { %14104 = vmatpush3.bf16.msra.mxu0 %v15242_v55  ;;  %14158 = vmatpush3.bf16.msra.mxu1 %v14969_v21 }
0x14fe   :  { %14105 = vmatprep.subr.bf16.mxu0 %v14868_v9  ;;  %14159 = vmatprep.subr.bf16.mxu1 %v14868_v9 }
0x14ff   :  { %12515 = vmatprep.mubr.msk.f32.mxu1 %vm14867_vm0, %v14866_v0 }
0x1501   :  { %14107 = vmatpush3.bf16.msra.mxu0 %v15252_v1  ;;  %14161 = vmatpush3.bf16.msra.mxu1 %v14975_v26 }
0x1502   :  { %14132 = vmatprep.subr.bf16.mxu0 %v14868_v9  ;;  %14162 = vmatprep.subr.bf16.mxu1 %v14868_v9 }
0x1504   :  { %12411 = vmatmul.mubr.f32.vlgmr.msra.gmra.mrb[38].mxu0 %v6410_v47 }
0x1505   :  { %14134 = vmatpush3.bf16.msra.mxu0 %v15262_v37  ;;  %14164 = vmatpush3.bf16.msra.mxu1 %v14984_v31 }
0x1506   :  { %14135 = vmatprep.subr.bf16.mxu0 %v14868_v9  ;;  %14165 = vmatprep.subr.bf16.mxu1 %v14868_v9 }
0x1507   :  { %12480 = vmatprep.mubr.msk.f32.mxu0 %vm14867_vm0, %v14866_v0 }
0x1509   :  { %14137 = vmatpush3.bf16.msra.mxu0 %v15274_v41  ;;  %14167 = vmatpush3.bf16.msra.mxu1 %v14995_v36 }
0x150a   :  { %14138 = vmatprep.subr.bf16.mxu0 %v14868_v9  ;;  %14168 = vmatprep.subr.bf16.mxu1 %v14868_v9 }
0x150d   :  { %14140 = vmatpush3.bf16.msra.mxu0 %v15288_v42  ;;  %14170 = vmatpush3.bf16.msra.mxu1 %v15010_v43 }
0x150e   :  { %14141 = vmatprep.subr.bf16.mxu0 %v14868_v9  ;;  %14171 = vmatprep.subr.bf16.mxu1 %v14868_v9 }
0x1511   :  { %14143 = vmatpush3.bf16.msra.mxu0 %v15298_v48  ;;  %14173 = vmatpush3.bf16.msra.mxu1 %v15032_v52 }
0x1512   :  { %14144 = vmatprep.subr.bf16.mxu0 %v14868_v9  ;;  %14174 = vmatprep.subr.bf16.mxu1 %v14868_v9 }
0x1515   :  { %14146 = vmatpush3.bf16.msra.mxu0 %v15308_v49  ;;  %14176 = vmatpush3.bf16.msra.mxu1 %v15059_v63 }
0x1516   :  { %14147 = vmatprep.subr.bf16.mxu0 %v14868_v9  ;;  %14177 = vmatprep.subr.bf16.mxu1 %v14868_v9 }
0x1519   :  { %14149 = vmatpush3.bf16.msra.mxu0 %v15318_v50  ;;  %14179 = vmatpush3.bf16.msra.mxu1 %v15085_v3 }
0x151a   :  { %14150 = vmatprep.subr.bf16.mxu0 %v14868_v9  ;;  %14216 = vmatprep.subr.bf16.mxu1 %v14868_v9 }
0x151c   :  { %12516 = vmatmul.mubr.f32.vlgmr.msra.gmra.mrb[44].mxu1 %v16108_v30 }
0x151d   :  { %14152 = vmatpush3.bf16.msra.mxu0 %v15328_v51  ;;  %14218 = vmatpush3.bf16.msra.mxu1 %v14969_v21 }
0x151e   :  { %14153 = vmatprep.subr.bf16.mxu0 %v14868_v9  ;;  %14219 = vmatprep.subr.bf16.mxu1 %v14868_v9 }
0x151f   :  { %12616 = vmatprep.mubr.msk.f32.mxu1 %vm14867_vm0, %v14866_v0 }
0x1521   :  { %14155 = vmatpush3.bf16.msra.mxu0 %v15338_v58  ;;  %14221 = vmatpush3.bf16.msra.mxu1 %v14975_v26 }
0x1522   :  { %14180 = vmatprep.subr.bf16.mxu0 %v14868_v9  ;;  %14222 = vmatprep.subr.bf16.mxu1 %v14868_v9 }
0x1524   :  { %12481 = vmatmul.mubr.f32.vlgmr.msra.gmra.mrb[40].mxu0 %v16108_v30 }
0x1525   :  { %14182 = vmatpush3.bf16.msra.mxu0 %v15398_v27  ;;  %12526 = vmatprep.mubr.msk.f32.mxu0 %vm14867_vm0, %v14866_v0 }
0x1526   :  { %14183 = vmatprep.subr.bf16.mxu0 %v14868_v9  ;;  %14224 = vmatpush3.bf16.msra.mxu1 %v14984_v31 }
0x1527   :  { %14225 = vmatprep.subr.bf16.mxu1 %v14868_v9 }
0x1529   :  { %14185 = vmatpush3.bf16.msra.mxu0 %v15402_v16 }
0x152a   :  { %14186 = vmatprep.subr.bf16.mxu0 %v14868_v9  ;;  %14227 = vmatpush3.bf16.msra.mxu1 %v14995_v36 }
0x152b   :  { %14228 = vmatprep.subr.bf16.mxu1 %v14868_v9 }
0x152e   :  { %14230 = vmatpush3.bf16.msra.mxu1 %v15010_v43 }
0x152f   :  { %14231 = vmatprep.subr.bf16.mxu1 %v14868_v9 }
0x1532   :  { %14233 = vmatpush3.bf16.msra.mxu1 %v15032_v52 }
0x1533   :  { %14234 = vmatprep.subr.bf16.mxu1 %v14868_v9 }
0x1536   :  { %14236 = vmatpush3.bf16.msra.mxu1 %v15059_v63 }
0x1537   :  { %14237 = vmatprep.subr.bf16.mxu1 %v14868_v9 }
0x153a   :  { %14239 = vmatpush3.bf16.msra.mxu1 %v15085_v3 }
0x153b   :  { %14264 = vmatprep.subr.bf16.mxu1 %v14868_v9 }
0x15af   :  { %v6566_v62 = vpop.f32.mrb[40].mxu1 }
0x15b0   :  { %v12377_v4 = vpop.f32.mrb[41].mxu1 }
0x15b7   :  { %v6415_v13 = vpop.f32.mrb[36].mxu0 }
0x15b8   :  { %v6567_v14 = vadd.f32 %v6566_v62, %v6415_v13  ;;  %v12342_v15 = vpop.f32.mrb[37].mxu0 }
0x15cf   :  { %v6759_v59 = vpop.f32.mrb[42].mxu1 }
0x15d0   :  { %v12447_v28 = vpop.f32.mrb[43].mxu1 }
0x15d7   :  { %v6670_v7 = vpop.f32.mrb[38].mxu0 }
0x15d8   :  { %v6671_v22 = vadd.f32 %v6670_v7, %v6567_v14  ;;  %v12412_v39 = vpop.f32.mrb[39].mxu0 }
0x15da   :  { %v6760_v40 = vadd.f32 %v6759_v59, %v6671_v22 }
0x15ef   :  { %v6965_v60 = vpop.f32.mrb[44].mxu1 }
0x15f0   :  { %v12517_v53 = vpop.f32.mrb[45].mxu1 }
0x15f7   :  { %v6878_v29 = vpop.f32.mrb[40].mxu0 }
0x15f8   :  { %v6879_v30 = vadd.f32 %v6878_v29, %v6760_v40  ;;  %v12482_v6 = vpop.f32.mrb[41].mxu0 }
0x15fa   :  { %v6966_v47 = vadd.f32 %v6965_v60, %v6879_v30 }
0x15fc   :  { %v6969_v2 = vadd.f32 %v15389_v8, %v6966_v47 }
0x15fe   :  { %14718 = vtanh.f32 %v6969_v2  ;;  %v9827_v54 = vmul.f32 -1.442695, %v6969_v2 }
0x1600   :  { %14720 = vpow2.f32 %v9827_v54 }
0x1608   :  { %v14719_v33 = vpop.eup %14718 }
0x1609   :  { %6979 = vrot.lane.b32.xlu0 %v14719_v33, %s14869_s3 }
0x160a   :  { %v14721_v62 = vpop.eup %14720 }
0x160b   :  { %v6973_v4 = vadd.f32 1.0, %v14721_v62 }
0x160d   :  { %14722 = vrcp.f32 %v6973_v4 }
0x1617   :  { %v14723_v13 = vpop.eup %14722 }
0x1618   :  { %v6977_v59 = vmul.f32 %v14723_v13, %v16054_v20 }
0x167b   :  { %v6980_v14 = vpop.permute.xlu0 %6979 }
0x167c   :  { %v6982_v15 = vmul.f32 %v14723_v13, %v6980_v14 }
0x167e   :  { %6984 = vrot.lane.b32.xlu1 %v6982_v15, %s14870_s15 }
0x16f0   :  { %v6985_v28 = vpop.permute.xlu1 %6984 }
0x16f1   :  { %v16214_v7 = vadd.f32 %v6985_v28, %v6977_v59 }
0x16f3   :  { %14724 = vtanh.f32 %v16214_v7 }
0x16fd   :  { %v14725_v22 = vpop.eup %14724 }
0x16fe   :  { %6990 = vrot.lane.b32.xlu0 %v14725_v22, %s14869_s3 }
0x1770   :  { %v6991_v39 = vpop.permute.xlu0 %6990 }
0x1771   :  { %v6993_v40 = vmul.f32 %v14723_v13, %v6991_v39 }
0x1773   :  { %6995 = vrot.lane.b32.xlu1 %v6993_v40, %s14870_s15 }
0x17e5   :  { %v6996_v60 = vpop.permute.xlu1 %6995 }
0x17e6   :  { %v6997_v53 = vsel %vm1207_vm2, %v6996_v60, 0 }
0x17e7   :  { %v7068_v29 = vand.u32 4294901760, %v6997_v53 }
0x17e9   :  { %v7069_v30 = vsub.f32 %v6997_v53, %v7068_v29 }
0x17eb   :  { %v7070_v6 = vand.u32 4294901760, %v7069_v30 }
0x17ed   :  { %v7071_v47 = vsub.f32 %v7069_v30, %v7070_v6 }
0x17ef   :  { %v7072_v20 = vand.u32 4294901760, %v7071_v47 }
0x17f1   :  { %12527 = vmatmul.mubr.f32.vlgmr.msra.gmra.mrb[42].mxu0 %v7072_v20 }
0x17f2   :  { %14188 = vmatpush3.bf16.msra.mxu0 %v15406_v61  ;;  %12537 = vmatprep.mubr.msk.f32.mxu0 %vm14867_vm0, %v14866_v0 }
0x17f3   :  { %14189 = vmatprep.subr.bf16.mxu0 %v14868_v9 }
0x17f6   :  { %14191 = vmatpush3.bf16.msra.mxu0 %v15409_v17 }
0x17f7   :  { %14192 = vmatprep.subr.bf16.mxu0 %v14868_v9 }
0x17f9   :  { %12538 = vmatmul.mubr.f32.vlgmr.msra.gmra.mrb[42].mxu0 %v7068_v29 }
0x17fa   :  { %14194 = vmatpush3.bf16.msra.mxu0 %v15411_v18  ;;  %12548 = vmatprep.mubr.msk.f32.mxu0 %vm14867_vm0, %v14866_v0 }
0x17fb   :  { %14195 = vmatprep.subr.bf16.mxu0 %v14868_v9 }
0x17fe   :  { %14197 = vmatpush3.bf16.msra.mxu0 %v15413_v5 }
0x17ff   :  { %14198 = vmatprep.subr.bf16.mxu0 %v14868_v9 }
0x1801   :  { %12549 = vmatmul.mubr.f32.vlgmr.msra.gmra.mrb[42].mxu0 %v7069_v30 }
0x1802   :  { %14200 = vmatpush3.bf16.msra.mxu0 %v15398_v27  ;;  %12559 = vmatprep.mubr.msk.f32.mxu0 %vm14867_vm0, %v14866_v0 }
0x1803   :  { %14201 = vmatprep.subr.bf16.mxu0 %v14868_v9 }
0x1806   :  { %14203 = vmatpush3.bf16.msra.mxu0 %v15402_v16 }
0x1807   :  { %14204 = vmatprep.subr.bf16.mxu0 %v14868_v9 }
0x1809   :  { %12560 = vmatmul.mubr.f32.vlgmr.msra.gmra.mrb[42].mxu0 %v7070_v6 }
0x180a   :  { %14206 = vmatpush3.bf16.msra.mxu0 %v15415_v44  ;;  %12570 = vmatprep.mubr.msk.f32.mxu0 %vm14867_vm0, %v14866_v0 }
0x180b   :  { %14207 = vmatprep.subr.bf16.mxu0 %v14868_v9 }
0x180e   :  { %14209 = vmatpush3.bf16.msra.mxu0 %v15417_v45 }
0x180f   :  { %14210 = vmatprep.subr.bf16.mxu0 %v14868_v9 }
0x1811   :  { %12571 = vmatmul.mubr.f32.vlgmr.msra.gmra.mrb[42].mxu0 %v7068_v29 }
0x1812   :  { %14212 = vmatpush3.bf16.msra.mxu0 %v15398_v27  ;;  %12581 = vmatprep.mubr.msk.f32.mxu0 %vm14867_vm0, %v14866_v0 }
0x1813   :  { %14213 = vmatprep.subr.bf16.mxu0 %v14868_v9 }
0x1816   :  { %14215 = vmatpush3.bf16.msra.mxu0 %v15402_v16 }
0x1817   :  { %14240 = vmatprep.subr.bf16.mxu0 %v14868_v9 }
0x1819   :  { %12582 = vmatmul.mubr.f32.vlgmr.msra.gmra.mrb[42].mxu0 %v7068_v29 }
0x181a   :  { %14242 = vmatpush3.bf16.msra.mxu0 %v15100_v19  ;;  %12651 = vmatprep.mubr.msk.f32.mxu0 %vm14867_vm0, %v14866_v0 }
0x181b   :  { %14243 = vmatprep.subr.bf16.mxu0 %v14868_v9 }
0x181e   :  { %14245 = vmatpush3.bf16.msra.mxu0 %v15127_v32 }
0x181f   :  { %14246 = vmatprep.subr.bf16.mxu0 %v14868_v9 }
0x1822   :  { %14248 = vmatpush3.bf16.msra.mxu0 %v15158_v57 }
0x1823   :  { %14249 = vmatprep.subr.bf16.mxu0 %v14868_v9 }
0x1826   :  { %14251 = vmatpush3.bf16.msra.mxu0 %v15173_v10 }
0x1827   :  { %14252 = vmatprep.subr.bf16.mxu0 %v14868_v9 }
0x182a   :  { %14254 = vmatpush3.bf16.msra.mxu0 %v15201_v25 }
0x182b   :  { %14255 = vmatprep.subr.bf16.mxu0 %v14868_v9 }
0x182e   :  { %14257 = vmatpush3.bf16.msra.mxu0 %v15220_v38 }
0x182f   :  { %14258 = vmatprep.subr.bf16.mxu0 %v14868_v9 }
0x1832   :  { %14260 = vmatpush3.bf16.msra.mxu0 %v15236_v12 }
0x1833   :  { %14261 = vmatprep.subr.bf16.mxu0 %v14868_v9 }
0x1836   :  { %14263 = vmatpush3.bf16.msra.mxu0 %v15246_v56 }
0x1837   :  { %14288 = vmatprep.subr.bf16.mxu0 %v14868_v9 }
0x18ec   :  { %v7480_v2 = vpop.f32.mrb[42].mxu0 }
0x18ed   :  { %7485 = vst [vmem:[#allocation10 + $0xa] sm:$0x3] %v7480_v2  ;;  %v16268_v33 = vand.u32 4294901760, %v7480_v2  ;;  %v12583_v54 = vpop.f32.mrb[43].mxu0 }
0x18ef   :  { %v7568_v62 = vsub.f32 %v7480_v2, %v16268_v33  ;;  %12652 = vmatmul.mubr.f32.vlgmr.msra.gmra.mrb[44].mxu0 %v16268_v33 }
0x18f0   :  { %14290 = vmatpush3.bf16.msra.mxu0 %v14969_v21  ;;  %12721 = vmatprep.mubr.msk.f32.mxu0 %vm14867_vm0, %v14866_v0 }
0x18f1   :  { %v7569_v4 = vand.u32 4294901760, %v7568_v62  ;;  %14291 = vmatprep.subr.bf16.mxu0 %v14868_v9 }
0x18f3   :  { %v7570_v13 = vsub.f32 %v7568_v62, %v7569_v4 }
0x18f4   :  { %14293 = vmatpush3.bf16.msra.mxu0 %v14975_v26 }
0x18f5   :  { %14294 = vmatprep.subr.bf16.mxu0 %v14868_v9  ;;  %v7571_v14 = vand.u32 4294901760, %v7570_v13 }
0x18f7   :  { %12617 = vmatmul.mubr.f32.vlgmr.msra.gmra.mrb[46].mxu1 %v7571_v14 }
0x18f8   :  { %14266 = vmatpush3.bf16.msra.mxu1 %v15108_v24  ;;  %14296 = vmatpush3.bf16.msra.mxu0 %v14984_v31 }
0x18f9   :  { %14267 = vmatprep.subr.bf16.mxu1 %v14868_v9  ;;  %14297 = vmatprep.subr.bf16.mxu0 %v14868_v9 }
0x18fa   :  { %12686 = vmatprep.mubr.msk.f32.mxu1 %vm14867_vm0, %v14866_v0 }
0x18fc   :  { %14269 = vmatpush3.bf16.msra.mxu1 %v15138_v35  ;;  %14299 = vmatpush3.bf16.msra.mxu0 %v14995_v36 }
0x18fd   :  { %14270 = vmatprep.subr.bf16.mxu1 %v14868_v9  ;;  %14300 = vmatprep.subr.bf16.mxu0 %v14868_v9 }
0x1900   :  { %14272 = vmatpush3.bf16.msra.mxu1 %v15170_v46  ;;  %14302 = vmatpush3.bf16.msra.mxu0 %v15010_v43 }
0x1901   :  { %14273 = vmatprep.subr.bf16.mxu1 %v14868_v9  ;;  %14303 = vmatprep.subr.bf16.mxu0 %v14868_v9 }
0x1904   :  { %14275 = vmatpush3.bf16.msra.mxu1 %v15198_v23  ;;  %14305 = vmatpush3.bf16.msra.mxu0 %v15032_v52 }
0x1905   :  { %14276 = vmatprep.subr.bf16.mxu1 %v14868_v9  ;;  %14306 = vmatprep.subr.bf16.mxu0 %v14868_v9 }
0x1908   :  { %14278 = vmatpush3.bf16.msra.mxu1 %v15216_v34  ;;  %14308 = vmatpush3.bf16.msra.mxu0 %v15059_v63 }
0x1909   :  { %14279 = vmatprep.subr.bf16.mxu1 %v14868_v9  ;;  %14309 = vmatprep.subr.bf16.mxu0 %v14868_v9 }
0x190c   :  { %14281 = vmatpush3.bf16.msra.mxu1 %v15232_v11  ;;  %14311 = vmatpush3.bf16.msra.mxu0 %v15085_v3 }
0x190d   :  { %14282 = vmatprep.subr.bf16.mxu1 %v14868_v9  ;;  %14336 = vmatprep.subr.bf16.mxu0 %v14868_v9 }
0x190f   :  { %12722 = vmatmul.mubr.f32.vlgmr.msra.gmra.mrb[46].mxu0 %v7569_v4 }
0x1910   :  { %14284 = vmatpush3.bf16.msra.mxu1 %v15242_v55  ;;  %14338 = vmatpush3.bf16.msra.mxu0 %v14969_v21 }
0x1911   :  { %14285 = vmatprep.subr.bf16.mxu1 %v14868_v9  ;;  %14339 = vmatprep.subr.bf16.mxu0 %v14868_v9 }
0x1912   :  { %12791 = vmatprep.mubr.msk.f32.mxu0 %vm14867_vm0, %v14866_v0 }
0x1914   :  { %14287 = vmatpush3.bf16.msra.mxu1 %v15252_v1  ;;  %14341 = vmatpush3.bf16.msra.mxu0 %v14975_v26 }
0x1915   :  { %14312 = vmatprep.subr.bf16.mxu1 %v14868_v9  ;;  %14342 = vmatprep.subr.bf16.mxu0 %v14868_v9 }
0x1917   :  { %12687 = vmatmul.mubr.f32.vlgmr.msra.gmra.mrb[48].mxu1 %v7568_v62 }
0x1918   :  { %14314 = vmatpush3.bf16.msra.mxu1 %v15262_v37  ;;  %14344 = vmatpush3.bf16.msra.mxu0 %v14984_v31 }
0x1919   :  { %14315 = vmatprep.subr.bf16.mxu1 %v14868_v9  ;;  %14345 = vmatprep.subr.bf16.mxu0 %v14868_v9 }
0x191a   :  { %12756 = vmatprep.mubr.msk.f32.mxu1 %vm14867_vm0, %v14866_v0 }
0x191c   :  { %14317 = vmatpush3.bf16.msra.mxu1 %v15274_v41  ;;  %14347 = vmatpush3.bf16.msra.mxu0 %v14995_v36 }
0x191d   :  { %14318 = vmatprep.subr.bf16.mxu1 %v14868_v9  ;;  %14348 = vmatprep.subr.bf16.mxu0 %v14868_v9 }
0x1920   :  { %14320 = vmatpush3.bf16.msra.mxu1 %v15288_v42  ;;  %14350 = vmatpush3.bf16.msra.mxu0 %v15010_v43 }
0x1921   :  { %14321 = vmatprep.subr.bf16.mxu1 %v14868_v9  ;;  %14351 = vmatprep.subr.bf16.mxu0 %v14868_v9 }
0x1924   :  { %14323 = vmatpush3.bf16.msra.mxu1 %v15298_v48  ;;  %14353 = vmatpush3.bf16.msra.mxu0 %v15032_v52 }
0x1925   :  { %14324 = vmatprep.subr.bf16.mxu1 %v14868_v9  ;;  %14354 = vmatprep.subr.bf16.mxu0 %v14868_v9 }
0x1928   :  { %14326 = vmatpush3.bf16.msra.mxu1 %v15308_v49  ;;  %14356 = vmatpush3.bf16.msra.mxu0 %v15059_v63 }
0x1929   :  { %14327 = vmatprep.subr.bf16.mxu1 %v14868_v9  ;;  %14357 = vmatprep.subr.bf16.mxu0 %v14868_v9 }
0x192c   :  { %14329 = vmatpush3.bf16.msra.mxu1 %v15318_v50  ;;  %14359 = vmatpush3.bf16.msra.mxu0 %v15085_v3 }
0x192d   :  { %14330 = vmatprep.subr.bf16.mxu1 %v14868_v9  ;;  %14396 = vmatprep.subr.bf16.mxu0 %v14868_v9 }
0x192f   :  { %12792 = vmatmul.mubr.f32.vlgmr.msra.gmra.mrb[48].mxu0 %v16268_v33 }
0x1930   :  { %14332 = vmatpush3.bf16.msra.mxu1 %v15328_v51  ;;  %14398 = vmatpush3.bf16.msra.mxu0 %v14969_v21 }
0x1931   :  { %14333 = vmatprep.subr.bf16.mxu1 %v14868_v9  ;;  %14399 = vmatprep.subr.bf16.mxu0 %v14868_v9 }
0x1932   :  { %12892 = vmatprep.mubr.msk.f32.mxu0 %vm14867_vm0, %v14866_v0 }
0x1934   :  { %14335 = vmatpush3.bf16.msra.mxu1 %v15338_v58  ;;  %14401 = vmatpush3.bf16.msra.mxu0 %v14975_v26 }
0x1935   :  { %14360 = vmatprep.subr.bf16.mxu1 %v14868_v9  ;;  %14402 = vmatprep.subr.bf16.mxu0 %v14868_v9 }
0x1937   :  { %12757 = vmatmul.mubr.f32.vlgmr.msra.gmra.mrb[50].mxu1 %v16268_v33 }
0x1938   :  { %14362 = vmatpush3.bf16.msra.mxu1 %v15398_v27  ;;  %12802 = vmatprep.mubr.msk.f32.mxu1 %vm14867_vm0, %v14866_v0 }
0x1939   :  { %14363 = vmatprep.subr.bf16.mxu1 %v14868_v9  ;;  %14404 = vmatpush3.bf16.msra.mxu0 %v14984_v31 }
0x193a   :  { %14405 = vmatprep.subr.bf16.mxu0 %v14868_v9 }
0x193c   :  { %14365 = vmatpush3.bf16.msra.mxu1 %v15402_v16 }
0x193d   :  { %14366 = vmatprep.subr.bf16.mxu1 %v14868_v9  ;;  %14407 = vmatpush3.bf16.msra.mxu0 %v14995_v36 }
0x193e   :  { %14408 = vmatprep.subr.bf16.mxu0 %v14868_v9 }
0x1941   :  { %14410 = vmatpush3.bf16.msra.mxu0 %v15010_v43 }
0x1942   :  { %14411 = vmatprep.subr.bf16.mxu0 %v14868_v9 }
0x1945   :  { %14413 = vmatpush3.bf16.msra.mxu0 %v15032_v52 }
0x1946   :  { %14414 = vmatprep.subr.bf16.mxu0 %v14868_v9 }
0x1949   :  { %14416 = vmatpush3.bf16.msra.mxu0 %v15059_v63 }
0x194a   :  { %14417 = vmatprep.subr.bf16.mxu0 %v14868_v9 }
0x194d   :  { %14419 = vmatpush3.bf16.msra.mxu0 %v15085_v3 }
0x194e   :  { %14444 = vmatprep.subr.bf16.mxu0 %v14868_v9 }
0x19c2   :  { %v7724_v15 = vpop.f32.mrb[44].mxu0 }
0x19c3   :  { %v12653_v59 = vpop.f32.mrb[45].mxu0 }
0x19ca   :  { %v7573_v28 = vpop.f32.mrb[46].mxu1 }
0x19cb   :  { %v7725_v22 = vadd.f32 %v7724_v15, %v7573_v28  ;;  %v12618_v39 = vpop.f32.mrb[47].mxu1 }
0x19e2   :  { %v7917_v40 = vpop.f32.mrb[46].mxu0 }
0x19e3   :  { %v12723_v60 = vpop.f32.mrb[47].mxu0 }
0x19ea   :  { %v7828_v53 = vpop.f32.mrb[48].mxu1 }
0x19eb   :  { %v7829_v29 = vadd.f32 %v7828_v53, %v7725_v22  ;;  %v12688_v30 = vpop.f32.mrb[49].mxu1 }
0x19ed   :  { %v7918_v6 = vadd.f32 %v7917_v40, %v7829_v29 }
0x1a02   :  { %v8123_v47 = vpop.f32.mrb[48].mxu0 }
0x1a03   :  { %v12793_v20 = vpop.f32.mrb[49].mxu0 }
0x1a0a   :  { %v8036_v2 = vpop.f32.mrb[50].mxu1 }
0x1a0b   :  { %v8037_v33 = vadd.f32 %v8036_v2, %v7918_v6  ;;  %v12758_v54 = vpop.f32.mrb[51].mxu1 }
0x1a0d   :  { %v8124_v62 = vadd.f32 %v8123_v47, %v8037_v33 }
0x1a0f   :  { %v8127_v4 = vadd.f32 %v15389_v8, %v8124_v62 }
0x1a11   :  { %14726 = vtanh.f32 %v8127_v4  ;;  %v9828_v14 = vmul.f32 -1.442695, %v8127_v4 }
0x1a13   :  { %14728 = vpow2.f32 %v9828_v14 }
0x1a1b   :  { %v14727_v13 = vpop.eup %14726 }
0x1a1c   :  { %8137 = vrot.lane.b32.xlu0 %v14727_v13, %s14869_s3 }
0x1a1d   :  { %v14729_v15 = vpop.eup %14728 }
0x1a1e   :  { %v8131_v59 = vadd.f32 1.0, %v14729_v15 }
0x1a20   :  { %14730 = vrcp.f32 %v8131_v59 }
0x1a2a   :  { %v14731_v28 = vpop.eup %14730 }
0x1a2b   :  { %v8135_v40 = vmul.f32 %v14731_v28, %v16214_v7 }
0x1a8e   :  { %v8138_v22 = vpop.permute.xlu0 %8137 }
0x1a8f   :  { %v8140_v39 = vmul.f32 %v14731_v28, %v8138_v22 }
0x1a91   :  { %8142 = vrot.lane.b32.xlu1 %v8140_v39, %s14870_s15 }
0x1b03   :  { %v8143_v60 = vpop.permute.xlu1 %8142 }
0x1b04   :  { %v16374_v53 = vadd.f32 %v8143_v60, %v8135_v40 }
0x1b06   :  { %14732 = vtanh.f32 %v16374_v53 }
0x1b10   :  { %v14733_v29 = vpop.eup %14732 }
0x1b11   :  { %8148 = vrot.lane.b32.xlu0 %v14733_v29, %s14869_s3 }
0x1b83   :  { %v8149_v30 = vpop.permute.xlu0 %8148 }
0x1b84   :  { %v8151_v6 = vmul.f32 %v14731_v28, %v8149_v30 }
0x1b86   :  { %8153 = vrot.lane.b32.xlu1 %v8151_v6, %s14870_s15 }
0x1bf8   :  { %v8154_v47 = vpop.permute.xlu1 %8153 }
0x1bf9   :  { %v8155_v20 = vsel %vm1207_vm2, %v8154_v47, 0 }
0x1bfa   :  { %v8226_v2 = vand.u32 4294901760, %v8155_v20 }
0x1bfc   :  { %v8227_v33 = vsub.f32 %v8155_v20, %v8226_v2 }
0x1bfe   :  { %v8228_v54 = vand.u32 4294901760, %v8227_v33 }
0x1c00   :  { %v8229_v62 = vsub.f32 %v8227_v33, %v8228_v54 }
0x1c02   :  { %v8230_v7 = vand.u32 4294901760, %v8229_v62 }
0x1c04   :  { %12803 = vmatmul.mubr.f32.vlgmr.msra.gmra.mrb[52].mxu1 %v8230_v7 }
0x1c05   :  { %14368 = vmatpush3.bf16.msra.mxu1 %v15406_v61  ;;  %12813 = vmatprep.mubr.msk.f32.mxu1 %vm14867_vm0, %v14866_v0 }
0x1c06   :  { %14369 = vmatprep.subr.bf16.mxu1 %v14868_v9 }
0x1c09   :  { %14371 = vmatpush3.bf16.msra.mxu1 %v15409_v17 }
0x1c0a   :  { %14372 = vmatprep.subr.bf16.mxu1 %v14868_v9 }
0x1c0c   :  { %12814 = vmatmul.mubr.f32.vlgmr.msra.gmra.mrb[52].mxu1 %v8226_v2 }
0x1c0d   :  { %14374 = vmatpush3.bf16.msra.mxu1 %v15411_v18  ;;  %12824 = vmatprep.mubr.msk.f32.mxu1 %vm14867_vm0, %v14866_v0 }
0x1c0e   :  { %14375 = vmatprep.subr.bf16.mxu1 %v14868_v9 }
0x1c11   :  { %14377 = vmatpush3.bf16.msra.mxu1 %v15413_v5 }
0x1c12   :  { %14378 = vmatprep.subr.bf16.mxu1 %v14868_v9 }
0x1c14   :  { %12825 = vmatmul.mubr.f32.vlgmr.msra.gmra.mrb[52].mxu1 %v8227_v33 }
0x1c15   :  { %14380 = vmatpush3.bf16.msra.mxu1 %v15398_v27  ;;  %12835 = vmatprep.mubr.msk.f32.mxu1 %vm14867_vm0, %v14866_v0 }
0x1c16   :  { %14381 = vmatprep.subr.bf16.mxu1 %v14868_v9 }
0x1c19   :  { %14383 = vmatpush3.bf16.msra.mxu1 %v15402_v16 }
0x1c1a   :  { %14384 = vmatprep.subr.bf16.mxu1 %v14868_v9 }
0x1c1c   :  { %12836 = vmatmul.mubr.f32.vlgmr.msra.gmra.mrb[52].mxu1 %v8228_v54 }
0x1c1d   :  { %14386 = vmatpush3.bf16.msra.mxu1 %v15415_v44  ;;  %12846 = vmatprep.mubr.msk.f32.mxu1 %vm14867_vm0, %v14866_v0 }
0x1c1e   :  { %14387 = vmatprep.subr.bf16.mxu1 %v14868_v9 }
0x1c21   :  { %14389 = vmatpush3.bf16.msra.mxu1 %v15417_v45 }
0x1c22   :  { %14390 = vmatprep.subr.bf16.mxu1 %v14868_v9 }
0x1c24   :  { %12847 = vmatmul.mubr.f32.vlgmr.msra.gmra.mrb[52].mxu1 %v8226_v2 }
0x1c25   :  { %14392 = vmatpush3.bf16.msra.mxu1 %v15398_v27  ;;  %12857 = vmatprep.mubr.msk.f32.mxu1 %vm14867_vm0, %v14866_v0 }
0x1c26   :  { %14393 = vmatprep.subr.bf16.mxu1 %v14868_v9 }
0x1c29   :  { %14395 = vmatpush3.bf16.msra.mxu1 %v15402_v16 }
0x1c2a   :  { %14420 = vmatprep.subr.bf16.mxu1 %v14868_v9 }
0x1c2c   :  { %12858 = vmatmul.mubr.f32.vlgmr.msra.gmra.mrb[52].mxu1 %v8226_v2 }
0x1c2d   :  { %14422 = vmatpush3.bf16.msra.mxu1 %v15100_v19  ;;  %12927 = vmatprep.mubr.msk.f32.mxu1 %vm14867_vm0, %v14866_v0 }
0x1c2e   :  { %14423 = vmatprep.subr.bf16.mxu1 %v14868_v9 }
0x1c31   :  { %14425 = vmatpush3.bf16.msra.mxu1 %v15127_v32 }
0x1c32   :  { %14426 = vmatprep.subr.bf16.mxu1 %v14868_v9 }
0x1c35   :  { %14428 = vmatpush3.bf16.msra.mxu1 %v15158_v57 }
0x1c36   :  { %14429 = vmatprep.subr.bf16.mxu1 %v14868_v9 }
0x1c39   :  { %14431 = vmatpush3.bf16.msra.mxu1 %v15173_v10 }
0x1c3a   :  { %14432 = vmatprep.subr.bf16.mxu1 %v14868_v9 }
0x1c3d   :  { %14434 = vmatpush3.bf16.msra.mxu1 %v15201_v25 }
0x1c3e   :  { %14435 = vmatprep.subr.bf16.mxu1 %v14868_v9 }
0x1c41   :  { %14437 = vmatpush3.bf16.msra.mxu1 %v15220_v38 }
0x1c42   :  { %14438 = vmatprep.subr.bf16.mxu1 %v14868_v9 }
0x1c45   :  { %14440 = vmatpush3.bf16.msra.mxu1 %v15236_v12 }
0x1c46   :  { %14441 = vmatprep.subr.bf16.mxu1 %v14868_v9 }
0x1c49   :  { %14443 = vmatpush3.bf16.msra.mxu1 %v15246_v56 }
0x1c4a   :  { %14468 = vmatprep.subr.bf16.mxu1 %v14868_v9 }
0x1cff   :  { %v8638_v19 = vpop.f32.mrb[52].mxu1 }
0x1d00   :  { %8643 = vst [vmem:[#allocation10 + $0xc] sm:$0x3] %v8638_v19  ;;  %v16428_v32 = vand.u32 4294901760, %v8638_v19  ;;  %v12859_v57 = vpop.f32.mrb[53].mxu1 }
0x1d02   :  { %v8726_v10 = vsub.f32 %v8638_v19, %v16428_v32  ;;  %12928 = vmatmul.mubr.f32.vlgmr.msra.gmra.mrb[54].mxu1 %v16428_v32 }
0x1d03   :  { %14470 = vmatpush3.bf16.msra.mxu1 %v14969_v21  ;;  %12997 = vmatprep.mubr.msk.f32.mxu1 %vm14867_vm0, %v14866_v0 }
0x1d04   :  { %v8727_v25 = vand.u32 4294901760, %v8726_v10  ;;  %14471 = vmatprep.subr.bf16.mxu1 %v14868_v9 }
0x1d06   :  { %v8728_v38 = vsub.f32 %v8726_v10, %v8727_v25 }
0x1d07   :  { %14473 = vmatpush3.bf16.msra.mxu1 %v14975_v26 }
0x1d08   :  { %14474 = vmatprep.subr.bf16.mxu1 %v14868_v9  ;;  %v8729_v12 = vand.u32 4294901760, %v8728_v38 }
0x1d0a   :  { %12893 = vmatmul.mubr.f32.vlgmr.msra.gmra.mrb[50].mxu0 %v8729_v12 }
0x1d0b   :  { %14446 = vmatpush3.bf16.msra.mxu0 %v15108_v24  ;;  %14476 = vmatpush3.bf16.msra.mxu1 %v14984_v31 }
0x1d0c   :  { %14447 = vmatprep.subr.bf16.mxu0 %v14868_v9  ;;  %14477 = vmatprep.subr.bf16.mxu1 %v14868_v9 }
0x1d0d   :  { %12962 = vmatprep.mubr.msk.f32.mxu0 %vm14867_vm0, %v14866_v0 }
0x1d0f   :  { %14449 = vmatpush3.bf16.msra.mxu0 %v15138_v35  ;;  %14479 = vmatpush3.bf16.msra.mxu1 %v14995_v36 }
0x1d10   :  { %14450 = vmatprep.subr.bf16.mxu0 %v14868_v9  ;;  %14480 = vmatprep.subr.bf16.mxu1 %v14868_v9 }
0x1d13   :  { %14452 = vmatpush3.bf16.msra.mxu0 %v15170_v46  ;;  %14482 = vmatpush3.bf16.msra.mxu1 %v15010_v43 }
0x1d14   :  { %14453 = vmatprep.subr.bf16.mxu0 %v14868_v9  ;;  %14483 = vmatprep.subr.bf16.mxu1 %v14868_v9 }
0x1d17   :  { %14455 = vmatpush3.bf16.msra.mxu0 %v15198_v23  ;;  %14485 = vmatpush3.bf16.msra.mxu1 %v15032_v52 }
0x1d18   :  { %14456 = vmatprep.subr.bf16.mxu0 %v14868_v9  ;;  %14486 = vmatprep.subr.bf16.mxu1 %v14868_v9 }
0x1d1b   :  { %14458 = vmatpush3.bf16.msra.mxu0 %v15216_v34  ;;  %14488 = vmatpush3.bf16.msra.mxu1 %v15059_v63 }
0x1d1c   :  { %14459 = vmatprep.subr.bf16.mxu0 %v14868_v9  ;;  %14489 = vmatprep.subr.bf16.mxu1 %v14868_v9 }
0x1d1f   :  { %14461 = vmatpush3.bf16.msra.mxu0 %v15232_v11  ;;  %14491 = vmatpush3.bf16.msra.mxu1 %v15085_v3 }
0x1d20   :  { %14462 = vmatprep.subr.bf16.mxu0 %v14868_v9  ;;  %14516 = vmatprep.subr.bf16.mxu1 %v14868_v9 }
0x1d22   :  { %12998 = vmatmul.mubr.f32.vlgmr.msra.gmra.mrb[56].mxu1 %v8727_v25 }
0x1d23   :  { %14464 = vmatpush3.bf16.msra.mxu0 %v15242_v55  ;;  %14518 = vmatpush3.bf16.msra.mxu1 %v14969_v21 }
0x1d24   :  { %14465 = vmatprep.subr.bf16.mxu0 %v14868_v9  ;;  %14519 = vmatprep.subr.bf16.mxu1 %v14868_v9 }
0x1d25   :  { %13067 = vmatprep.mubr.msk.f32.mxu1 %vm14867_vm0, %v14866_v0 }
0x1d27   :  { %14467 = vmatpush3.bf16.msra.mxu0 %v15252_v1  ;;  %14521 = vmatpush3.bf16.msra.mxu1 %v14975_v26 }
0x1d28   :  { %14492 = vmatprep.subr.bf16.mxu0 %v14868_v9  ;;  %14522 = vmatprep.subr.bf16.mxu1 %v14868_v9 }
0x1d2a   :  { %12963 = vmatmul.mubr.f32.vlgmr.msra.gmra.mrb[52].mxu0 %v8726_v10 }
0x1d2b   :  { %14494 = vmatpush3.bf16.msra.mxu0 %v15262_v37  ;;  %14524 = vmatpush3.bf16.msra.mxu1 %v14984_v31 }
0x1d2c   :  { %14495 = vmatprep.subr.bf16.mxu0 %v14868_v9  ;;  %14525 = vmatprep.subr.bf16.mxu1 %v14868_v9 }
0x1d2d   :  { %13032 = vmatprep.mubr.msk.f32.mxu0 %vm14867_vm0, %v14866_v0 }
0x1d2f   :  { %14497 = vmatpush3.bf16.msra.mxu0 %v15274_v41  ;;  %14527 = vmatpush3.bf16.msra.mxu1 %v14995_v36 }
0x1d30   :  { %14498 = vmatprep.subr.bf16.mxu0 %v14868_v9  ;;  %14528 = vmatprep.subr.bf16.mxu1 %v14868_v9 }
0x1d33   :  { %14500 = vmatpush3.bf16.msra.mxu0 %v15288_v42  ;;  %14530 = vmatpush3.bf16.msra.mxu1 %v15010_v43 }
0x1d34   :  { %14501 = vmatprep.subr.bf16.mxu0 %v14868_v9  ;;  %14531 = vmatprep.subr.bf16.mxu1 %v14868_v9 }
0x1d37   :  { %14503 = vmatpush3.bf16.msra.mxu0 %v15298_v48  ;;  %14533 = vmatpush3.bf16.msra.mxu1 %v15032_v52 }
0x1d38   :  { %14504 = vmatprep.subr.bf16.mxu0 %v14868_v9  ;;  %14534 = vmatprep.subr.bf16.mxu1 %v14868_v9 }
0x1d3b   :  { %14506 = vmatpush3.bf16.msra.mxu0 %v15308_v49  ;;  %14536 = vmatpush3.bf16.msra.mxu1 %v15059_v63 }
0x1d3c   :  { %14507 = vmatprep.subr.bf16.mxu0 %v14868_v9  ;;  %14537 = vmatprep.subr.bf16.mxu1 %v14868_v9 }
0x1d3f   :  { %14509 = vmatpush3.bf16.msra.mxu0 %v15318_v50  ;;  %14539 = vmatpush3.bf16.msra.mxu1 %v15085_v3 }
0x1d40   :  { %14510 = vmatprep.subr.bf16.mxu0 %v14868_v9 }
0x1d42   :  { %13068 = vmatmul.mubr.f32.vlgmr.msra.gmra.mrb[58].mxu1 %v16428_v32 }
0x1d43   :  { %14512 = vmatpush3.bf16.msra.mxu0 %v15328_v51 }
0x1d44   :  { %14513 = vmatprep.subr.bf16.mxu0 %v14868_v9 }
0x1d47   :  { %14515 = vmatpush3.bf16.msra.mxu0 %v15338_v58 }
0x1d48   :  { %14540 = vmatprep.subr.bf16.mxu0 %v14868_v9 }
0x1d4a   :  { %13033 = vmatmul.mubr.f32.vlgmr.msra.gmra.mrb[54].mxu0 %v16428_v32 }
0x1d4b   :  { %14542 = vmatpush3.bf16.msra.mxu0 %v15398_v27  ;;  %13078 = vmatprep.mubr.msk.f32.mxu0 %vm14867_vm0, %v14866_v0 }
0x1d4c   :  { %14543 = vmatprep.subr.bf16.mxu0 %v14868_v9 }
0x1d4f   :  { %14545 = vmatpush3.bf16.msra.mxu0 %v15402_v16 }
0x1d50   :  { %14546 = vmatprep.subr.bf16.mxu0 %v14868_v9 }
0x1dd5   :  { %v8882_v21 = vpop.f32.mrb[54].mxu1 }
0x1dd6   :  { %v12929_v26 = vpop.f32.mrb[55].mxu1 }
0x1ddd   :  { %v8731_v31 = vpop.f32.mrb[50].mxu0 }
0x1dde   :  { %v8883_v36 = vadd.f32 %v8882_v21, %v8731_v31  ;;  %v12894_v43 = vpop.f32.mrb[51].mxu0 }
0x1df5   :  { %v9075_v52 = vpop.f32.mrb[56].mxu1 }
0x1df6   :  { %v12999_v63 = vpop.f32.mrb[57].mxu1 }
0x1dfd   :  { %v8986_v3 = vpop.f32.mrb[52].mxu0 }
0x1dfe   :  { %v8987_v24 = vadd.f32 %v8986_v3, %v8883_v36  ;;  %v12964_v35 = vpop.f32.mrb[53].mxu0 }
0x1e00   :  { %v9076_v46 = vadd.f32 %v9075_v52, %v8987_v24 }
0x1e15   :  { %v9281_v23 = vpop.f32.mrb[58].mxu1 }
0x1e16   :  { %v13069_v34 = vpop.f32.mrb[59].mxu1 }
0x1e1d   :  { %v9194_v11 = vpop.f32.mrb[54].mxu0 }
0x1e1e   :  { %v9195_v55 = vadd.f32 %v9194_v11, %v9076_v46  ;;  %v13034_v56 = vpop.f32.mrb[55].mxu0 }
0x1e20   :  { %v9282_v1 = vadd.f32 %v9281_v23, %v9195_v55 }
0x1e22   :  { %v9285_v37 = vadd.f32 %v15389_v8, %v9282_v1 }
0x1e24   :  { %14734 = vtanh.f32 %v9285_v37  ;;  %v9829_v42 = vmul.f32 -1.442695, %v9285_v37 }
0x1e26   :  { %14736 = vpow2.f32 %v9829_v42 }
0x1e2e   :  { %v14735_v41 = vpop.eup %14734 }
0x1e2f   :  { %9295 = vrot.lane.b32.xlu0 %v14735_v41, %s14869_s3 }
0x1e30   :  { %v14737_v48 = vpop.eup %14736 }
0x1e31   :  { %v9289_v49 = vadd.f32 1.0, %v14737_v48 }
0x1e33   :  { %14738 = vrcp.f32 %v9289_v49 }
0x1e3d   :  { %v14739_v50 = vpop.eup %14738 }
0x1e3e   :  { %v9293_v4 = vmul.f32 %v14739_v50, %v16374_v53 }
0x1ea1   :  { %v9296_v51 = vpop.permute.xlu0 %9295 }
0x1ea2   :  { %v9298_v58 = vmul.f32 %v14739_v50, %v9296_v51 }
0x1ea4   :  { %9300 = vrot.lane.b32.xlu1 %v9298_v58, %s14870_s15 }
0x1f16   :  { %v9301_v13 = vpop.permute.xlu1 %9300 }
0x1f17   :  { %v9303_v14 = vadd.f32 %v9301_v13, %v9293_v4 }
0x1f19   :  { %14740 = vtanh.f32 %v9303_v14 }
0x1f23   :  { %v14741_v8 = vpop.eup %14740 }
0x1f24   :  { %9306 = vrot.lane.b32.xlu0 %v14741_v8, %s14869_s3 }
0x1f96   :  { %v9307_v15 = vpop.permute.xlu0 %9306 }
0x1f97   :  { %v9309_v59 = vmul.f32 %v14739_v50, %v9307_v15 }
0x1f99   :  { %9311 = vrot.lane.b32.xlu1 %v9309_v59, %s14870_s15 }
0x200b   :  { %v9312_v28 = vpop.permute.xlu1 %9311 }
0x200c   :  { %v9313_v22 = vsel %vm1207_vm2, %v9312_v28, 0 }
0x200d   :  { %v9384_v39 = vand.u32 4294901760, %v9313_v22 }
0x200f   :  { %v9385_v40 = vsub.f32 %v9313_v22, %v9384_v39 }
0x2011   :  { %v9386_v60 = vand.u32 4294901760, %v9385_v40 }
0x2013   :  { %v9387_v29 = vsub.f32 %v9385_v40, %v9386_v60 }
0x2015   :  { %v9388_v30 = vand.u32 4294901760, %v9387_v29 }
0x2017   :  { %13079 = vmatmul.mubr.f32.vlgmr.msra.gmra.mrb[56].mxu0 %v9388_v30 }
0x2018   :  { %14548 = vmatpush3.bf16.msra.mxu0 %v15406_v61  ;;  %13089 = vmatprep.mubr.msk.f32.mxu0 %vm14867_vm0, %v14866_v0 }
0x2019   :  { %14549 = vmatprep.subr.bf16.mxu0 %v14868_v9 }
0x201c   :  { %14551 = vmatpush3.bf16.msra.mxu0 %v15409_v17 }
0x201d   :  { %14552 = vmatprep.subr.bf16.mxu0 %v14868_v9 }
0x201f   :  { %13090 = vmatmul.mubr.f32.vlgmr.msra.gmra.mrb[56].mxu0 %v9384_v39 }
0x2020   :  { %14554 = vmatpush3.bf16.msra.mxu0 %v15411_v18  ;;  %13100 = vmatprep.mubr.msk.f32.mxu0 %vm14867_vm0, %v14866_v0 }
0x2021   :  { %14555 = vmatprep.subr.bf16.mxu0 %v14868_v9 }
0x2024   :  { %14557 = vmatpush3.bf16.msra.mxu0 %v15413_v5 }
0x2025   :  { %14558 = vmatprep.subr.bf16.mxu0 %v14868_v9 }
0x2027   :  { %13101 = vmatmul.mubr.f32.vlgmr.msra.gmra.mrb[56].mxu0 %v9385_v40 }
0x2028   :  { %14560 = vmatpush3.bf16.msra.mxu0 %v15398_v27  ;;  %13111 = vmatprep.mubr.msk.f32.mxu0 %vm14867_vm0, %v14866_v0 }
0x2029   :  { %14561 = vmatprep.subr.bf16.mxu0 %v14868_v9 }
0x202c   :  { %14563 = vmatpush3.bf16.msra.mxu0 %v15402_v16 }
0x202d   :  { %14564 = vmatprep.subr.bf16.mxu0 %v14868_v9 }
0x202f   :  { %13112 = vmatmul.mubr.f32.vlgmr.msra.gmra.mrb[56].mxu0 %v9386_v60 }
0x2030   :  { %14566 = vmatpush3.bf16.msra.mxu0 %v15415_v44  ;;  %13122 = vmatprep.mubr.msk.f32.mxu0 %vm14867_vm0, %v14866_v0 }
0x2031   :  { %14567 = vmatprep.subr.bf16.mxu0 %v14868_v9 }
0x2034   :  { %14569 = vmatpush3.bf16.msra.mxu0 %v15417_v45 }
0x2035   :  { %14570 = vmatprep.subr.bf16.mxu0 %v14868_v9 }
0x2037   :  { %13123 = vmatmul.mubr.f32.vlgmr.msra.gmra.mrb[56].mxu0 %v9384_v39 }
0x2038   :  { %14572 = vmatpush3.bf16.msra.mxu0 %v15398_v27  ;;  %13133 = vmatprep.mubr.msk.f32.mxu0 %vm14867_vm0, %v14866_v0 }
0x2039   :  { %14573 = vmatprep.subr.bf16.mxu0 %v14868_v9 }
0x203c   :  { %14575 = vmatpush3.bf16.msra.mxu0 %v15402_v16 }
0x203f   :  { %13134 = vmatmul.mubr.f32.vlgmr.msra.gmra.mrb[56].mxu0 %v9384_v39 }
0x2112   :  { %v9796_v61 = vpop.f32.mrb[56].mxu0 }
0x2113   :  { %9801 = vst [vmem:[#allocation10 + $0xe] sm:$0x3] %v9796_v61  ;;  %v13135_v17 = vpop.f32.mrb[57].mxu0 }
0x2114   :  { %14841 = shalt.err (!%p14838_p8)
}
0x2115   :  { %s14842_s22 = scalar_lea.hbm %s16566_s5, 256 }
0x2116   :  { %p14843_p9 = scmp.ne.s32.totalorder %s16566_s5, %s14842_s22  ;;  %p14846_p10 = scmp.lt.u32.totalorder %s14842_s22, %s16566_s5 }
0x2118   :  { %p14848_p11 = pnand %p14846_p10, %p14843_p9 }
0x211a   :  { %14851 = shalt.err (!%p14848_p11)
}
0x211b   :  { %s14872_s0 = smov 2  }
0x211c   :  { %9813 = dma.vmem_to_hbm [thread:$0]  %s9808_s17, 256, %s16566_s5, [#allocation4], %s14870_s15, %s14870_s15, %s14872_s0  }
0x211d   :  { %14858 = dma.done.wait [#allocation4], 256  }
0x211e   :  { %14859 = vsyncadd [#allocation4], 4294967040 }
0x211f   :  { %9817 = vsyncpa [#allocation3], 1 }
0x2120   :  { %9818 = vsyncpa [#allocation6], 1 }
0x2121   :  { %9819 = vsyncpa [#allocation9], 1 }
0x2122   :  { %9820 = vsyncpa [#allocation4], 1 }

</bundles_post_ra>
